<compile_context>
chip_gen: v7x
topology: tpu7x:2x2x1
jax: 0.10.0
libtpu: 0.0.40
codegen_flags: <defaults>
</compile_context>

<pallas_src>
import numpy as np

import jax
import jax.numpy as jnp
from jax.experimental import pallas as pl
from jax.experimental.pallas import tpu as pltpu

# ---- synthetic model configuration (stands in for config.* / timm model) ----
BATCH = 2
CHANNELS = 3
IMG = 16
PATCH = 4
HIDDEN = 128          # self.vit.in_features (lane-aligned)
NUM_HEADS = 2
HEAD_DIM = HIDDEN // NUM_HEADS
DEPTH = 2
MLP = 256
EMBED = 128           # config.EMBEDDING_SIZE (lane-aligned)
NPATCH = (IMG // PATCH) * (IMG // PATCH)   # 16
NTOK = NPATCH + 1                          # + cls token = 17
NPAD = ((NTOK + 7) // 8) * 8               # 24 sublane-aligned tokens / image
PDIM = CHANNELS * PATCH * PATCH            # 48
PDIM_PAD = 128                             # lane-aligned patch-vector length

# Images folded into the token/sublane axis per grid step; grid = BATCH // IMGS_PER_STEP.
# BATCH (fold everything, grid=(1,)) is fastest on single-TC v5e/v6e.
# TODO(synk): on v7x use IMGS_PER_STEP = BATCH // 2 to occupy both TensorCores.
IMGS_PER_STEP = BATCH
NTOT = IMGS_PER_STEP * NPAD                # tokens per grid step (48)

# Row layout of the packed per-layer vector array `vec` (DEPTH, NVEC, MLP);
# HIDDEN-wide entries live in lanes [0:HIDDEN].
ROW_LN1_G, ROW_LN1_B, ROW_LN2_G, ROW_LN2_B = 0, 1, 2, 3
ROW_PROJ_B, ROW_FC2_B = 4, 5
ROW_Q_B, ROW_K_B, ROW_V_B = 6, 7, 8
ROW_FC1_B = 9
NVEC = 10


def _layer_norm(x, g, b, eps=1e-6):
    mu = jnp.mean(x, axis=-1, keepdims=True)
    var = jnp.mean(jnp.square(x - mu), axis=-1, keepdims=True)
    return (x - mu) * jax.lax.rsqrt(var + eps) * g + b


def encoder_kernel(x_ref, patch_w_ref, tok_add_ref, mask_ref,
                   qkv_w_ref, proj_w_ref, fc1_w_ref, fc2_w_ref, vec_ref,
                   emb_w_ref, head_vec_ref, out_ref):
    D, HD = HIDDEN, HEAD_DIM

    # --- patch embedding: one lane-dense 2-D bf16 matmul over all folded
    # images. cls-slot / pad-token rows of x are zero, so their embedding is
    # zero; cls token + positional embedding + patch bias arrive via tok_add.
    tok = jnp.dot(x_ref[...], patch_w_ref[...],
                  preferred_element_type=jnp.float32)           # (NTOT, D) f32
    x = tok + tok_add_ref[...]

    # Block-diagonal (per-image) key mask with padded tokens removed; built in
    # the wrapper, loaded once (loop-invariant).
    mask_bias = mask_ref[...]                                   # (NTOT, NTOT)

    for l in range(DEPTH):                 # static unroll over depth
        # ---------- attention ----------
        h = _layer_norm(x, vec_ref[l, ROW_LN1_G:ROW_LN1_G + 1, :D],
                        vec_ref[l, ROW_LN1_B:ROW_LN1_B + 1, :D])
        # fused QKV projection: one (NTOT,128)@(128,384) matmul per layer
        qkv = jnp.dot(h.astype(jnp.bfloat16), qkv_w_ref[l],
                      preferred_element_type=jnp.float32)       # (NTOT, 3D)
        # 1/sqrt(HEAD_DIM) is folded into the Q weights at init time.
        q = (qkv[:, 0:D] + vec_ref[l, ROW_Q_B:ROW_Q_B + 1, :D]).astype(jnp.bfloat16)
        k = (qkv[:, D:2 * D] + vec_ref[l, ROW_K_B:ROW_K_B + 1, :D]).astype(jnp.bfloat16)
        v = (qkv[:, 2 * D:3 * D] + vec_ref[l, ROW_V_B:ROW_V_B + 1, :D]).astype(jnp.bfloat16)

        ctx = []
        for hh in range(NUM_HEADS):        # heads = static 64-lane halves
            lo, hi = hh * HD, (hh + 1) * HD
            s = jax.lax.dot_general(q[:, lo:hi], k[:, lo:hi],
                                    (((1,), (1,)), ((), ())),
                                    preferred_element_type=jnp.float32)
            s = s + mask_bias                                   # (NTOT, NTOT)
            s = s - jnp.max(s, axis=-1, keepdims=True)
            p = jnp.exp(s)
            p = p * pl.reciprocal(jnp.sum(p, axis=-1, keepdims=True),
                                  approx=True)
            ctx.append(jnp.dot(p.astype(jnp.bfloat16), v[:, lo:hi],
                               preferred_element_type=jnp.float32))
        ctx = jnp.concatenate(ctx, axis=-1)                     # (NTOT, D)
        # head concat + output proj == one (NTOT,128)@(128,128) matmul
        attn = jnp.dot(ctx.astype(jnp.bfloat16), proj_w_ref[l],
                       preferred_element_type=jnp.float32)
        x = x + attn + vec_ref[l, ROW_PROJ_B:ROW_PROJ_B + 1, :D]

        # ---------- MLP ----------
        h = _layer_norm(x, vec_ref[l, ROW_LN2_G:ROW_LN2_G + 1, :D],
                        vec_ref[l, ROW_LN2_B:ROW_LN2_B + 1, :D])
        h1 = jnp.dot(h.astype(jnp.bfloat16), fc1_w_ref[l],
                     preferred_element_type=jnp.float32)
        h1 = h1 + vec_ref[l, ROW_FC1_B:ROW_FC1_B + 1, :]
        # TODO(synk): timm ViT uses exact (erf) GELU; tanh approximation here.
        h1 = jax.nn.gelu(h1)
        x = x + jnp.dot(h1.astype(jnp.bfloat16), fc2_w_ref[l],
                        preferred_element_type=jnp.float32) \
              + vec_ref[l, ROW_FC2_B:ROW_FC2_B + 1, :D]

    # Final LayerNorm + nn.Linear embed over all token rows (one tiny
    # (NTOT,128)@(128,128) matmul); the wrapper picks the cls row per image.
    xf = _layer_norm(x, head_vec_ref[0:1, :], head_vec_ref[1:2, :])
    out = jnp.dot(xf.astype(jnp.bfloat16), emb_w_ref[...],
                  preferred_element_type=jnp.float32) + head_vec_ref[2:3, :]
    out_ref[...] = out.astype(out_ref.dtype)


def init_params(key):
    D, L, E, HD, F = HIDDEN, DEPTH, EMBED, HEAD_DIM, MLP
    ks = jax.random.split(key, 10)
    bf = jnp.bfloat16

    def rnd(k, shape):
        return jax.random.normal(k, shape, jnp.float32) * 0.02

    # patch-embed weight, feature axis zero-padded PDIM -> PDIM_PAD
    patch_w = jnp.pad(rnd(ks[0], (PDIM, D)), ((0, PDIM_PAD - PDIM), (0, 0)))
    # positional embedding (zero on the padded token rows NTOK..NPAD-1)
    pos = jnp.zeros((NPAD, D), jnp.float32).at[:NTOK].set(rnd(ks[2], (NTOK, D)))

    # fused QKV weight; 1/sqrt(HEAD_DIM) folded into the Q third.
    scale = 1.0 / (HD ** 0.5)
    qkv_w = jnp.concatenate([rnd(ks[3], (L, D, D)) * scale,
                             rnd(ks[4], (L, D, D)),
                             rnd(ks[5], (L, D, D))], axis=-1)   # (L, D, 3D)

    # packed per-layer LayerNorm gammas/betas + biases (betas/biases zero,
    # gammas one in this synthetic init).
    vec = jnp.zeros((L, NVEC, F), jnp.float32)
    vec = vec.at[:, ROW_LN1_G, :D].set(1.0)
    vec = vec.at[:, ROW_LN2_G, :D].set(1.0)

    # final LN gamma / beta + embed bias
    head_vec = jnp.zeros((3, E), jnp.float32).at[0, :].set(1.0)

    return {
        "patch_w": patch_w.astype(bf),
        "patch_b": jnp.zeros((1, D), jnp.float32),
        "cls": rnd(ks[1], (1, D)),
        "pos": pos,
        "qkv_w": qkv_w.astype(bf),
        "proj_w": rnd(ks[6], (L, D, D)).astype(bf),
        "fc1_w": rnd(ks[7], (L, D, F)).astype(bf),
        "fc2_w": rnd(ks[8], (L, F, D)).astype(bf),
        "vec": vec,
        "emb_w": rnd(ks[9], (D, E)).astype(bf),
        "head_vec": head_vec,
    }


def encoder_cnn_forward(images, params):
    """EncoderCNN.forward: images (B,C,H,W) -> embeddings (B, EMBED)."""
    B, C, H, W = images.shape
    P = PATCH
    Hp, Wp = H // P, W // P
    assert B % IMGS_PER_STEP == 0
    grid = B // IMGS_PER_STEP

    # Unfold NCHW into per-patch vectors flattened in (C, P, P) order (matches
    # Conv2d patch-embed weight layout).  Per image: row 0 = cls slot (zeros),
    # rows 1..16 = patches, rows 17..23 = pad; feature axis zero-padded
    # PDIM (48) -> PDIM_PAD (128).  Batch is folded into the sublane axis.
    patches = images.reshape(B, C, Hp, P, Wp, P)
    patches = patches.transpose(0, 2, 4, 1, 3, 5).reshape(B, Hp * Wp, C * P * P)
    x = jnp.pad(patches.astype(jnp.float32),
                ((0, 0), (1, NPAD - 1 - Hp * Wp), (0, PDIM_PAD - C * P * P)))
    x = x.reshape(grid * NTOT, PDIM_PAD).astype(jnp.bfloat16)

    # Additive prologue tensor (cls token + positional emb + patch bias) for
    # one image, tiled over the images folded into a grid step.
    tok_add_img = params["pos"] + jnp.concatenate(
        [params["cls"],
         jnp.broadcast_to(params["patch_b"], (NPATCH, HIDDEN)),
         jnp.zeros((NPAD - NTOK, HIDDEN), jnp.float32)], axis=0)
    tok_add = jnp.tile(tok_add_img, (IMGS_PER_STEP, 1))          # (NTOT, D)

    # Block-diagonal attention-mask bias: token i attends to token j only if
    # both belong to the same folded image and j is a real (non-pad) token.
    mask = np.full((NTOT, NTOT), -1e30, np.float32)
    for b in range(IMGS_PER_STEP):
        mask[b * NPAD:(b + 1) * NPAD, b * NPAD:b * NPAD + NTOK] = 0.0
    mask_bias = jnp.asarray(mask)

    def const_spec(shape):
        nd = len(shape)
        return pl.BlockSpec(tuple(shape), lambda i, _n=nd: (0,) * _n)

    args = (x, params["patch_w"], tok_add, mask_bias, params["qkv_w"],
            params["proj_w"], params["fc1_w"], params["fc2_w"], params["vec"],
            params["emb_w"], params["head_vec"])
    in_specs = [pl.BlockSpec((NTOT, PDIM_PAD), lambda i: (i, 0))]
    in_specs += [const_spec(a.shape) for a in args[1:]]

    out = pl.pallas_call(
        encoder_kernel,
        grid=(grid,),
        out_shape=jax.ShapeDtypeStruct((grid * NTOT, EMBED), jnp.float32),
        in_specs=in_specs,
        out_specs=pl.BlockSpec((NTOT, EMBED), lambda i: (i, 0)),
        compiler_params=pltpu.CompilerParams(
            dimension_semantics=("parallel",)),
    )(*args)
    # cls-token pooling (timm head = Identity) lives at token row 0 per image.
    return out.reshape(B, NPAD, EMBED)[:, 0, :]


if __name__ == "__main__":
    root = jax.random.PRNGKey(0)
    k_img, k_param = jax.random.split(root)
    images = jax.random.normal(k_img, (BATCH, CHANNELS, IMG, IMG), jnp.float32)
    params = init_params(k_param)

    out = encoder_cnn_forward(images, params)
    jax.block_until_ready(out)
    assert out.shape == (BATCH, EMBED), out.shape
    assert bool(jnp.all(jnp.isfinite(out)))
    print("KERNEL_OK")
</pallas_src>

<mosaic_0001>
module attributes {stable_mosaic.version = 11 : i64} {
  func.func @encoder_kernel(%arg0: i32, %arg1: memref<48x128xbf16, #tpu.memory_space<vmem>>, %arg2: memref<128x128xbf16, #tpu.memory_space<vmem>>, %arg3: memref<48x128xf32, #tpu.memory_space<vmem>>, %arg4: memref<48x48xf32, #tpu.memory_space<vmem>>, %arg5: memref<2x128x384xbf16, #tpu.memory_space<vmem>>, %arg6: memref<2x128x128xbf16, #tpu.memory_space<vmem>>, %arg7: memref<2x128x256xbf16, #tpu.memory_space<vmem>>, %arg8: memref<2x256x128xbf16, #tpu.memory_space<vmem>>, %arg9: memref<2x10x256xf32, #tpu.memory_space<vmem>>, %arg10: memref<128x128xbf16, #tpu.memory_space<vmem>>, %arg11: memref<3x128xf32, #tpu.memory_space<vmem>>, %arg12: memref<48x128xf32, #tpu.memory_space<vmem>>) attributes {dimension_semantics = [#tpu.dimension_semantics<parallel>], iteration_bounds = array<i64: 1>, scalar_prefetch = 0 : i64, scratch_operands = 0 : i64, tpu.core_type = #tpu.core_type<tc>, window_params = [{transform_indices = @transform_0, window_bounds = array<i64: 48, 128>}, {pipeline_mode = #tpu.pipeline_mode<synchronous>, transform_indices = @transform_1, window_bounds = array<i64: 128, 128>}, {pipeline_mode = #tpu.pipeline_mode<synchronous>, transform_indices = @transform_2, window_bounds = array<i64: 48, 128>}, {pipeline_mode = #tpu.pipeline_mode<synchronous>, transform_indices = @transform_3, window_bounds = array<i64: 48, 48>}, {pipeline_mode = #tpu.pipeline_mode<synchronous>, transform_indices = @transform_4, window_bounds = array<i64: 2, 128, 384>}, {pipeline_mode = #tpu.pipeline_mode<synchronous>, transform_indices = @transform_5, window_bounds = array<i64: 2, 128, 128>}, {pipeline_mode = #tpu.pipeline_mode<synchronous>, transform_indices = @transform_6, window_bounds = array<i64: 2, 128, 256>}, {pipeline_mode = #tpu.pipeline_mode<synchronous>, transform_indices = @transform_7, window_bounds = array<i64: 2, 256, 128>}, {pipeline_mode = #tpu.pipeline_mode<synchronous>, transform_indices = @transform_8, window_bounds = array<i64: 2, 10, 256>}, {pipeline_mode = #tpu.pipeline_mode<synchronous>, transform_indices = @transform_9, window_bounds = array<i64: 128, 128>}, {pipeline_mode = #tpu.pipeline_mode<synchronous>, transform_indices = @transform_10, window_bounds = array<i64: 3, 128>}, {transform_indices = @transform_11, window_bounds = array<i64: 48, 128>}]} {
    %c0 = arith.constant 0 : index
    %c0_0 = arith.constant 0 : index
    %0 = vector.load %arg1[%c0, %c0_0] : memref<48x128xbf16, #tpu.memory_space<vmem>>, vector<48x128xbf16>
    %c0_1 = arith.constant 0 : index
    %c0_2 = arith.constant 0 : index
    %1 = vector.load %arg2[%c0_1, %c0_2] : memref<128x128xbf16, #tpu.memory_space<vmem>>, vector<128x128xbf16>
    %cst = arith.constant dense<0.000000e+00> : vector<48x128xf32>
    %2 = tpu.matmul %0, %1, %cst {dimension_numbers = #tpu.dot_dimension_numbers<[1], [0], [0], [1], [0, 0, 1, 1], [], []>} : vector<48x128xbf16>, vector<128x128xbf16>, vector<48x128xf32> -> vector<48x128xf32>
    %c0_3 = arith.constant 0 : index
    %c0_4 = arith.constant 0 : index
    %3 = vector.load %arg3[%c0_3, %c0_4] : memref<48x128xf32, #tpu.memory_space<vmem>>, vector<48x128xf32>
    %4 = arith.addf %2, %3 : vector<48x128xf32>
    %c0_5 = arith.constant 0 : index
    %c0_6 = arith.constant 0 : index
    %5 = vector.load %arg4[%c0_5, %c0_6] : memref<48x48xf32, #tpu.memory_space<vmem>>, vector<48x48xf32>
    %c0_7 = arith.constant 0 : index
    %c0_8 = arith.constant 0 : index
    %c0_9 = arith.constant 0 : index
    %6 = vector.load %arg9[%c0_7, %c0_8, %c0_9] : memref<2x10x256xf32, #tpu.memory_space<vmem>>, vector<1x1x128xf32>
    %7 = vector.shape_cast %6 : vector<1x1x128xf32> to vector<1x128xf32>
    %c0_10 = arith.constant 0 : index
    %c1 = arith.constant 1 : index
    %c0_11 = arith.constant 0 : index
    %8 = vector.load %arg9[%c0_10, %c1, %c0_11] : memref<2x10x256xf32, #tpu.memory_space<vmem>>, vector<1x1x128xf32>
    %9 = vector.shape_cast %8 : vector<1x1x128xf32> to vector<1x128xf32>
    %cst_12 = arith.constant dense<0.000000e+00> : vector<48xf32>
    %10 = vector.multi_reduction <add>, %4, %cst_12 [1] : vector<48x128xf32> to vector<48xf32>
    %11 = vector.shape_cast %10 : vector<48xf32> to vector<48x1xf32>
    %cst_13 = arith.constant 1.280000e+02 : f32
    %12 = vector.broadcast %cst_13 : f32 to vector<48x1xf32>
    %13 = arith.divf %11, %12 : vector<48x1xf32>
    %14 = vector.broadcast %13 : vector<48x1xf32> to vector<48x128xf32>
    %15 = arith.subf %4, %14 : vector<48x128xf32>
    %16 = arith.mulf %15, %15 : vector<48x128xf32>
    %cst_14 = arith.constant dense<0.000000e+00> : vector<48xf32>
    %17 = vector.multi_reduction <add>, %16, %cst_14 [1] : vector<48x128xf32> to vector<48xf32>
    %18 = vector.shape_cast %17 : vector<48xf32> to vector<48x1xf32>
    %cst_15 = arith.constant 1.280000e+02 : f32
    %19 = vector.broadcast %cst_15 : f32 to vector<48x1xf32>
    %20 = arith.divf %18, %19 : vector<48x1xf32>
    %21 = vector.broadcast %13 : vector<48x1xf32> to vector<48x128xf32>
    %22 = arith.subf %4, %21 : vector<48x128xf32>
    %cst_16 = arith.constant 9.99999997E-7 : f32
    %23 = vector.broadcast %cst_16 : f32 to vector<48x1xf32>
    %24 = arith.addf %20, %23 : vector<48x1xf32>
    %25 = math.rsqrt %24 : vector<48x1xf32>
    %26 = vector.broadcast %25 : vector<48x1xf32> to vector<48x128xf32>
    %27 = arith.mulf %22, %26 : vector<48x128xf32>
    %28 = vector.broadcast %7 : vector<1x128xf32> to vector<48x128xf32>
    %29 = arith.mulf %27, %28 : vector<48x128xf32>
    %30 = vector.broadcast %9 : vector<1x128xf32> to vector<48x128xf32>
    %31 = arith.addf %29, %30 : vector<48x128xf32>
    %32 = arith.truncf %31 : vector<48x128xf32> to vector<48x128xbf16>
    %c0_17 = arith.constant 0 : index
    %c0_18 = arith.constant 0 : index
    %c0_19 = arith.constant 0 : index
    %33 = vector.load %arg5[%c0_17, %c0_18, %c0_19] : memref<2x128x384xbf16, #tpu.memory_space<vmem>>, vector<1x128x384xbf16>
    %34 = vector.shape_cast %33 : vector<1x128x384xbf16> to vector<128x384xbf16>
    %cst_20 = arith.constant dense<0.000000e+00> : vector<48x384xf32>
    %35 = tpu.matmul %32, %34, %cst_20 {dimension_numbers = #tpu.dot_dimension_numbers<[1], [0], [0], [1], [0, 0, 1, 1], [], []>} : vector<48x128xbf16>, vector<128x384xbf16>, vector<48x384xf32> -> vector<48x384xf32>
    %36 = vector.extract_strided_slice %35 {offsets = [0, 0], sizes = [48, 128], strides = [1, 1]} : vector<48x384xf32> to vector<48x128xf32>
    %c0_21 = arith.constant 0 : index
    %c6 = arith.constant 6 : index
    %c0_22 = arith.constant 0 : index
    %37 = vector.load %arg9[%c0_21, %c6, %c0_22] : memref<2x10x256xf32, #tpu.memory_space<vmem>>, vector<1x1x128xf32>
    %38 = vector.shape_cast %37 : vector<1x1x128xf32> to vector<1x128xf32>
    %39 = vector.broadcast %38 : vector<1x128xf32> to vector<48x128xf32>
    %40 = arith.addf %36, %39 : vector<48x128xf32>
    %41 = arith.truncf %40 : vector<48x128xf32> to vector<48x128xbf16>
    %42 = vector.extract_strided_slice %35 {offsets = [0, 128], sizes = [48, 128], strides = [1, 1]} : vector<48x384xf32> to vector<48x128xf32>
    %c0_23 = arith.constant 0 : index
    %c7 = arith.constant 7 : index
    %c0_24 = arith.constant 0 : index
    %43 = vector.load %arg9[%c0_23, %c7, %c0_24] : memref<2x10x256xf32, #tpu.memory_space<vmem>>, vector<1x1x128xf32>
    %44 = vector.shape_cast %43 : vector<1x1x128xf32> to vector<1x128xf32>
    %45 = vector.broadcast %44 : vector<1x128xf32> to vector<48x128xf32>
    %46 = arith.addf %42, %45 : vector<48x128xf32>
    %47 = arith.truncf %46 : vector<48x128xf32> to vector<48x128xbf16>
    %48 = vector.extract_strided_slice %35 {offsets = [0, 256], sizes = [48, 128], strides = [1, 1]} : vector<48x384xf32> to vector<48x128xf32>
    %c0_25 = arith.constant 0 : index
    %c8 = arith.constant 8 : index
    %c0_26 = arith.constant 0 : index
    %49 = vector.load %arg9[%c0_25, %c8, %c0_26] : memref<2x10x256xf32, #tpu.memory_space<vmem>>, vector<1x1x128xf32>
    %50 = vector.shape_cast %49 : vector<1x1x128xf32> to vector<1x128xf32>
    %51 = vector.broadcast %50 : vector<1x128xf32> to vector<48x128xf32>
    %52 = arith.addf %48, %51 : vector<48x128xf32>
    %53 = arith.truncf %52 : vector<48x128xf32> to vector<48x128xbf16>
    %54 = vector.extract_strided_slice %41 {offsets = [0, 0], sizes = [48, 64], strides = [1, 1]} : vector<48x128xbf16> to vector<48x64xbf16>
    %55 = vector.extract_strided_slice %47 {offsets = [0, 0], sizes = [48, 64], strides = [1, 1]} : vector<48x128xbf16> to vector<48x64xbf16>
    %cst_27 = arith.constant dense<0.000000e+00> : vector<48x48xf32>
    %56 = tpu.matmul %54, %55, %cst_27 {dimension_numbers = #tpu.dot_dimension_numbers<[1], [1], [0], [0], [0, 0, 1, 0], [], []>} : vector<48x64xbf16>, vector<48x64xbf16>, vector<48x48xf32> -> vector<48x48xf32>
    %57 = arith.addf %56, %5 : vector<48x48xf32>
    %cst_28 = arith.constant dense<0xFF800000> : vector<48xf32>
    %58 = vector.multi_reduction <maximumf>, %57, %cst_28 [1] : vector<48x48xf32> to vector<48xf32>
    %59 = vector.shape_cast %58 : vector<48xf32> to vector<48x1xf32>
    %60 = vector.broadcast %59 : vector<48x1xf32> to vector<48x48xf32>
    %61 = arith.subf %57, %60 : vector<48x48xf32>
    %62 = math.exp %61 : vector<48x48xf32>
    %cst_29 = arith.constant dense<0.000000e+00> : vector<48xf32>
    %63 = vector.multi_reduction <add>, %62, %cst_29 [1] : vector<48x48xf32> to vector<48xf32>
    %64 = vector.shape_cast %63 : vector<48xf32> to vector<48x1xf32>
    %65 = tpu.reciprocal %64 {approx = true} : vector<48x1xf32> -> vector<48x1xf32>
    %66 = vector.broadcast %65 : vector<48x1xf32> to vector<48x48xf32>
    %67 = arith.mulf %62, %66 : vector<48x48xf32>
    %68 = arith.truncf %67 : vector<48x48xf32> to vector<48x48xbf16>
    %69 = vector.extract_strided_slice %53 {offsets = [0, 0], sizes = [48, 64], strides = [1, 1]} : vector<48x128xbf16> to vector<48x64xbf16>
    %cst_30 = arith.constant dense<0.000000e+00> : vector<48x64xf32>
    %70 = tpu.matmul %68, %69, %cst_30 {dimension_numbers = #tpu.dot_dimension_numbers<[1], [0], [0], [1], [0, 0, 1, 1], [], []>} : vector<48x48xbf16>, vector<48x64xbf16>, vector<48x64xf32> -> vector<48x64xf32>
    %71 = vector.extract_strided_slice %41 {offsets = [0, 64], sizes = [48, 64], strides = [1, 1]} : vector<48x128xbf16> to vector<48x64xbf16>
    %72 = vector.extract_strided_slice %47 {offsets = [0, 64], sizes = [48, 64], strides = [1, 1]} : vector<48x128xbf16> to vector<48x64xbf16>
    %cst_31 = arith.constant dense<0.000000e+00> : vector<48x48xf32>
    %73 = tpu.matmul %71, %72, %cst_31 {dimension_numbers = #tpu.dot_dimension_numbers<[1], [1], [0], [0], [0, 0, 1, 0], [], []>} : vector<48x64xbf16>, vector<48x64xbf16>, vector<48x48xf32> -> vector<48x48xf32>
    %74 = arith.addf %73, %5 : vector<48x48xf32>
    %cst_32 = arith.constant dense<0xFF800000> : vector<48xf32>
    %75 = vector.multi_reduction <maximumf>, %74, %cst_32 [1] : vector<48x48xf32> to vector<48xf32>
    %76 = vector.shape_cast %75 : vector<48xf32> to vector<48x1xf32>
    %77 = vector.broadcast %76 : vector<48x1xf32> to vector<48x48xf32>
    %78 = arith.subf %74, %77 : vector<48x48xf32>
    %79 = math.exp %78 : vector<48x48xf32>
    %cst_33 = arith.constant dense<0.000000e+00> : vector<48xf32>
    %80 = vector.multi_reduction <add>, %79, %cst_33 [1] : vector<48x48xf32> to vector<48xf32>
    %81 = vector.shape_cast %80 : vector<48xf32> to vector<48x1xf32>
    %82 = tpu.reciprocal %81 {approx = true} : vector<48x1xf32> -> vector<48x1xf32>
    %83 = vector.broadcast %82 : vector<48x1xf32> to vector<48x48xf32>
    %84 = arith.mulf %79, %83 : vector<48x48xf32>
    %85 = arith.truncf %84 : vector<48x48xf32> to vector<48x48xbf16>
    %86 = vector.extract_strided_slice %53 {offsets = [0, 64], sizes = [48, 64], strides = [1, 1]} : vector<48x128xbf16> to vector<48x64xbf16>
    %cst_34 = arith.constant dense<0.000000e+00> : vector<48x64xf32>
    %87 = tpu.matmul %85, %86, %cst_34 {dimension_numbers = #tpu.dot_dimension_numbers<[1], [0], [0], [1], [0, 0, 1, 1], [], []>} : vector<48x48xbf16>, vector<48x64xbf16>, vector<48x64xf32> -> vector<48x64xf32>
    %88 = tpu.concatenate %70, %87 in 1 : vector<48x64xf32>, vector<48x64xf32> -> vector<48x128xf32>
    %89 = arith.truncf %88 : vector<48x128xf32> to vector<48x128xbf16>
    %c0_35 = arith.constant 0 : index
    %c0_36 = arith.constant 0 : index
    %c0_37 = arith.constant 0 : index
    %90 = vector.load %arg6[%c0_35, %c0_36, %c0_37] : memref<2x128x128xbf16, #tpu.memory_space<vmem>>, vector<1x128x128xbf16>
    %91 = vector.shape_cast %90 : vector<1x128x128xbf16> to vector<128x128xbf16>
    %cst_38 = arith.constant dense<0.000000e+00> : vector<48x128xf32>
    %92 = tpu.matmul %89, %91, %cst_38 {dimension_numbers = #tpu.dot_dimension_numbers<[1], [0], [0], [1], [0, 0, 1, 1], [], []>} : vector<48x128xbf16>, vector<128x128xbf16>, vector<48x128xf32> -> vector<48x128xf32>
    %93 = arith.addf %4, %92 : vector<48x128xf32>
    %c0_39 = arith.constant 0 : index
    %c4 = arith.constant 4 : index
    %c0_40 = arith.constant 0 : index
    %94 = vector.load %arg9[%c0_39, %c4, %c0_40] : memref<2x10x256xf32, #tpu.memory_space<vmem>>, vector<1x1x128xf32>
    %95 = vector.shape_cast %94 : vector<1x1x128xf32> to vector<1x128xf32>
    %96 = vector.broadcast %95 : vector<1x128xf32> to vector<48x128xf32>
    %97 = arith.addf %93, %96 : vector<48x128xf32>
    %c0_41 = arith.constant 0 : index
    %c2 = arith.constant 2 : index
    %c0_42 = arith.constant 0 : index
    %98 = vector.load %arg9[%c0_41, %c2, %c0_42] : memref<2x10x256xf32, #tpu.memory_space<vmem>>, vector<1x1x128xf32>
    %99 = vector.shape_cast %98 : vector<1x1x128xf32> to vector<1x128xf32>
    %c0_43 = arith.constant 0 : index
    %c3 = arith.constant 3 : index
    %c0_44 = arith.constant 0 : index
    %100 = vector.load %arg9[%c0_43, %c3, %c0_44] : memref<2x10x256xf32, #tpu.memory_space<vmem>>, vector<1x1x128xf32>
    %101 = vector.shape_cast %100 : vector<1x1x128xf32> to vector<1x128xf32>
    %cst_45 = arith.constant dense<0.000000e+00> : vector<48xf32>
    %102 = vector.multi_reduction <add>, %97, %cst_45 [1] : vector<48x128xf32> to vector<48xf32>
    %103 = vector.shape_cast %102 : vector<48xf32> to vector<48x1xf32>
    %cst_46 = arith.constant 1.280000e+02 : f32
    %104 = vector.broadcast %cst_46 : f32 to vector<48x1xf32>
    %105 = arith.divf %103, %104 : vector<48x1xf32>
    %106 = vector.broadcast %105 : vector<48x1xf32> to vector<48x128xf32>
    %107 = arith.subf %97, %106 : vector<48x128xf32>
    %108 = arith.mulf %107, %107 : vector<48x128xf32>
    %cst_47 = arith.constant dense<0.000000e+00> : vector<48xf32>
    %109 = vector.multi_reduction <add>, %108, %cst_47 [1] : vector<48x128xf32> to vector<48xf32>
    %110 = vector.shape_cast %109 : vector<48xf32> to vector<48x1xf32>
    %cst_48 = arith.constant 1.280000e+02 : f32
    %111 = vector.broadcast %cst_48 : f32 to vector<48x1xf32>
    %112 = arith.divf %110, %111 : vector<48x1xf32>
    %113 = vector.broadcast %105 : vector<48x1xf32> to vector<48x128xf32>
    %114 = arith.subf %97, %113 : vector<48x128xf32>
    %cst_49 = arith.constant 9.99999997E-7 : f32
    %115 = vector.broadcast %cst_49 : f32 to vector<48x1xf32>
    %116 = arith.addf %112, %115 : vector<48x1xf32>
    %117 = math.rsqrt %116 : vector<48x1xf32>
    %118 = vector.broadcast %117 : vector<48x1xf32> to vector<48x128xf32>
    %119 = arith.mulf %114, %118 : vector<48x128xf32>
    %120 = vector.broadcast %99 : vector<1x128xf32> to vector<48x128xf32>
    %121 = arith.mulf %119, %120 : vector<48x128xf32>
    %122 = vector.broadcast %101 : vector<1x128xf32> to vector<48x128xf32>
    %123 = arith.addf %121, %122 : vector<48x128xf32>
    %124 = arith.truncf %123 : vector<48x128xf32> to vector<48x128xbf16>
    %c0_50 = arith.constant 0 : index
    %c0_51 = arith.constant 0 : index
    %c0_52 = arith.constant 0 : index
    %125 = vector.load %arg7[%c0_50, %c0_51, %c0_52] : memref<2x128x256xbf16, #tpu.memory_space<vmem>>, vector<1x128x256xbf16>
    %126 = vector.shape_cast %125 : vector<1x128x256xbf16> to vector<128x256xbf16>
    %cst_53 = arith.constant dense<0.000000e+00> : vector<48x256xf32>
    %127 = tpu.matmul %124, %126, %cst_53 {dimension_numbers = #tpu.dot_dimension_numbers<[1], [0], [0], [1], [0, 0, 1, 1], [], []>} : vector<48x128xbf16>, vector<128x256xbf16>, vector<48x256xf32> -> vector<48x256xf32>
    %c0_54 = arith.constant 0 : index
    %c9 = arith.constant 9 : index
    %c0_55 = arith.constant 0 : index
    %128 = vector.load %arg9[%c0_54, %c9, %c0_55] : memref<2x10x256xf32, #tpu.memory_space<vmem>>, vector<1x1x256xf32>
    %129 = vector.shape_cast %128 : vector<1x1x256xf32> to vector<1x256xf32>
    %130 = vector.broadcast %129 : vector<1x256xf32> to vector<48x256xf32>
    %131 = arith.addf %127, %130 : vector<48x256xf32>
    %132 = arith.mulf %131, %131 : vector<48x256xf32>
    %133 = arith.mulf %131, %132 : vector<48x256xf32>
    %cst_56 = arith.constant 4.471500e-02 : f32
    %134 = vector.broadcast %cst_56 : f32 to vector<48x256xf32>
    %135 = arith.mulf %134, %133 : vector<48x256xf32>
    %136 = arith.addf %131, %135 : vector<48x256xf32>
    %cst_57 = arith.constant 0.797884583 : f32
    %137 = vector.broadcast %cst_57 : f32 to vector<48x256xf32>
    %138 = arith.mulf %137, %136 : vector<48x256xf32>
    %139 = math.tanh %138 : vector<48x256xf32>
    %cst_58 = arith.constant 1.000000e+00 : f32
    %140 = vector.broadcast %cst_58 : f32 to vector<48x256xf32>
    %141 = arith.addf %140, %139 : vector<48x256xf32>
    %cst_59 = arith.constant 5.000000e-01 : f32
    %142 = vector.broadcast %cst_59 : f32 to vector<48x256xf32>
    %143 = arith.mulf %142, %141 : vector<48x256xf32>
    %144 = arith.mulf %131, %143 : vector<48x256xf32>
    %145 = arith.truncf %144 : vector<48x256xf32> to vector<48x256xbf16>
    %c0_60 = arith.constant 0 : index
    %c0_61 = arith.constant 0 : index
    %c0_62 = arith.constant 0 : index
    %146 = vector.load %arg8[%c0_60, %c0_61, %c0_62] : memref<2x256x128xbf16, #tpu.memory_space<vmem>>, vector<1x256x128xbf16>
    %147 = vector.shape_cast %146 : vector<1x256x128xbf16> to vector<256x128xbf16>
    %cst_63 = arith.constant dense<0.000000e+00> : vector<48x128xf32>
    %148 = tpu.matmul %145, %147, %cst_63 {dimension_numbers = #tpu.dot_dimension_numbers<[1], [0], [0], [1], [0, 0, 1, 1], [], []>} : vector<48x256xbf16>, vector<256x128xbf16>, vector<48x128xf32> -> vector<48x128xf32>
    %149 = arith.addf %97, %148 : vector<48x128xf32>
    %c0_64 = arith.constant 0 : index
    %c5 = arith.constant 5 : index
    %c0_65 = arith.constant 0 : index
    %150 = vector.load %arg9[%c0_64, %c5, %c0_65] : memref<2x10x256xf32, #tpu.memory_space<vmem>>, vector<1x1x128xf32>
    %151 = vector.shape_cast %150 : vector<1x1x128xf32> to vector<1x128xf32>
    %152 = vector.broadcast %151 : vector<1x128xf32> to vector<48x128xf32>
    %153 = arith.addf %149, %152 : vector<48x128xf32>
    %c1_66 = arith.constant 1 : index
    %c0_67 = arith.constant 0 : index
    %c0_68 = arith.constant 0 : index
    %154 = vector.load %arg9[%c1_66, %c0_67, %c0_68] : memref<2x10x256xf32, #tpu.memory_space<vmem>>, vector<1x1x128xf32>
    %155 = vector.shape_cast %154 : vector<1x1x128xf32> to vector<1x128xf32>
    %c1_69 = arith.constant 1 : index
    %c1_70 = arith.constant 1 : index
    %c0_71 = arith.constant 0 : index
    %156 = vector.load %arg9[%c1_69, %c1_70, %c0_71] : memref<2x10x256xf32, #tpu.memory_space<vmem>>, vector<1x1x128xf32>
    %157 = vector.shape_cast %156 : vector<1x1x128xf32> to vector<1x128xf32>
    %cst_72 = arith.constant dense<0.000000e+00> : vector<48xf32>
    %158 = vector.multi_reduction <add>, %153, %cst_72 [1] : vector<48x128xf32> to vector<48xf32>
    %159 = vector.shape_cast %158 : vector<48xf32> to vector<48x1xf32>
    %cst_73 = arith.constant 1.280000e+02 : f32
    %160 = vector.broadcast %cst_73 : f32 to vector<48x1xf32>
    %161 = arith.divf %159, %160 : vector<48x1xf32>
    %162 = vector.broadcast %161 : vector<48x1xf32> to vector<48x128xf32>
    %163 = arith.subf %153, %162 : vector<48x128xf32>
    %164 = arith.mulf %163, %163 : vector<48x128xf32>
    %cst_74 = arith.constant dense<0.000000e+00> : vector<48xf32>
    %165 = vector.multi_reduction <add>, %164, %cst_74 [1] : vector<48x128xf32> to vector<48xf32>
    %166 = vector.shape_cast %165 : vector<48xf32> to vector<48x1xf32>
    %cst_75 = arith.constant 1.280000e+02 : f32
    %167 = vector.broadcast %cst_75 : f32 to vector<48x1xf32>
    %168 = arith.divf %166, %167 : vector<48x1xf32>
    %169 = vector.broadcast %161 : vector<48x1xf32> to vector<48x128xf32>
    %170 = arith.subf %153, %169 : vector<48x128xf32>
    %cst_76 = arith.constant 9.99999997E-7 : f32
    %171 = vector.broadcast %cst_76 : f32 to vector<48x1xf32>
    %172 = arith.addf %168, %171 : vector<48x1xf32>
    %173 = math.rsqrt %172 : vector<48x1xf32>
    %174 = vector.broadcast %173 : vector<48x1xf32> to vector<48x128xf32>
    %175 = arith.mulf %170, %174 : vector<48x128xf32>
    %176 = vector.broadcast %155 : vector<1x128xf32> to vector<48x128xf32>
    %177 = arith.mulf %175, %176 : vector<48x128xf32>
    %178 = vector.broadcast %157 : vector<1x128xf32> to vector<48x128xf32>
    %179 = arith.addf %177, %178 : vector<48x128xf32>
    %180 = arith.truncf %179 : vector<48x128xf32> to vector<48x128xbf16>
    %c1_77 = arith.constant 1 : index
    %c0_78 = arith.constant 0 : index
    %c0_79 = arith.constant 0 : index
    %181 = vector.load %arg5[%c1_77, %c0_78, %c0_79] : memref<2x128x384xbf16, #tpu.memory_space<vmem>>, vector<1x128x384xbf16>
    %182 = vector.shape_cast %181 : vector<1x128x384xbf16> to vector<128x384xbf16>
    %cst_80 = arith.constant dense<0.000000e+00> : vector<48x384xf32>
    %183 = tpu.matmul %180, %182, %cst_80 {dimension_numbers = #tpu.dot_dimension_numbers<[1], [0], [0], [1], [0, 0, 1, 1], [], []>} : vector<48x128xbf16>, vector<128x384xbf16>, vector<48x384xf32> -> vector<48x384xf32>
    %184 = vector.extract_strided_slice %183 {offsets = [0, 0], sizes = [48, 128], strides = [1, 1]} : vector<48x384xf32> to vector<48x128xf32>
    %c1_81 = arith.constant 1 : index
    %c6_82 = arith.constant 6 : index
    %c0_83 = arith.constant 0 : index
    %185 = vector.load %arg9[%c1_81, %c6_82, %c0_83] : memref<2x10x256xf32, #tpu.memory_space<vmem>>, vector<1x1x128xf32>
    %186 = vector.shape_cast %185 : vector<1x1x128xf32> to vector<1x128xf32>
    %187 = vector.broadcast %186 : vector<1x128xf32> to vector<48x128xf32>
    %188 = arith.addf %184, %187 : vector<48x128xf32>
    %189 = arith.truncf %188 : vector<48x128xf32> to vector<48x128xbf16>
    %190 = vector.extract_strided_slice %183 {offsets = [0, 128], sizes = [48, 128], strides = [1, 1]} : vector<48x384xf32> to vector<48x128xf32>
    %c1_84 = arith.constant 1 : index
    %c7_85 = arith.constant 7 : index
    %c0_86 = arith.constant 0 : index
    %191 = vector.load %arg9[%c1_84, %c7_85, %c0_86] : memref<2x10x256xf32, #tpu.memory_space<vmem>>, vector<1x1x128xf32>
    %192 = vector.shape_cast %191 : vector<1x1x128xf32> to vector<1x128xf32>
    %193 = vector.broadcast %192 : vector<1x128xf32> to vector<48x128xf32>
    %194 = arith.addf %190, %193 : vector<48x128xf32>
    %195 = arith.truncf %194 : vector<48x128xf32> to vector<48x128xbf16>
    %196 = vector.extract_strided_slice %183 {offsets = [0, 256], sizes = [48, 128], strides = [1, 1]} : vector<48x384xf32> to vector<48x128xf32>
    %c1_87 = arith.constant 1 : index
    %c8_88 = arith.constant 8 : index
    %c0_89 = arith.constant 0 : index
    %197 = vector.load %arg9[%c1_87, %c8_88, %c0_89] : memref<2x10x256xf32, #tpu.memory_space<vmem>>, vector<1x1x128xf32>
    %198 = vector.shape_cast %197 : vector<1x1x128xf32> to vector<1x128xf32>
    %199 = vector.broadcast %198 : vector<1x128xf32> to vector<48x128xf32>
    %200 = arith.addf %196, %199 : vector<48x128xf32>
    %201 = arith.truncf %200 : vector<48x128xf32> to vector<48x128xbf16>
    %202 = vector.extract_strided_slice %189 {offsets = [0, 0], sizes = [48, 64], strides = [1, 1]} : vector<48x128xbf16> to vector<48x64xbf16>
    %203 = vector.extract_strided_slice %195 {offsets = [0, 0], sizes = [48, 64], strides = [1, 1]} : vector<48x128xbf16> to vector<48x64xbf16>
    %cst_90 = arith.constant dense<0.000000e+00> : vector<48x48xf32>
    %204 = tpu.matmul %202, %203, %cst_90 {dimension_numbers = #tpu.dot_dimension_numbers<[1], [1], [0], [0], [0, 0, 1, 0], [], []>} : vector<48x64xbf16>, vector<48x64xbf16>, vector<48x48xf32> -> vector<48x48xf32>
    %205 = arith.addf %204, %5 : vector<48x48xf32>
    %cst_91 = arith.constant dense<0xFF800000> : vector<48xf32>
    %206 = vector.multi_reduction <maximumf>, %205, %cst_91 [1] : vector<48x48xf32> to vector<48xf32>
    %207 = vector.shape_cast %206 : vector<48xf32> to vector<48x1xf32>
    %208 = vector.broadcast %207 : vector<48x1xf32> to vector<48x48xf32>
    %209 = arith.subf %205, %208 : vector<48x48xf32>
    %210 = math.exp %209 : vector<48x48xf32>
    %cst_92 = arith.constant dense<0.000000e+00> : vector<48xf32>
    %211 = vector.multi_reduction <add>, %210, %cst_92 [1] : vector<48x48xf32> to vector<48xf32>
    %212 = vector.shape_cast %211 : vector<48xf32> to vector<48x1xf32>
    %213 = tpu.reciprocal %212 {approx = true} : vector<48x1xf32> -> vector<48x1xf32>
    %214 = vector.broadcast %213 : vector<48x1xf32> to vector<48x48xf32>
    %215 = arith.mulf %210, %214 : vector<48x48xf32>
    %216 = arith.truncf %215 : vector<48x48xf32> to vector<48x48xbf16>
    %217 = vector.extract_strided_slice %201 {offsets = [0, 0], sizes = [48, 64], strides = [1, 1]} : vector<48x128xbf16> to vector<48x64xbf16>
    %cst_93 = arith.constant dense<0.000000e+00> : vector<48x64xf32>
    %218 = tpu.matmul %216, %217, %cst_93 {dimension_numbers = #tpu.dot_dimension_numbers<[1], [0], [0], [1], [0, 0, 1, 1], [], []>} : vector<48x48xbf16>, vector<48x64xbf16>, vector<48x64xf32> -> vector<48x64xf32>
    %219 = vector.extract_strided_slice %189 {offsets = [0, 64], sizes = [48, 64], strides = [1, 1]} : vector<48x128xbf16> to vector<48x64xbf16>
    %220 = vector.extract_strided_slice %195 {offsets = [0, 64], sizes = [48, 64], strides = [1, 1]} : vector<48x128xbf16> to vector<48x64xbf16>
    %cst_94 = arith.constant dense<0.000000e+00> : vector<48x48xf32>
    %221 = tpu.matmul %219, %220, %cst_94 {dimension_numbers = #tpu.dot_dimension_numbers<[1], [1], [0], [0], [0, 0, 1, 0], [], []>} : vector<48x64xbf16>, vector<48x64xbf16>, vector<48x48xf32> -> vector<48x48xf32>
    %222 = arith.addf %221, %5 : vector<48x48xf32>
    %cst_95 = arith.constant dense<0xFF800000> : vector<48xf32>
    %223 = vector.multi_reduction <maximumf>, %222, %cst_95 [1] : vector<48x48xf32> to vector<48xf32>
    %224 = vector.shape_cast %223 : vector<48xf32> to vector<48x1xf32>
    %225 = vector.broadcast %224 : vector<48x1xf32> to vector<48x48xf32>
    %226 = arith.subf %222, %225 : vector<48x48xf32>
    %227 = math.exp %226 : vector<48x48xf32>
    %cst_96 = arith.constant dense<0.000000e+00> : vector<48xf32>
    %228 = vector.multi_reduction <add>, %227, %cst_96 [1] : vector<48x48xf32> to vector<48xf32>
    %229 = vector.shape_cast %228 : vector<48xf32> to vector<48x1xf32>
    %230 = tpu.reciprocal %229 {approx = true} : vector<48x1xf32> -> vector<48x1xf32>
    %231 = vector.broadcast %230 : vector<48x1xf32> to vector<48x48xf32>
    %232 = arith.mulf %227, %231 : vector<48x48xf32>
    %233 = arith.truncf %232 : vector<48x48xf32> to vector<48x48xbf16>
    %234 = vector.extract_strided_slice %201 {offsets = [0, 64], sizes = [48, 64], strides = [1, 1]} : vector<48x128xbf16> to vector<48x64xbf16>
    %cst_97 = arith.constant dense<0.000000e+00> : vector<48x64xf32>
    %235 = tpu.matmul %233, %234, %cst_97 {dimension_numbers = #tpu.dot_dimension_numbers<[1], [0], [0], [1], [0, 0, 1, 1], [], []>} : vector<48x48xbf16>, vector<48x64xbf16>, vector<48x64xf32> -> vector<48x64xf32>
    %236 = tpu.concatenate %218, %235 in 1 : vector<48x64xf32>, vector<48x64xf32> -> vector<48x128xf32>
    %237 = arith.truncf %236 : vector<48x128xf32> to vector<48x128xbf16>
    %c1_98 = arith.constant 1 : index
    %c0_99 = arith.constant 0 : index
    %c0_100 = arith.constant 0 : index
    %238 = vector.load %arg6[%c1_98, %c0_99, %c0_100] : memref<2x128x128xbf16, #tpu.memory_space<vmem>>, vector<1x128x128xbf16>
    %239 = vector.shape_cast %238 : vector<1x128x128xbf16> to vector<128x128xbf16>
    %cst_101 = arith.constant dense<0.000000e+00> : vector<48x128xf32>
    %240 = tpu.matmul %237, %239, %cst_101 {dimension_numbers = #tpu.dot_dimension_numbers<[1], [0], [0], [1], [0, 0, 1, 1], [], []>} : vector<48x128xbf16>, vector<128x128xbf16>, vector<48x128xf32> -> vector<48x128xf32>
    %241 = arith.addf %153, %240 : vector<48x128xf32>
    %c1_102 = arith.constant 1 : index
    %c4_103 = arith.constant 4 : index
    %c0_104 = arith.constant 0 : index
    %242 = vector.load %arg9[%c1_102, %c4_103, %c0_104] : memref<2x10x256xf32, #tpu.memory_space<vmem>>, vector<1x1x128xf32>
    %243 = vector.shape_cast %242 : vector<1x1x128xf32> to vector<1x128xf32>
    %244 = vector.broadcast %243 : vector<1x128xf32> to vector<48x128xf32>
    %245 = arith.addf %241, %244 : vector<48x128xf32>
    %c1_105 = arith.constant 1 : index
    %c2_106 = arith.constant 2 : index
    %c0_107 = arith.constant 0 : index
    %246 = vector.load %arg9[%c1_105, %c2_106, %c0_107] : memref<2x10x256xf32, #tpu.memory_space<vmem>>, vector<1x1x128xf32>
    %247 = vector.shape_cast %246 : vector<1x1x128xf32> to vector<1x128xf32>
    %c1_108 = arith.constant 1 : index
    %c3_109 = arith.constant 3 : index
    %c0_110 = arith.constant 0 : index
    %248 = vector.load %arg9[%c1_108, %c3_109, %c0_110] : memref<2x10x256xf32, #tpu.memory_space<vmem>>, vector<1x1x128xf32>
    %249 = vector.shape_cast %248 : vector<1x1x128xf32> to vector<1x128xf32>
    %cst_111 = arith.constant dense<0.000000e+00> : vector<48xf32>
    %250 = vector.multi_reduction <add>, %245, %cst_111 [1] : vector<48x128xf32> to vector<48xf32>
    %251 = vector.shape_cast %250 : vector<48xf32> to vector<48x1xf32>
    %cst_112 = arith.constant 1.280000e+02 : f32
    %252 = vector.broadcast %cst_112 : f32 to vector<48x1xf32>
    %253 = arith.divf %251, %252 : vector<48x1xf32>
    %254 = vector.broadcast %253 : vector<48x1xf32> to vector<48x128xf32>
    %255 = arith.subf %245, %254 : vector<48x128xf32>
    %256 = arith.mulf %255, %255 : vector<48x128xf32>
    %cst_113 = arith.constant dense<0.000000e+00> : vector<48xf32>
    %257 = vector.multi_reduction <add>, %256, %cst_113 [1] : vector<48x128xf32> to vector<48xf32>
    %258 = vector.shape_cast %257 : vector<48xf32> to vector<48x1xf32>
    %cst_114 = arith.constant 1.280000e+02 : f32
    %259 = vector.broadcast %cst_114 : f32 to vector<48x1xf32>
    %260 = arith.divf %258, %259 : vector<48x1xf32>
    %261 = vector.broadcast %253 : vector<48x1xf32> to vector<48x128xf32>
    %262 = arith.subf %245, %261 : vector<48x128xf32>
    %cst_115 = arith.constant 9.99999997E-7 : f32
    %263 = vector.broadcast %cst_115 : f32 to vector<48x1xf32>
    %264 = arith.addf %260, %263 : vector<48x1xf32>
    %265 = math.rsqrt %264 : vector<48x1xf32>
    %266 = vector.broadcast %265 : vector<48x1xf32> to vector<48x128xf32>
    %267 = arith.mulf %262, %266 : vector<48x128xf32>
    %268 = vector.broadcast %247 : vector<1x128xf32> to vector<48x128xf32>
    %269 = arith.mulf %267, %268 : vector<48x128xf32>
    %270 = vector.broadcast %249 : vector<1x128xf32> to vector<48x128xf32>
    %271 = arith.addf %269, %270 : vector<48x128xf32>
    %272 = arith.truncf %271 : vector<48x128xf32> to vector<48x128xbf16>
    %c1_116 = arith.constant 1 : index
    %c0_117 = arith.constant 0 : index
    %c0_118 = arith.constant 0 : index
    %273 = vector.load %arg7[%c1_116, %c0_117, %c0_118] : memref<2x128x256xbf16, #tpu.memory_space<vmem>>, vector<1x128x256xbf16>
    %274 = vector.shape_cast %273 : vector<1x128x256xbf16> to vector<128x256xbf16>
    %cst_119 = arith.constant dense<0.000000e+00> : vector<48x256xf32>
    %275 = tpu.matmul %272, %274, %cst_119 {dimension_numbers = #tpu.dot_dimension_numbers<[1], [0], [0], [1], [0, 0, 1, 1], [], []>} : vector<48x128xbf16>, vector<128x256xbf16>, vector<48x256xf32> -> vector<48x256xf32>
    %c1_120 = arith.constant 1 : index
    %c9_121 = arith.constant 9 : index
    %c0_122 = arith.constant 0 : index
    %276 = vector.load %arg9[%c1_120, %c9_121, %c0_122] : memref<2x10x256xf32, #tpu.memory_space<vmem>>, vector<1x1x256xf32>
    %277 = vector.shape_cast %276 : vector<1x1x256xf32> to vector<1x256xf32>
    %278 = vector.broadcast %277 : vector<1x256xf32> to vector<48x256xf32>
    %279 = arith.addf %275, %278 : vector<48x256xf32>
    %280 = arith.mulf %279, %279 : vector<48x256xf32>
    %281 = arith.mulf %279, %280 : vector<48x256xf32>
    %cst_123 = arith.constant 4.471500e-02 : f32
    %282 = vector.broadcast %cst_123 : f32 to vector<48x256xf32>
    %283 = arith.mulf %282, %281 : vector<48x256xf32>
    %284 = arith.addf %279, %283 : vector<48x256xf32>
    %cst_124 = arith.constant 0.797884583 : f32
    %285 = vector.broadcast %cst_124 : f32 to vector<48x256xf32>
    %286 = arith.mulf %285, %284 : vector<48x256xf32>
    %287 = math.tanh %286 : vector<48x256xf32>
    %cst_125 = arith.constant 1.000000e+00 : f32
    %288 = vector.broadcast %cst_125 : f32 to vector<48x256xf32>
    %289 = arith.addf %288, %287 : vector<48x256xf32>
    %cst_126 = arith.constant 5.000000e-01 : f32
    %290 = vector.broadcast %cst_126 : f32 to vector<48x256xf32>
    %291 = arith.mulf %290, %289 : vector<48x256xf32>
    %292 = arith.mulf %279, %291 : vector<48x256xf32>
    %293 = arith.truncf %292 : vector<48x256xf32> to vector<48x256xbf16>
    %c1_127 = arith.constant 1 : index
    %c0_128 = arith.constant 0 : index
    %c0_129 = arith.constant 0 : index
    %294 = vector.load %arg8[%c1_127, %c0_128, %c0_129] : memref<2x256x128xbf16, #tpu.memory_space<vmem>>, vector<1x256x128xbf16>
    %295 = vector.shape_cast %294 : vector<1x256x128xbf16> to vector<256x128xbf16>
    %cst_130 = arith.constant dense<0.000000e+00> : vector<48x128xf32>
    %296 = tpu.matmul %293, %295, %cst_130 {dimension_numbers = #tpu.dot_dimension_numbers<[1], [0], [0], [1], [0, 0, 1, 1], [], []>} : vector<48x256xbf16>, vector<256x128xbf16>, vector<48x128xf32> -> vector<48x128xf32>
    %297 = arith.addf %245, %296 : vector<48x128xf32>
    %c1_131 = arith.constant 1 : index
    %c5_132 = arith.constant 5 : index
    %c0_133 = arith.constant 0 : index
    %298 = vector.load %arg9[%c1_131, %c5_132, %c0_133] : memref<2x10x256xf32, #tpu.memory_space<vmem>>, vector<1x1x128xf32>
    %299 = vector.shape_cast %298 : vector<1x1x128xf32> to vector<1x128xf32>
    %300 = vector.broadcast %299 : vector<1x128xf32> to vector<48x128xf32>
    %301 = arith.addf %297, %300 : vector<48x128xf32>
    %c0_134 = arith.constant 0 : index
    %c0_135 = arith.constant 0 : index
    %302 = vector.load %arg11[%c0_134, %c0_135] : memref<3x128xf32, #tpu.memory_space<vmem>>, vector<1x128xf32>
    %c1_136 = arith.constant 1 : index
    %c0_137 = arith.constant 0 : index
    %303 = vector.load %arg11[%c1_136, %c0_137] : memref<3x128xf32, #tpu.memory_space<vmem>>, vector<1x128xf32>
    %cst_138 = arith.constant dense<0.000000e+00> : vector<48xf32>
    %304 = vector.multi_reduction <add>, %301, %cst_138 [1] : vector<48x128xf32> to vector<48xf32>
    %305 = vector.shape_cast %304 : vector<48xf32> to vector<48x1xf32>
    %cst_139 = arith.constant 1.280000e+02 : f32
    %306 = vector.broadcast %cst_139 : f32 to vector<48x1xf32>
    %307 = arith.divf %305, %306 : vector<48x1xf32>
    %308 = vector.broadcast %307 : vector<48x1xf32> to vector<48x128xf32>
    %309 = arith.subf %301, %308 : vector<48x128xf32>
    %310 = arith.mulf %309, %309 : vector<48x128xf32>
    %cst_140 = arith.constant dense<0.000000e+00> : vector<48xf32>
    %311 = vector.multi_reduction <add>, %310, %cst_140 [1] : vector<48x128xf32> to vector<48xf32>
    %312 = vector.shape_cast %311 : vector<48xf32> to vector<48x1xf32>
    %cst_141 = arith.constant 1.280000e+02 : f32
    %313 = vector.broadcast %cst_141 : f32 to vector<48x1xf32>
    %314 = arith.divf %312, %313 : vector<48x1xf32>
    %315 = vector.broadcast %307 : vector<48x1xf32> to vector<48x128xf32>
    %316 = arith.subf %301, %315 : vector<48x128xf32>
    %cst_142 = arith.constant 9.99999997E-7 : f32
    %317 = vector.broadcast %cst_142 : f32 to vector<48x1xf32>
    %318 = arith.addf %314, %317 : vector<48x1xf32>
    %319 = math.rsqrt %318 : vector<48x1xf32>
    %320 = vector.broadcast %319 : vector<48x1xf32> to vector<48x128xf32>
    %321 = arith.mulf %316, %320 : vector<48x128xf32>
    %322 = vector.broadcast %302 : vector<1x128xf32> to vector<48x128xf32>
    %323 = arith.mulf %321, %322 : vector<48x128xf32>
    %324 = vector.broadcast %303 : vector<1x128xf32> to vector<48x128xf32>
    %325 = arith.addf %323, %324 : vector<48x128xf32>
    %326 = arith.truncf %325 : vector<48x128xf32> to vector<48x128xbf16>
    %c0_143 = arith.constant 0 : index
    %c0_144 = arith.constant 0 : index
    %327 = vector.load %arg10[%c0_143, %c0_144] : memref<128x128xbf16, #tpu.memory_space<vmem>>, vector<128x128xbf16>
    %cst_145 = arith.constant dense<0.000000e+00> : vector<48x128xf32>
    %328 = tpu.matmul %326, %327, %cst_145 {dimension_numbers = #tpu.dot_dimension_numbers<[1], [0], [0], [1], [0, 0, 1, 1], [], []>} : vector<48x128xbf16>, vector<128x128xbf16>, vector<48x128xf32> -> vector<48x128xf32>
    %c2_146 = arith.constant 2 : index
    %c0_147 = arith.constant 0 : index
    %329 = vector.load %arg11[%c2_146, %c0_147] : memref<3x128xf32, #tpu.memory_space<vmem>>, vector<1x128xf32>
    %330 = vector.broadcast %329 : vector<1x128xf32> to vector<48x128xf32>
    %331 = arith.addf %328, %330 : vector<48x128xf32>
    %c0_148 = arith.constant 0 : index
    %c0_149 = arith.constant 0 : index
    %332 = vector.load %arg12[%c0_148, %c0_149] : memref<48x128xf32, #tpu.memory_space<vmem>>, vector<48x128xf32>
    tpu.vector_store %arg12[%c0_148, %c0_149], %331 {strides = array<i32>} : memref<48x128xf32, #tpu.memory_space<vmem>>, vector<48x128xf32>,
    return
  }
  func.func @transform_0(%arg0: i32) -> (i32, i32) {
    %c0_i32 = arith.constant 0 : i32
    %c0_i32_0 = arith.constant 0 : i32
    return %arg0, %c0_i32 : i32, i32
  }
  func.func @transform_1(%arg0: i32) -> (i32, i32) {
    %c0_i32 = arith.constant 0 : i32
    %c0_i32_0 = arith.constant 0 : i32
    %c0_i32_1 = arith.constant 0 : i32
    return %c0_i32, %c0_i32_0 : i32, i32
  }
  func.func @transform_2(%arg0: i32) -> (i32, i32) {
    %c0_i32 = arith.constant 0 : i32
    %c0_i32_0 = arith.constant 0 : i32
    %c0_i32_1 = arith.constant 0 : i32
    return %c0_i32, %c0_i32_0 : i32, i32
  }
  func.func @transform_3(%arg0: i32) -> (i32, i32) {
    %c0_i32 = arith.constant 0 : i32
    %c0_i32_0 = arith.constant 0 : i32
    %c0_i32_1 = arith.constant 0 : i32
    return %c0_i32, %c0_i32_0 : i32, i32
  }
  func.func @transform_4(%arg0: i32) -> (i32, i32, i32) {
    %c0_i32 = arith.constant 0 : i32
    %c0_i32_0 = arith.constant 0 : i32
    %c0_i32_1 = arith.constant 0 : i32
    %c0_i32_2 = arith.constant 0 : i32
    return %c0_i32, %c0_i32_0, %c0_i32_1 : i32, i32, i32
  }
  func.func @transform_5(%arg0: i32) -> (i32, i32, i32) {
    %c0_i32 = arith.constant 0 : i32
    %c0_i32_0 = arith.constant 0 : i32
    %c0_i32_1 = arith.constant 0 : i32
    %c0_i32_2 = arith.constant 0 : i32
    return %c0_i32, %c0_i32_0, %c0_i32_1 : i32, i32, i32
  }
  func.func @transform_6(%arg0: i32) -> (i32, i32, i32) {
    %c0_i32 = arith.constant 0 : i32
    %c0_i32_0 = arith.constant 0 : i32
    %c0_i32_1 = arith.constant 0 : i32
    %c0_i32_2 = arith.constant 0 : i32
    return %c0_i32, %c0_i32_0, %c0_i32_1 : i32, i32, i32
  }
  func.func @transform_7(%arg0: i32) -> (i32, i32, i32) {
    %c0_i32 = arith.constant 0 : i32
    %c0_i32_0 = arith.constant 0 : i32
    %c0_i32_1 = arith.constant 0 : i32
    %c0_i32_2 = arith.constant 0 : i32
    return %c0_i32, %c0_i32_0, %c0_i32_1 : i32, i32, i32
  }
  func.func @transform_8(%arg0: i32) -> (i32, i32, i32) {
    %c0_i32 = arith.constant 0 : i32
    %c0_i32_0 = arith.constant 0 : i32
    %c0_i32_1 = arith.constant 0 : i32
    %c0_i32_2 = arith.constant 0 : i32
    return %c0_i32, %c0_i32_0, %c0_i32_1 : i32, i32, i32
  }
  func.func @transform_9(%arg0: i32) -> (i32, i32) {
    %c0_i32 = arith.constant 0 : i32
    %c0_i32_0 = arith.constant 0 : i32
    %c0_i32_1 = arith.constant 0 : i32
    return %c0_i32, %c0_i32_0 : i32, i32
  }
  func.func @transform_10(%arg0: i32) -> (i32, i32) {
    %c0_i32 = arith.constant 0 : i32
    %c0_i32_0 = arith.constant 0 : i32
    %c0_i32_1 = arith.constant 0 : i32
    return %c0_i32, %c0_i32_0 : i32, i32
  }
  func.func @transform_11(%arg0: i32) -> (i32, i32) {
    %c0_i32 = arith.constant 0 : i32
    %c0_i32_0 = arith.constant 0 : i32
    return %arg0, %c0_i32 : i32, i32
  }
}

</mosaic_0001>

<bundles_post_ra>
// kernel: tpu_custom_call.1
= control target key start
LH: loop header
LB: loop body
LE: loop exit
PB: predicated region body
PF: predicated region fallthrough
CT: control target
= control target key end

     0   :  { %16 = vsyncpa [#allocation3], 0  ;;  %s6301_s0 = inlined_call_operand.hbm [shape: bf16[48,128], index: 0, kind: input, shape index: {}]   ;;  %s6302_s1 = inlined_call_operand.vmem [shape: bf16[128,128], index: 1, kind: input, shape index: {}]   ;;  %s6303_s2 = inlined_call_operand.hbm [shape: f32[48,128], index: 2, kind: input, shape index: {}]   ;;  %s6304_s3 = inlined_call_operand.hbm [shape: f32[48,48], index: 3, kind: input, shape index: {}]   ;;  %s6305_s4 = inlined_call_operand.hbm [shape: bf16[2,128,384], index: 4, kind: input, shape index: {}]   ;;  %s6306_s5 = inlined_call_operand.hbm [shape: bf16[2,128,128], index: 5, kind: input, shape index: {}]   ;;  %s6307_s6 = inlined_call_operand.hbm [shape: bf16[2,128,256], index: 6, kind: input, shape index: {}]   ;;  %s6308_s7 = inlined_call_operand.hbm [shape: bf16[2,256,128], index: 7, kind: input, shape index: {}]   ;;  %s6309_s8 = inlined_call_operand.vmem [shape: f32[2,10,256], index: 8, kind: input, shape index: {}]   ;;  %s6310_s9 = inlined_call_operand.vmem [shape: bf16[128,128], index: 9, kind: input, shape index: {}]   ;;  %s6311_s10 = inlined_call_operand.vmem [shape: f32[3,128], index: 10, kind: input, shape index: {}]   ;;  %s6312_s11 = inlined_call_operand.hbm [shape: f32[48,128], index: 11, kind: output, shape index: {}]  }
   0x1   :  { %17 = vsyncpa [#allocation6], 0 }
   0x2   :  { %18 = vsyncpa [#allocation9], 0 }
   0x3   :  { %19 = vsyncpa [#allocation12], 0 }
   0x4   :  { %20 = vsyncpa [#allocation4], 0  ;;  %s4999_s17 = smov [#allocation5]   ;;  %s4813_s21 = scalar_lea.hbm %s6303_s2, 768 }
   0x5   :  { %s40_s18 = sshll.u32 %s4999_s17, 4  ;;  %p4814_p0 = scmp.ne.s32.totalorder %s6303_s2, %s4813_s21  ;;  %s41_s18 = int_to_ptr.vmem [resolvable:$true] %s40_s18 }
   0x6   :  { %p4817_p1 = scmp.lt.u32.totalorder %s4813_s21, %s6303_s2 }
   0x8   :  { %p4819_p2 = pnand %p4817_p1, %p4814_p0 }
   0xa   :  { %4822 = shalt.err (!%p4819_p2)
}
   0xb   :  { %s4823_s26 = scalar_lea.vmem %s41_s18, 768  ;;  %p4828_p4 = scmp.lt.s32.totalorder %s41_s18, %s41_s18 }
   0xc   :  { %p4824_p3 = scmp.ne.s32.totalorder %s41_s18, %s4823_s26  ;;  %p4829_p5 = scmp.lt.s32.totalorder %s4823_s26, %s4823_s26 }
   0xe   :  { %p4830_p6 = por %p4829_p5, %p4828_p4 }
  0x10   :  { %p4831_p7 = pnand %p4830_p6, %p4824_p3 }
  0x12   :  { %4834 = shalt.err (!%p4831_p7)
}
  0x13   :  { %s5000_s27 = smov 128   ;;  %s5001_s28 = smov 8  }
  0x14   :  { %46 = dma.hbm_to_vmem [thread:$0]  %s6303_s2, 768, %s41_s18, [#allocation6], %s5000_s27, %s5000_s27, %s5001_s28  }
  0x15   :  { %s5002_s12 = smov [#allocation8]   ;;  %s4835_s16 = scalar_lea.hbm %s6305_s4, 6144 }
  0x16   :  { %s64_s13 = sshll.u32 %s5002_s12, 4  ;;  %p4836_p8 = scmp.ne.s32.totalorder %s6305_s4, %s4835_s16  ;;  %s65_s13 = int_to_ptr.vmem [resolvable:$true] %s64_s13 }
  0x17   :  { %p4839_p9 = scmp.lt.u32.totalorder %s4835_s16, %s6305_s4 }
  0x19   :  { %p4841_p10 = pnand %p4839_p9, %p4836_p8 }
  0x1b   :  { %4844 = shalt.err (!%p4841_p10)
}
  0x1c   :  { %s4845_s22 = scalar_lea.vmem %s65_s13, 6144  ;;  %p4850_p12 = scmp.lt.s32.totalorder %s65_s13, %s65_s13 }
  0x1d   :  { %p4846_p11 = scmp.ne.s32.totalorder %s65_s13, %s4845_s22  ;;  %p4851_p13 = scmp.lt.s32.totalorder %s4845_s22, %s4845_s22 }
  0x1f   :  { %p4852_p0 = por %p4851_p13, %p4850_p12 }
  0x21   :  { %p4853_p1 = pnand %p4852_p0, %p4846_p11 }
  0x23   :  { %4856 = shalt.err (!%p4853_p1)
}
  0x24   :  { %s5003_s2 = smov 192   ;;  %s5004_s18 = smov 12  }
  0x25   :  { %70 = dma.hbm_to_vmem [thread:$0]  %s6305_s4, 6144, %s65_s13, [#allocation9], %s5003_s2, %s5003_s2, %s5004_s18  }
  0x26   :  { %s5005_s25 = smov [#allocation11]   ;;  %s5006_s29 = smov [#allocation2]  }
  0x27   :  { %s88_s26 = sshll.u32 %s5005_s25, 4  ;;  %s26_s30 = sshll.u32 %s5006_s29, 4  ;;  %s89_s26 = int_to_ptr.vmem [resolvable:$true] %s88_s26  ;;  %s5103_s30 = int_to_ptr.vmem [resolvable:$true] %s26_s30 }
  0x28   :  { %s4857_s15 = scalar_lea.hbm %s6307_s6, 4096 }
  0x29   :  { %p4858_p2 = scmp.ne.s32.totalorder %s6307_s6, %s4857_s15  ;;  %p4861_p3 = scmp.lt.u32.totalorder %s4857_s15, %s6307_s6 }
  0x2b   :  { %p4863_p4 = pnand %p4861_p3, %p4858_p2 }
  0x2d   :  { %4866 = shalt.err (!%p4863_p4)
}
  0x2e   :  { %s4867_s4 = scalar_lea.vmem %s89_s26, 4096  ;;  %p4872_p6 = scmp.lt.s32.totalorder %s89_s26, %s89_s26 }
  0x2f   :  { %p4868_p5 = scmp.ne.s32.totalorder %s89_s26, %s4867_s4  ;;  %p4873_p7 = scmp.lt.s32.totalorder %s4867_s4, %s4867_s4 }
  0x31   :  { %p4874_p8 = por %p4873_p7, %p4872_p6 }
  0x33   :  { %p4875_p9 = pnand %p4874_p8, %p4868_p5 }
  0x35   :  { %4878 = shalt.err (!%p4875_p9)
}
  0x36   :  { %94 = dma.hbm_to_vmem [thread:$0]  %s6307_s6, 4096, %s89_s26, [#allocation12], %s5000_s27, %s5000_s27, %s5001_s28  }
  0x37   :  { %s4879_s18 = scalar_lea.hbm %s6301_s0, 384 }
  0x38   :  { %p4880_p10 = scmp.ne.s32.totalorder %s6301_s0, %s4879_s18  ;;  %p4883_p11 = scmp.lt.u32.totalorder %s4879_s18, %s6301_s0 }
  0x3a   :  { %p4885_p12 = pnand %p4883_p11, %p4880_p10 }
  0x3c   :  { %4888 = shalt.err (!%p4885_p12)
}
  0x3d   :  { %s4889_s12 = scalar_lea.vmem %s5103_s30, 384  ;;  %p4894_p0 = scmp.lt.s32.totalorder %s5103_s30, %s5103_s30 }
  0x3e   :  { %p4890_p13 = scmp.ne.s32.totalorder %s5103_s30, %s4889_s12  ;;  %p4895_p1 = scmp.lt.s32.totalorder %s4889_s12, %s4889_s12 }
  0x40   :  { %p4896_p2 = por %p4895_p1, %p4894_p0 }
  0x42   :  { %p4897_p3 = pnand %p4896_p2, %p4890_p13 }
  0x44   :  { %4900 = shalt.err (!%p4897_p3)
}
  0x45   :  { %s5007_s6 = smov 64   ;;  %s5008_s26 = smov 4  }
  0x46   :  { %32 = dma.hbm_to_vmem [thread:$0]  %s6301_s0, 384, %s5103_s30, [#allocation3], %s5007_s6, %s5007_s6, %s5008_s26  }
  0x47   :  { %s5009_s16 = smov [#allocation7]   ;;  %s5010_s19 = smov [#allocation10]  }
  0x48   :  { %s52_s17 = sshll.u32 %s5009_s16, 4  ;;  %s76_s20 = sshll.u32 %s5010_s19, 4  ;;  %s53_s17 = int_to_ptr.vmem [resolvable:$true] %s52_s17  ;;  %s5140_s20 = int_to_ptr.vmem [resolvable:$true] %s76_s20 }
  0x49   :  { %s4901_s21 = scalar_lea.hbm %s6304_s3, 768 }
  0x4a   :  { %p4902_p4 = scmp.ne.s32.totalorder %s6304_s3, %s4901_s21  ;;  %p4905_p5 = scmp.lt.u32.totalorder %s4901_s21, %s6304_s3 }
  0x4c   :  { %p4907_p6 = pnand %p4905_p5, %p4902_p4 }
  0x4e   :  { %4910 = shalt.err (!%p4907_p6)
}
  0x4f   :  { %s4911_s0 = scalar_lea.vmem %s53_s17, 768  ;;  %p4916_p8 = scmp.lt.s32.totalorder %s53_s17, %s53_s17 }
  0x50   :  { %p4912_p7 = scmp.ne.s32.totalorder %s53_s17, %s4911_s0  ;;  %p4917_p9 = scmp.lt.s32.totalorder %s4911_s0, %s4911_s0 }
  0x52   :  { %p4918_p10 = por %p4917_p9, %p4916_p8 }
  0x54   :  { %p4919_p11 = pnand %p4918_p10, %p4912_p7 }
  0x56   :  { %4922 = shalt.err (!%p4919_p11)
}
  0x57   :  { %58 = dma.hbm_to_vmem [thread:$0]  %s6304_s3, 768, %s53_s17, [#allocation6], %s5000_s27, %s5000_s27, %s5001_s28  }
  0x58   :  { %s4923_s12 = scalar_lea.hbm %s6306_s5, 2048 }
  0x59   :  { %p4924_p12 = scmp.ne.s32.totalorder %s6306_s5, %s4923_s12  ;;  %p4927_p13 = scmp.lt.u32.totalorder %s4923_s12, %s6306_s5 }
  0x5b   :  { %p4929_p0 = pnand %p4927_p13, %p4924_p12 }
  0x5d   :  { %4932 = shalt.err (!%p4929_p0)
}
  0x5e   :  { %s4933_s4 = scalar_lea.vmem %s5140_s20, 2048  ;;  %p4938_p2 = scmp.lt.s32.totalorder %s5140_s20, %s5140_s20 }
  0x5f   :  { %p4934_p1 = scmp.ne.s32.totalorder %s5140_s20, %s4933_s4  ;;  %p4939_p3 = scmp.lt.s32.totalorder %s4933_s4, %s4933_s4 }
  0x61   :  { %p4940_p4 = por %p4939_p3, %p4938_p2 }
  0x63   :  { %p4941_p5 = pnand %p4940_p4, %p4934_p1 }
  0x65   :  { %4944 = shalt.err (!%p4941_p5)
}
  0x66   :  { %82 = dma.hbm_to_vmem [thread:$0]  %s6306_s5, 2048, %s5140_s20, [#allocation9], %s5007_s6, %s5007_s6, %s5008_s26  }
  0x67   :  { %s5011_s13 = smov [#allocation13]   ;;  %s4945_s18 = scalar_lea.hbm %s6308_s7, 4096 }
  0x68   :  { %s100_s21 = sshll.u32 %s5011_s13, 4  ;;  %p4946_p6 = scmp.ne.s32.totalorder %s6308_s7, %s4945_s18  ;;  %s101_s21 = int_to_ptr.vmem [resolvable:$true] %s100_s21 }
  0x69   :  { %p4949_p7 = scmp.lt.u32.totalorder %s4945_s18, %s6308_s7 }
  0x6b   :  { %p4951_p8 = pnand %p4949_p7, %p4946_p6 }
  0x6d   :  { %4954 = shalt.err (!%p4951_p8)
}
  0x6e   :  { %s4955_s25 = scalar_lea.vmem %s101_s21, 4096  ;;  %p4960_p10 = scmp.lt.s32.totalorder %s101_s21, %s101_s21 }
  0x6f   :  { %p4956_p9 = scmp.ne.s32.totalorder %s101_s21, %s4955_s25  ;;  %p4961_p11 = scmp.lt.s32.totalorder %s4955_s25, %s4955_s25 }
  0x71   :  { %p4962_p12 = por %p4961_p11, %p4960_p10 }
  0x73   :  { %p4963_p13 = pnand %p4962_p12, %p4956_p9 }
  0x75   :  { %4966 = shalt.err (!%p4963_p13)
}
  0x76   :  { %106 = dma.hbm_to_vmem [thread:$0]  %s6308_s7, 4096, %s101_s21, [#allocation12], %s5007_s6, %s5007_s6, %s5008_s26  }
  0x77   :  { %4989 = dma.done.wait [#allocation3], 384  }
  0x78   :  { %4990 = vsyncadd [#allocation3], 4294966912 }
  0x79   :  { %4991 = dma.done.wait [#allocation6], 1536  }
  0x7a   :  { %4992 = vsyncadd [#allocation6], 4294965760 }
  0x7b   :  { %4993 = dma.done.wait [#allocation9], 8192  }
  0x7c   :  { %4994 = vsyncadd [#allocation9], 4294959104 }
  0x7d   :  { %4995 = dma.done.wait [#allocation12], 8192  }
  0x7e   :  { %4996 = vsyncadd [#allocation12], 4294959104  ;;  %v5012_v0 = vmov 0.0   ;;  %vm5013_vm0 = vmmov 0   ;;  %v4424_v1 = vld [vmem:[%s6302_s1] sm:$0xff]   ;;  %v4425_v2 = vld [vmem:[%s6302_s1 + $0x8] sm:$0xff]  }
  0x7f   :  { %4065 = vmatprep.subr.bf16.mxu0 %v5012_v0  ;;  %4081 = vmatprep.mubr.msk.bf16.mxu0 %vm5013_vm0, %v5012_v0  ;;  %v4426_v3 = vld [vmem:[%s6302_s1 + $0x10] sm:$0xff]   ;;  %v4427_v4 = vld [vmem:[%s6302_s1 + $0x18] sm:$0xff]   ;;  %v4428_v5 = vld [vmem:[%s6302_s1 + $0x20] sm:$0xff]   ;;  %vm686_vm1 = vcmask 523264   ;;  %vm762_vm2 = vcmask 392192   ;;  %s5015_s7 = smov [#allocation14]  }
  0x80   :  { %4066 = vmatpush3.bf16.msra.mxu0 %v4424_v1  ;;  %v4429_v6 = vld [vmem:[%s6302_s1 + $0x28] sm:$0xff]   ;;  %v4430_v7 = vld [vmem:[%s6302_s1 + $0x30] sm:$0xff]   ;;  %v4431_v8 = vld [vmem:[%s6302_s1 + $0x38] sm:$0xff]   ;;  %s3682_s26 = sshll.u32 %s5015_s7, 4  ;;  %s3683_s26 = int_to_ptr.vmem [resolvable:$true] %s3682_s26 }
  0x81   :  { %4067 = vmatprep.subr.bf16.mxu0 %v5012_v0  ;;  %v4432_v9 = vld [vmem:[#allocation2] sm:$0xff]   ;;  %v4433_v10 = vld [vmem:[#allocation2 + $0x8] sm:$0xff]   ;;  %v4434_v11 = vld [vmem:[#allocation2 + $0x10] sm:$0xff]   ;;  %p4972_p1 = scmp.lt.s32.totalorder %s3683_s26, %s3683_s26 }
  0x82   :  { %v157_v12 = vld [vmem:[#allocation5] sm:$0xff]  ;;  %v158_v16 = vld [vmem:[#allocation5 + $0x8] sm:$0xff]  ;;  %v159_v20 = vld [vmem:[#allocation5 + $0x10] sm:$0xff] }
  0x83   :  { %v160_v24 = vld [vmem:[#allocation5 + $0x18] sm:$0xff]  ;;  %v161_v28 = vld [vmem:[#allocation5 + $0x20] sm:$0xff]  ;;  %v162_v30 = vld [vmem:[#allocation5 + $0x28] sm:$0xff] }
  0x84   :  { %4068 = vmatpush3.bf16.msra.mxu0 %v4425_v2  ;;  %v4435_v36 = vld [vmem:[#allocation8 + $0x4] ss:$12 sps:$4 sm:$0xff]   ;;  %v4437_v37 = vld [vmem:[#allocation8] ss:$12 sps:$4 sm:$0xff]   ;;  %v4438_v38 = vld [vmem:[#allocation8 + $0x8] ss:$12 sps:$4 sm:$0xff]  }
  0x85   :  { %4069 = vmatprep.subr.bf16.mxu0 %v5012_v0  ;;  %v4439_v39 = vld [vmem:[#allocation8 + $0x1c] ss:$12 sps:$4 sm:$0xff]   ;;  %536 = vmatprep.subr.bf16.mxu1 %v4435_v36  ;;  %v4441_v61 = vld [vmem:[#allocation8 + $0x18] ss:$12 sps:$4 sm:$0xff]   ;;  %v4442_v62 = vld [vmem:[#allocation8 + $0x20] ss:$12 sps:$4 sm:$0xff]  }
  0x86   :  { %537 = vmatpush1.bf16.msra.mxu1 %v4437_v37  ;;  %v4443_v2 = vld [vmem:[#allocation8 + $0x34] ss:$12 sps:$4 sm:$0xff]  }
  0x87   :  { %538 = vmatprep.subr.bf16.mxu1 %v4439_v39 }
  0x88   :  { %4070 = vmatpush3.bf16.msra.mxu0 %v4426_v3 }
  0x89   :  { %4071 = vmatprep.subr.bf16.mxu0 %v5012_v0 }
  0x8a   :  { %539 = vmatpush1.bf16.msra.mxu1 %v4441_v61 }
  0x8b   :  { %540 = vmatprep.subr.bf16.mxu1 %v4443_v2 }
  0x8c   :  { %4072 = vmatpush3.bf16.msra.mxu0 %v4427_v4  ;;  %v4445_v4 = vld [vmem:[#allocation8 + $0x30] ss:$12 sps:$4 sm:$0xff]  }
  0x8d   :  { %4073 = vmatprep.subr.bf16.mxu0 %v5012_v0 }
  0x8e   :  { %541 = vmatpush1.bf16.msra.mxu1 %v4445_v4 }
  0x90   :  { %4074 = vmatpush3.bf16.msra.mxu0 %v4428_v5  ;;  %v4446_v5 = vld [vmem:[#allocation8 + $0x38] ss:$12 sps:$4 sm:$0xff]  }
  0x91   :  { %4075 = vmatprep.subr.bf16.mxu0 %v5012_v0 }
  0x94   :  { %4076 = vmatpush3.bf16.msra.mxu0 %v4429_v6  ;;  %v4447_v6 = vld [vmem:[#allocation8 + $0x4c] ss:$12 sps:$4 sm:$0xff]  }
  0x95   :  { %4077 = vmatprep.subr.bf16.mxu0 %v5012_v0  ;;  %542 = vmatprep.subr.bf16.mxu1 %v4447_v6 }
  0x98   :  { %4078 = vmatpush3.bf16.msra.mxu0 %v4430_v7  ;;  %v4449_v7 = vld [vmem:[#allocation8 + $0x48] ss:$12 sps:$4 sm:$0xff]  }
  0x99   :  { %4079 = vmatprep.subr.bf16.mxu0 %v5012_v0  ;;  %543 = vmatpush1.bf16.msra.mxu1 %v4449_v7 }
  0x9c   :  { %4080 = vmatpush3.bf16.msra.mxu0 %v4431_v8  ;;  %v4450_v8 = vld [vmem:[#allocation8 + $0x50] ss:$12 sps:$4 sm:$0xff]  }
  0x9d   :  { %4093 = vmatprep.subr.bf16.mxu0 %v5012_v0 }
  0x9f   :  { %4082 = vmatmul.mubr.bf16.vlgmr.msra.gmra.mrb[0].mxu0 %v4432_v9  ;;  %v4451_v9 = vld [vmem:[#allocation8 + $0x64] ss:$12 sps:$4 sm:$0xff]  }
  0xa0   :  { %4085 = vmatprep.mubr.msk.bf16.mxu0 %vm5013_vm0, %v5012_v0  ;;  %4094 = vmatpush3.bf16.msra.mxu0 %v4438_v38 }
  0xa1   :  { %4095 = vmatprep.subr.bf16.mxu0 %v5012_v0  ;;  %544 = vmatprep.subr.bf16.mxu1 %v4451_v9 }
  0xa4   :  { %4096 = vmatpush3.bf16.msra.mxu0 %v4442_v62 }
  0xa5   :  { %4097 = vmatprep.subr.bf16.mxu0 %v5012_v0 }
  0xa7   :  { %4086 = vmatmul.mubr.bf16.gmra.mrb[4].mxu0 %v4433_v10  ;;  %v4453_v10 = vld [vmem:[#allocation8 + $0x60] ss:$12 sps:$4 sm:$0xff]  }
  0xa8   :  { %4089 = vmatprep.mubr.msk.bf16.mxu0 %vm5013_vm0, %v5012_v0  ;;  %4098 = vmatpush3.bf16.msra.mxu0 %v4446_v5 }
  0xa9   :  { %4099 = vmatprep.subr.bf16.mxu0 %v5012_v0  ;;  %545 = vmatpush1.bf16.msra.mxu1 %v4453_v10 }
  0xac   :  { %4100 = vmatpush3.bf16.msra.mxu0 %v4450_v8 }
  0xad   :  { %4101 = vmatprep.subr.bf16.mxu0 %v5012_v0 }
  0xaf   :  { %4090 = vmatmul.mubr.bf16.gmra.mrb[8].mxu0 %v4434_v11  ;;  %v4454_v11 = vld [vmem:[#allocation8 + $0x68] ss:$12 sps:$4 sm:$0xff]  }
  0xb0   :  { %4109 = vmatprep.mubr.msk.bf16.mxu0 %vm5013_vm0, %v5012_v0  ;;  %4102 = vmatpush3.bf16.msra.mxu0 %v4454_v11 }
  0xb1   :  { %4103 = vmatprep.subr.bf16.mxu0 %v5012_v0 }
 0x172   :  { %v263_v13 = vpop.f32.mrb[0].mxu0 }
 0x173   :  { %v5233_v14 = vadd.f32 %v263_v13, %v157_v12  ;;  %v4083_v15 = vpop.f32.mrb[1].mxu0  ;;  %v4455_v12 = vld [vmem:[#allocation8 + $0x7c] ss:$12 sps:$4 sm:$0xff]   ;;  %v4457_v13 = vld [vmem:[#allocation8 + $0x78] ss:$12 sps:$4 sm:$0xff]  }
 0x174   :  { %v266_v17 = vpop.f32.mrb[2].mxu0  ;;  %v4458_v15 = vld [vmem:[#allocation8 + $0x80] ss:$12 sps:$4 sm:$0xff]   ;;  %546 = vmatprep.subr.bf16.mxu1 %v4455_v12 }
 0x175   :  { %294 = vadd.xlane.f32.xlu0 %v5233_v14  ;;  %v4084_v18 = vpop.f32.mrb[3].mxu0  ;;  %v5236_v19 = vadd.f32 %v266_v17, %v158_v16  ;;  %547 = vmatpush1.bf16.msra.mxu1 %v4457_v13  ;;  %v4459_v16 = vld [vmem:[#allocation8 + $0x94] ss:$12 sps:$4 sm:$0xff]   ;;  %v4461_v17 = vld [vmem:[#allocation8 + $0x90] ss:$12 sps:$4 sm:$0xff]  }
 0x176   :  { %4104 = vmatpush3.bf16.msra.mxu0 %v4458_v15  ;;  %v4462_v18 = vld [vmem:[#allocation8 + $0x98] ss:$12 sps:$4 sm:$0xff]   ;;  %548 = vmatprep.subr.bf16.mxu1 %v4459_v16 }
 0x177   :  { %4105 = vmatprep.subr.bf16.mxu0 %v5012_v0  ;;  %v676_v16 = vld [vmem:[%s6309_s8 + $0x10] ss:$0 sm:$0xff] }
 0x179   :  { %296 = vadd.xlane.f32.xlu0 %v5236_v19  ;;  %549 = vmatpush1.bf16.msra.mxu1 %v4461_v17 }
 0x17a   :  { %v271_v21 = vpop.f32.mrb[4].mxu0  ;;  %4106 = vmatpush3.bf16.msra.mxu0 %v4462_v18  ;;  %v666_v18 = vld [vmem:[%s6309_s8 + $0x7] ss:$0 sm:$0xff] }
 0x17b   :  { %v5239_v22 = vadd.f32 %v271_v21, %v159_v20  ;;  %v4087_v23 = vpop.f32.mrb[5].mxu0  ;;  %v4463_v20 = vld [vmem:[#allocation8 + $0xac] ss:$12 sps:$4 sm:$0xff]   ;;  %4107 = vmatprep.subr.bf16.mxu0 %v5012_v0  ;;  %v4465_v21 = vld [vmem:[#allocation8 + $0xa8] ss:$12 sps:$4 sm:$0xff]  }
 0x17c   :  { %v274_v25 = vpop.f32.mrb[6].mxu0  ;;  %v4466_v23 = vld [vmem:[#allocation8 + $0xb0] ss:$12 sps:$4 sm:$0xff]   ;;  %550 = vmatprep.subr.bf16.mxu1 %v4463_v20 }
 0x17d   :  { %298 = vadd.xlane.f32.xlu1 %v5239_v22  ;;  %v4088_v26 = vpop.f32.mrb[7].mxu0  ;;  %v5242_v27 = vadd.f32 %v274_v25, %v160_v24  ;;  %v5014_v24 = vmov 0   ;;  %551 = vmatpush1.bf16.msra.mxu1 %v4465_v21 }
 0x17e   :  { %568 = vmatprep.mubr.bf16.mxu1 %v5014_v24  ;;  %4108 = vmatpush3.bf16.msra.mxu0 %v4466_v23 }
 0x17f   :  { %4121 = vmatprep.subr.bf16.mxu1 %v5012_v0  ;;  %4157 = vmatprep.subr.bf16.mxu0 %v5012_v0 }
 0x181   :  { %300 = vadd.xlane.f32.xlu1 %v5242_v27 }
 0x182   :  { %v279_v29 = vpop.f32.mrb[8].mxu0 }
 0x183   :  { %v5245_v31 = vadd.f32 %v279_v29, %v161_v28  ;;  %v4091_v32 = vpop.f32.mrb[9].mxu0 }
 0x184   :  { %v282_v33 = vpop.f32.mrb[10].mxu0 }
 0x185   :  { %v5247_v34 = vadd.f32 %v282_v33, %v162_v30  ;;  %302 = vadd.xlane.f32.xlu0 %v5245_v31  ;;  %v4092_v35 = vpop.f32.mrb[11].mxu0 }
 0x187   :  { %304 = vadd.xlane.f32.xlu1 %v5247_v34 }
 0x202   :  { %v295_v40 = vpop.xlane.xlu0 %294 }
 0x203   :  { %v307_v41 = vmul.f32 0.0078125, %v295_v40 }
 0x205   :  { %v5253_v42 = vsub.f32 %v5233_v14, %v307_v41 }
 0x206   :  { %v297_v43 = vpop.xlane.xlu0 %296 }
 0x207   :  { %v308_v44 = vmul.f32 0.0078125, %v297_v43  ;;  %v319_v45 = vmul.f32 %v5253_v42, %v5253_v42 }
 0x209   :  { %325 = vadd.xlane.f32.xlu0 %v319_v45  ;;  %v5258_v46 = vsub.f32 %v5236_v19, %v308_v44  ;;  %v292_v45 = vld [vmem:[%s6309_s8] ss:$0 sm:$0xff] }
 0x20a   :  { %v299_v47 = vpop.xlane.xlu1 %298 }
 0x20b   :  { %v309_v48 = vmul.f32 0.0078125, %v299_v47  ;;  %v320_v49 = vmul.f32 %v5258_v46, %v5258_v46 }
 0x20d   :  { %327 = vadd.xlane.f32.xlu1 %v320_v49  ;;  %v5263_v50 = vsub.f32 %v5239_v22, %v309_v48 }
 0x20e   :  { %v301_v51 = vpop.xlane.xlu1 %300 }
 0x20f   :  { %v310_v52 = vmul.f32 0.0078125, %v301_v51  ;;  %v321_v53 = vmul.f32 %v5263_v50, %v5263_v50 }
 0x211   :  { %329 = vadd.xlane.f32.xlu0 %v321_v53  ;;  %v5268_v54 = vsub.f32 %v5242_v27, %v310_v52 }
 0x212   :  { %v303_v55 = vpop.xlane.xlu0 %302 }
 0x213   :  { %v311_v56 = vmul.f32 0.0078125, %v303_v55  ;;  %v322_v57 = vmul.f32 %v5268_v54, %v5268_v54 }
 0x214   :  { %v305_v58 = vpop.xlane.xlu1 %304 }
 0x215   :  { %v312_v59 = vmul.f32 0.0078125, %v305_v58  ;;  %331 = vadd.xlane.f32.xlu1 %v322_v57  ;;  %v5273_v60 = vsub.f32 %v5245_v31, %v311_v56  ;;  %v293_v56 = vld [vmem:[%s6309_s8 + $0x1] ss:$0 sm:$0xff] }
 0x217   :  { %v323_v63 = vmul.f32 %v5273_v60, %v5273_v60  ;;  %v5278_v1 = vsub.f32 %v5247_v34, %v312_v59 }
 0x219   :  { %333 = vadd.xlane.f32.xlu0 %v323_v63  ;;  %v324_v3 = vmul.f32 %v5278_v1, %v5278_v1 }
 0x21b   :  { %335 = vadd.xlane.f32.xlu1 %v324_v3 }
 0x296   :  { %v326_v25 = vpop.xlane.xlu0 %325 }
 0x297   :  { %v337_v26 = vmul.f32 0.0078125, %v326_v25 }
 0x299   :  { %v343_v28 = vadd.f32 1e-06, %v337_v26 }
 0x29a   :  { %v328_v29 = vpop.xlane.xlu1 %327 }
 0x29b   :  { %4603 = vrsqrt.f32 %v343_v28  ;;  %v338_v30 = vmul.f32 0.0078125, %v328_v29 }
 0x29d   :  { %v344_v32 = vadd.f32 1e-06, %v338_v30 }
 0x29e   :  { %v330_v33 = vpop.xlane.xlu0 %329 }
 0x29f   :  { %4605 = vrsqrt.f32 %v344_v32  ;;  %v339_v35 = vmul.f32 0.0078125, %v330_v33 }
 0x2a1   :  { %v345_v36 = vadd.f32 1e-06, %v339_v35 }
 0x2a2   :  { %v332_v37 = vpop.xlane.xlu1 %331 }
 0x2a3   :  { %4607 = vrsqrt.f32 %v345_v36  ;;  %v340_v38 = vmul.f32 0.0078125, %v332_v37 }
 0x2a5   :  { %v4604_v39 = vpop.eup %4603  ;;  %v346_v40 = vadd.f32 1e-06, %v340_v38 }
 0x2a6   :  { %v334_v41 = vpop.xlane.xlu0 %333  ;;  %v355_v43 = vmul.f32 %v4604_v39, %v5253_v42 }
 0x2a7   :  { %4609 = vrsqrt.f32 %v346_v40  ;;  %v341_v44 = vmul.f32 0.0078125, %v334_v41 }
 0x2a8   :  { %v336_v47 = vpop.xlane.xlu1 %335  ;;  %v361_v53 = vmul.f32 %v355_v43, %v292_v45 }
 0x2a9   :  { %v4606_v48 = vpop.eup %4605  ;;  %v347_v49 = vadd.f32 1e-06, %v341_v44  ;;  %v342_v51 = vmul.f32 0.0078125, %v336_v47 }
 0x2aa   :  { %v356_v52 = vmul.f32 %v4606_v48, %v5258_v46  ;;  %v367_v58 = vadd.f32 %v361_v53, %v293_v56 }
 0x2ab   :  { %4611 = vrsqrt.f32 %v347_v49  ;;  %v348_v55 = vadd.f32 1e-06, %v342_v51 }
 0x2ac   :  { %v362_v42 = vmul.f32 %v356_v52, %v292_v45 }
 0x2ad   :  { %v4608_v57 = vpop.eup %4607  ;;  %4613 = vrsqrt.f32 %v348_v55 }
 0x2ae   :  { %v368_v59 = vadd.f32 %v362_v42, %v293_v56  ;;  %v357_v61 = vmul.f32 %v4608_v57, %v5263_v50 }
 0x2b0   :  { %v373_v62 = vpack.c.bf16 %v368_v59, %v367_v58  ;;  %v363_v2 = vmul.f32 %v357_v61, %v292_v45 }
 0x2b1   :  { %v4610_v63 = vpop.eup %4609 }
 0x2b2   :  { %569 = vmatmul.mubr.bf16.vlgmr.msra.gmra.mrb[0].mxu1 %v373_v62  ;;  %4110 = vmatmul.mubr.bf16.vlgmr.msra.gmra.mrb[12].mxu0 %v373_v62  ;;  %v358_v46 = vmul.f32 %v4610_v63, %v5268_v54  ;;  %v369_v5 = vadd.f32 %v363_v2, %v293_v56 }
 0x2b3   :  { %578 = vmatprep.mubr.bf16.mxu1 %v5014_v24  ;;  %4113 = vmatprep.mubr.msk.bf16.mxu0 %vm5013_vm0, %v5012_v0 }
 0x2b4   :  { %v364_v3 = vmul.f32 %v358_v46, %v292_v45 }
 0x2b5   :  { %v4612_v4 = vpop.eup %4611 }
 0x2b6   :  { %v370_v6 = vadd.f32 %v364_v3, %v293_v56  ;;  %v359_v7 = vmul.f32 %v4612_v4, %v5273_v60 }
 0x2b7   :  { %v4614_v8 = vpop.eup %4613 }
 0x2b8   :  { %v374_v50 = vpack.c.bf16 %v370_v6, %v369_v5  ;;  %v360_v9 = vmul.f32 %v4614_v8, %v5278_v1  ;;  %v365_v10 = vmul.f32 %v359_v7, %v292_v45  ;;  %v656_v1 = vld [vmem:[%s6309_s8 + $0x6] ss:$0 sm:$0xff] }
 0x2ba   :  { %579 = vmatmul.mubr.bf16.gmra.mrb[4].mxu1 %v374_v50  ;;  %4114 = vmatmul.mubr.bf16.gmra.mrb[16].mxu0 %v374_v50  ;;  %v366_v54 = vmul.f32 %v360_v9, %v292_v45  ;;  %v371_v12 = vadd.f32 %v365_v10, %v293_v56 }
 0x2bb   :  { %588 = vmatprep.mubr.bf16.mxu1 %v5014_v24  ;;  %4117 = vmatprep.mubr.msk.bf16.mxu0 %vm5013_vm0, %v5012_v0 }
 0x2bc   :  { %v372_v11 = vadd.f32 %v366_v54, %v293_v56 }
 0x2be   :  { %v375_v13 = vpack.c.bf16 %v372_v11, %v371_v12 }
 0x2c2   :  { %589 = vmatmul.mubr.bf16.gmra.mrb[8].mxu1 %v375_v13  ;;  %4118 = vmatmul.mubr.bf16.gmra.mrb[20].mxu0 %v375_v13 }
 0x2c3   :  { %4127 = vmatprep.mubr.msk.bf16.mxu1 %vm5013_vm0, %v5012_v0  ;;  %4163 = vmatprep.mubr.msk.bf16.mxu0 %vm5013_vm0, %v5012_v0 }
 0x385   :  { %v570_v60 = vpop.f32.mrb[0].mxu1  ;;  %v633_v15 = vpop.f32.mrb[12].mxu0 }
 0x386   :  { %v572_v17 = vpop.f32.mrb[1].mxu1  ;;  %v4111_v20 = vpop.f32.mrb[13].mxu0  ;;  %v657_v25 = vadd.f32 %v656_v1, %v570_v60  ;;  %v677_v26 = vadd.f32 %v676_v16, %v633_v15 }
 0x387   :  { %v574_v21 = vpop.f32.mrb[2].mxu1  ;;  %v636_v23 = vpop.f32.mrb[14].mxu0  ;;  %v667_v33 = vadd.f32 %v666_v18, %v572_v17 }
 0x388   :  { %v658_v28 = vadd.f32 %v656_v1, %v574_v21  ;;  %v678_v29 = vadd.f32 %v676_v16, %v636_v23  ;;  %v576_v30 = vpop.f32.mrb[3].mxu1  ;;  %v4112_v32 = vpop.f32.mrb[15].mxu0 }
 0x389   :  { %v668_v35 = vadd.f32 %v666_v18, %v576_v30 }
 0x38a   :  { %v5322_v36 = vpack.c.bf16 %v678_v29, %v677_v26  ;;  %v663_v37 = vpack.c.bf16 %v658_v28, %v657_v25  ;;  %v286_v26 = vld [vmem:[#allocation7] sm:$0xff]  ;;  %v287_v29 = vld [vmem:[#allocation7 + $0x8] sm:$0xff] }
 0x38b   :  { %v673_v38 = vpack.c.bf16 %v668_v35, %v667_v33 }
 0x38d   :  { %910 = vrot.lane.b32.xlu0 %v673_v38, %s5007_s6  ;;  %v580_v39 = vpop.f32.mrb[4].mxu1  ;;  %v641_v40 = vpop.f32.mrb[16].mxu0  ;;  %v697_v41 = vsel %vm686_vm1, %v673_v38, 0 }
 0x38e   :  { %v582_v43 = vpop.f32.mrb[5].mxu1  ;;  %v4115_v44 = vpop.f32.mrb[17].mxu0  ;;  %4122 = vmatpush3.bf16.xpose.msra.mxu1 %v697_v41  ;;  %v659_v48 = vadd.f32 %v656_v1, %v580_v39  ;;  %v679_v49 = vadd.f32 %v676_v16, %v641_v40  ;;  %v288_v40 = vld [vmem:[#allocation7 + $0x10] sm:$0xff] }
 0x38f   :  { %v584_v45 = vpop.f32.mrb[6].mxu1  ;;  %v644_v47 = vpop.f32.mrb[18].mxu0  ;;  %4123 = vmatprep.subr.bf16.mxu1 %v5012_v0  ;;  %v669_v56 = vadd.f32 %v666_v18, %v582_v43  ;;  %v289_v43 = vld [vmem:[#allocation7 + $0x18] sm:$0xff] }
 0x390   :  { %v660_v51 = vadd.f32 %v656_v1, %v584_v45  ;;  %v680_v52 = vadd.f32 %v676_v16, %v644_v47  ;;  %v586_v53 = vpop.f32.mrb[7].mxu1  ;;  %v4116_v55 = vpop.f32.mrb[19].mxu0 }
 0x391   :  { %v670_v42 = vadd.f32 %v666_v18, %v586_v53 }
 0x392   :  { %v5327_v57 = vpack.c.bf16 %v680_v52, %v679_v49  ;;  %v664_v58 = vpack.c.bf16 %v660_v51, %v659_v48  ;;  %v290_v52 = vld [vmem:[#allocation7 + $0x20] sm:$0xff] }
 0x393   :  { %v674_v59 = vpack.c.bf16 %v670_v42, %v669_v56  ;;  %v291_v56 = vld [vmem:[#allocation7 + $0x28] sm:$0xff] }
 0x394   :  { %903 = vrot.lane.b32.xlu0 %v664_v58, %s5007_s6 }
 0x395   :  { %912 = vrot.lane.b32.xlu1 %v674_v59, %s5007_s6  ;;  %v590_v61 = vpop.f32.mrb[8].mxu1  ;;  %v649_v62 = vpop.f32.mrb[20].mxu0  ;;  %v700_v63 = vsel %vm686_vm1, %v674_v59, 0 }
 0x396   :  { %v592_v46 = vpop.f32.mrb[9].mxu1  ;;  %v4119_v2 = vpop.f32.mrb[21].mxu0  ;;  %4124 = vmatpush3.bf16.xpose.msra.mxu1 %v700_v63  ;;  %v661_v5 = vadd.f32 %v656_v1, %v590_v61  ;;  %v681_v6 = vadd.f32 %v676_v16, %v649_v62 }
 0x397   :  { %v594_v3 = vpop.f32.mrb[10].mxu1  ;;  %v652_v4 = vpop.f32.mrb[22].mxu0  ;;  %4125 = vmatprep.subr.bf16.mxu1 %v5012_v0  ;;  %v671_v10 = vadd.f32 %v666_v18, %v592_v46 }
 0x398   :  { %v662_v7 = vadd.f32 %v656_v1, %v594_v3  ;;  %v682_v8 = vadd.f32 %v676_v16, %v652_v4  ;;  %v596_v50 = vpop.f32.mrb[11].mxu1  ;;  %v4120_v9 = vpop.f32.mrb[23].mxu0 }
 0x399   :  { %v672_v54 = vadd.f32 %v666_v18, %v596_v50 }
 0x39a   :  { %v5333_v11 = vpack.c.bf16 %v682_v8, %v681_v6  ;;  %v665_v12 = vpack.c.bf16 %v662_v7, %v661_v5 }
 0x39b   :  { %v675_v13 = vpack.c.bf16 %v672_v54, %v671_v10 }
 0x39d   :  { %914 = vrot.lane.b32.xlu1 %v675_v13, %s5007_s6  ;;  %v703_v60 = vsel %vm686_vm1, %v675_v13, 0 }
 0x39e   :  { %4126 = vmatpush3.bf16.xpose.msra.mxu1 %v703_v60 }
 0x39f   :  { %4139 = vmatprep.subr.bf16.mxu1 %v5012_v0 }
 0x3a1   :  { %901 = vrot.lane.b32.xlu1 %v663_v37, %s5007_s6 }
 0x3a5   :  { %905 = vrot.lane.b32.xlu1 %v665_v12, %s5007_s6  ;;  %4128 = vmatmul.mubr.msk.bf16.vlgmr.msra.gmra.mrb[12].mxu1 %vm686_vm1, %v663_v37 }
 0x3a6   :  { %4140 = vmatpush3.bf16.msra.mxu1 %v5322_v36  ;;  %4131 = vmatprep.mubr.msk.bf16.mxu1 %vm5013_vm0, %v5012_v0 }
 0x3a7   :  { %4141 = vmatprep.subr.bf16.mxu1 %v5012_v0 }
 0x3aa   :  { %4142 = vmatpush3.bf16.msra.mxu1 %v5327_v57 }
 0x3ab   :  { %4143 = vmatprep.subr.bf16.mxu1 %v5012_v0 }
 0x3ad   :  { %4132 = vmatmul.mubr.msk.bf16.gmra.mrb[16].mxu1 %vm686_vm1, %v664_v58 }
 0x3ae   :  { %4144 = vmatpush3.bf16.msra.mxu1 %v5333_v11  ;;  %4135 = vmatprep.mubr.msk.bf16.mxu1 %vm5013_vm0, %v5012_v0 }
 0x3af   :  { %4175 = vmatprep.subr.bf16.mxu1 %v5012_v0 }
 0x3b5   :  { %4136 = vmatmul.mubr.msk.bf16.gmra.mrb[20].mxu1 %vm686_vm1, %v665_v12 }
 0x3b6   :  { %4145 = vmatprep.mubr.msk.bf16.mxu1 %vm5013_vm0, %v5012_v0 }
 0x3ff   :  { %v911_v1 = vpop.permute.xlu0 %910 }
 0x400   :  { %v926_v15 = vsel %vm686_vm1, %v911_v1, 0 }
 0x401   :  { %4158 = vmatpush3.bf16.xpose.msra.mxu0 %v926_v15 }
 0x402   :  { %4159 = vmatprep.subr.bf16.mxu0 %v5012_v0 }
 0x406   :  { %v904_v23 = vpop.permute.xlu0 %903 }
 0x407   :  { %v913_v16 = vpop.permute.xlu1 %912 }
 0x408   :  { %v929_v17 = vsel %vm686_vm1, %v913_v16, 0 }
 0x409   :  { %4160 = vmatpush3.bf16.xpose.msra.mxu0 %v929_v17 }
 0x40a   :  { %4161 = vmatprep.subr.bf16.mxu0 %v5012_v0 }
 0x40f   :  { %v915_v18 = vpop.permute.xlu1 %914 }
 0x410   :  { %v932_v20 = vsel %vm686_vm1, %v915_v18, 0 }
 0x411   :  { %4162 = vmatpush3.bf16.xpose.msra.mxu0 %v932_v20 }
 0x412   :  { %4193 = vmatprep.subr.bf16.mxu0 %v5012_v0 }
 0x413   :  { %v902_v21 = vpop.permute.xlu1 %901 }
 0x417   :  { %v906_v25 = vpop.permute.xlu1 %905 }
 0x418   :  { %4164 = vmatmul.mubr.msk.bf16.vlgmr.msra.gmra.mrb[24].mxu0 %vm686_vm1, %v902_v21 }
 0x419   :  { %4167 = vmatprep.mubr.msk.bf16.mxu0 %vm5013_vm0, %v5012_v0 }
 0x420   :  { %4168 = vmatmul.mubr.msk.bf16.gmra.mrb[28].mxu0 %vm686_vm1, %v904_v23 }
 0x421   :  { %4171 = vmatprep.mubr.msk.bf16.mxu0 %vm5013_vm0, %v5012_v0 }
 0x428   :  { %4172 = vmatmul.mubr.msk.bf16.gmra.mrb[32].mxu0 %vm686_vm1, %v906_v25 }
 0x429   :  { %4209 = vmatprep.mubr.msk.bf16.mxu0 %vm5013_vm0, %v5012_v0 }
 0x478   :  { %v739_v28 = vpop.f32.mrb[12].mxu1 }
 0x479   :  { %v5370_v30 = vadd.f32 %v739_v28, %v286_v26  ;;  %v4129_v32 = vpop.f32.mrb[13].mxu1 }
 0x47a   :  { %v742_v33 = vpop.f32.mrb[14].mxu1 }
 0x47b   :  { %v5372_v35 = vadd.f32 %v742_v33, %v287_v29  ;;  %v4130_v37 = vpop.f32.mrb[15].mxu1  ;;  %v763_v38 = vsel %vm762_vm2, %v5370_v30, -inf }
 0x47c   :  { %764 = vmax.xlane.f32.xlu0 %v763_v38 }
 0x47d   :  { %v766_v39 = vsel %vm762_vm2, %v5372_v35, -inf }
 0x47e   :  { %767 = vmax.xlane.f32.xlu1 %v766_v39 }
 0x480   :  { %v747_v41 = vpop.f32.mrb[16].mxu1 }
 0x481   :  { %v748_v44 = vadd.f32 %v747_v41, %v288_v40  ;;  %v4133_v45 = vpop.f32.mrb[17].mxu1 }
 0x482   :  { %v750_v47 = vpop.f32.mrb[18].mxu1 }
 0x483   :  { %v5378_v48 = vadd.f32 %v750_v47, %v289_v43  ;;  %v4134_v49 = vpop.f32.mrb[19].mxu1  ;;  %v769_v51 = vsel %vm762_vm2, %v748_v44, -inf }
 0x484   :  { %770 = vmax.xlane.f32.xlu0 %v769_v51 }
 0x485   :  { %v772_v53 = vsel %vm762_vm2, %v5378_v48, -inf }
 0x488   :  { %773 = vmax.xlane.f32.xlu0 %v772_v53  ;;  %v755_v55 = vpop.f32.mrb[20].mxu1 }
 0x489   :  { %v5383_v42 = vadd.f32 %v755_v55, %v290_v52  ;;  %v4137_v58 = vpop.f32.mrb[21].mxu1 }
 0x48a   :  { %v758_v59 = vpop.f32.mrb[22].mxu1 }
 0x48b   :  { %v5385_v61 = vadd.f32 %v758_v59, %v291_v56  ;;  %v4138_v62 = vpop.f32.mrb[23].mxu1  ;;  %v775_v63 = vsel %vm762_vm2, %v5383_v42, -inf }
 0x48c   :  { %776 = vmax.xlane.f32.xlu0 %v775_v63 }
 0x48d   :  { %v778_v46 = vsel %vm762_vm2, %v5385_v61, -inf }
 0x48e   :  { %779 = vmax.xlane.f32.xlu1 %v778_v46 }
 0x4eb   :  { %v968_v2 = vpop.f32.mrb[24].mxu0 }
 0x4ec   :  { %v5391_v3 = vadd.f32 %v968_v2, %v286_v26  ;;  %v4165_v4 = vpop.f32.mrb[25].mxu0 }
 0x4ed   :  { %v971_v5 = vpop.f32.mrb[26].mxu0 }
 0x4ee   :  { %v5393_v6 = vadd.f32 %v971_v5, %v287_v29  ;;  %v4166_v7 = vpop.f32.mrb[27].mxu0  ;;  %v991_v8 = vsel %vm762_vm2, %v5391_v3, -inf }
 0x4ef   :  { %992 = vmax.xlane.f32.xlu0 %v991_v8 }
 0x4f0   :  { %v994_v50 = vsel %vm762_vm2, %v5393_v6, -inf }
 0x4f1   :  { %995 = vmax.xlane.f32.xlu1 %v994_v50 }
 0x4f3   :  { %v976_v9 = vpop.f32.mrb[28].mxu0 }
 0x4f4   :  { %v5399_v10 = vadd.f32 %v976_v9, %v288_v40  ;;  %v4169_v54 = vpop.f32.mrb[29].mxu0 }
 0x4f5   :  { %v979_v12 = vpop.f32.mrb[30].mxu0 }
 0x4f6   :  { %v5401_v13 = vadd.f32 %v979_v12, %v289_v43  ;;  %v4170_v60 = vpop.f32.mrb[31].mxu0  ;;  %v997_v1 = vsel %vm762_vm2, %v5399_v10, -inf }
 0x4f7   :  { %998 = vmax.xlane.f32.xlu0 %v997_v1 }
 0x4f8   :  { %v1000_v15 = vsel %vm762_vm2, %v5401_v13, -inf }
 0x4f9   :  { %1001 = vmax.xlane.f32.xlu1 %v1000_v15 }
 0x4fb   :  { %v984_v16 = vpop.f32.mrb[32].mxu0 }
 0x4fc   :  { %v5407_v17 = vadd.f32 %v984_v16, %v290_v52  ;;  %v4173_v18 = vpop.f32.mrb[33].mxu0 }
 0x4fd   :  { %v987_v20 = vpop.f32.mrb[34].mxu0 }
 0x4fe   :  { %v5409_v21 = vadd.f32 %v987_v20, %v291_v56  ;;  %v4174_v23 = vpop.f32.mrb[35].mxu0  ;;  %v1003_v25 = vsel %vm762_vm2, %v5407_v17, -inf }
 0x4ff   :  { %1004 = vmax.xlane.f32.xlu0 %v1003_v25 }
 0x500   :  { %v1006_v26 = vsel %vm762_vm2, %v5409_v21, -inf }
 0x501   :  { %1007 = vmax.xlane.f32.xlu1 %v1006_v26 }
 0x509   :  { %v765_v28 = vpop.xlane.xlu0 %764 }
 0x50a   :  { %v781_v29 = vsub.f32 %v5370_v30, %v765_v28 }
 0x50b   :  { %v768_v32 = vpop.xlane.xlu1 %767 }
 0x50c   :  { %v787_v33 = vmul.f32 1.442695, %v781_v29  ;;  %v782_v37 = vsub.f32 %v5372_v35, %v768_v32 }
 0x50e   :  { %4615 = vpow2.f32 %v787_v33  ;;  %v789_v38 = vmul.f32 1.442695, %v782_v37 }
 0x510   :  { %4617 = vpow2.f32 %v789_v38 }
 0x511   :  { %v771_v39 = vpop.xlane.xlu0 %770 }
 0x512   :  { %v783_v40 = vsub.f32 %v748_v44, %v771_v39 }
 0x514   :  { %v791_v41 = vmul.f32 1.442695, %v783_v40 }
 0x515   :  { %v774_v43 = vpop.xlane.xlu0 %773 }
 0x516   :  { %4619 = vpow2.f32 %v791_v41  ;;  %v784_v45 = vsub.f32 %v5378_v48, %v774_v43 }
 0x518   :  { %v5418_v47 = vpop.eup %4615  ;;  %v793_v49 = vmul.f32 1.442695, %v784_v45 }
 0x519   :  { %v777_v51 = vpop.xlane.xlu0 %776  ;;  %v799_v30 = vsel %vm762_vm2, %v5418_v47, 0.0 }
 0x51a   :  { %v5422_v52 = vpop.eup %4617  ;;  %4621 = vpow2.f32 %v793_v49  ;;  %v785_v35 = vsub.f32 %v5383_v42, %v777_v51  ;;  %800 = vadd.xlane.f32.xlu0 %v799_v30 }
 0x51b   :  { %v780_v53 = vpop.xlane.xlu1 %779  ;;  %v802_v44 = vsel %vm762_vm2, %v5422_v52, 0.0 }
 0x51c   :  { %v795_v55 = vmul.f32 1.442695, %v785_v35  ;;  %v786_v48 = vsub.f32 %v5385_v61, %v780_v53  ;;  %803 = vadd.xlane.f32.xlu1 %v802_v44 }
 0x51e   :  { %4623 = vpow2.f32 %v795_v55  ;;  %v797_v56 = vmul.f32 1.442695, %v786_v48 }
 0x520   :  { %v5428_v58 = vpop.eup %4619  ;;  %4625 = vpow2.f32 %v797_v56 }
 0x521   :  { %v805_v59 = vsel %vm762_vm2, %v5428_v58, 0.0 }
 0x522   :  { %806 = vadd.xlane.f32.xlu0 %v805_v59 }
 0x524   :  { %v5432_v62 = vpop.eup %4621 }
 0x525   :  { %v808_v42 = vsel %vm762_vm2, %v5432_v62, 0.0 }
 0x526   :  { %809 = vadd.xlane.f32.xlu1 %v808_v42 }
 0x528   :  { %v5436_v63 = vpop.eup %4623 }
 0x529   :  { %v811_v61 = vsel %vm762_vm2, %v5436_v63, 0.0 }
 0x52a   :  { %v5440_v46 = vpop.eup %4625  ;;  %812 = vadd.xlane.f32.xlu0 %v811_v61 }
 0x52b   :  { %v814_v2 = vsel %vm762_vm2, %v5440_v46, 0.0 }
 0x52c   :  { %815 = vadd.xlane.f32.xlu1 %v814_v2 }
 0x57c   :  { %v993_v4 = vpop.xlane.xlu0 %992 }
 0x57d   :  { %v1009_v5 = vsub.f32 %v5391_v3, %v993_v4 }
 0x57e   :  { %v996_v7 = vpop.xlane.xlu1 %995 }
 0x57f   :  { %v1015_v8 = vmul.f32 1.442695, %v1009_v5  ;;  %v1010_v50 = vsub.f32 %v5393_v6, %v996_v7 }
 0x581   :  { %4627 = vpow2.f32 %v1015_v8  ;;  %v1017_v9 = vmul.f32 1.442695, %v1010_v50 }
 0x583   :  { %4629 = vpow2.f32 %v1017_v9 }
 0x584   :  { %v999_v54 = vpop.xlane.xlu0 %998 }
 0x585   :  { %v1011_v12 = vsub.f32 %v5399_v10, %v999_v54 }
 0x586   :  { %v1002_v60 = vpop.xlane.xlu1 %1001 }
 0x587   :  { %v1019_v1 = vmul.f32 1.442695, %v1011_v12  ;;  %v1012_v15 = vsub.f32 %v5401_v13, %v1002_v60 }
 0x589   :  { %4631 = vpow2.f32 %v1019_v1  ;;  %v1021_v16 = vmul.f32 1.442695, %v1012_v15 }
 0x58b   :  { %v5448_v18 = vpop.eup %4627  ;;  %4633 = vpow2.f32 %v1021_v16 }
 0x58c   :  { %v1005_v3 = vpop.xlane.xlu0 %1004  ;;  %v1027_v20 = vsel %vm762_vm2, %v5448_v18, 0.0 }
 0x58d   :  { %v5452_v6 = vpop.eup %4629  ;;  %v1013_v23 = vsub.f32 %v5407_v17, %v1005_v3  ;;  %1028 = vadd.xlane.f32.xlu0 %v1027_v20 }
 0x58e   :  { %v1030_v10 = vsel %vm762_vm2, %v5452_v6, 0.0  ;;  %v1008_v33 = vpop.xlane.xlu1 %1007 }
 0x58f   :  { %v1023_v25 = vmul.f32 1.442695, %v1013_v23  ;;  %1031 = vadd.xlane.f32.xlu1 %v1030_v10  ;;  %v1014_v51 = vsub.f32 %v5409_v21, %v1008_v33 }
 0x591   :  { %4635 = vpow2.f32 %v1023_v25  ;;  %v1025_v53 = vmul.f32 1.442695, %v1014_v51  ;;  %v4470_v51 = vld [vmem:[#allocation10 + $0x18] sm:$0xff]  }
 0x593   :  { %v5457_v13 = vpop.eup %4631 }
 0x594   :  { %v1033_v26 = vsel %vm762_vm2, %v5457_v13, 0.0 }
 0x595   :  { %v5461_v28 = vpop.eup %4633  ;;  %1034 = vadd.xlane.f32.xlu0 %v1033_v26 }
 0x596   :  { %v1036_v29 = vsel %vm762_vm2, %v5461_v28, 0.0 }
 0x597   :  { %1037 = vadd.xlane.f32.xlu1 %v1036_v29 }
 0x59b   :  { %v5465_v17 = vpop.eup %4635 }
 0x59c   :  { %v1039_v32 = vsel %vm762_vm2, %v5465_v17, 0.0 }
 0x59d   :  { %1040 = vadd.xlane.f32.xlu0 %v1039_v32 }
 0x5a7   :  { %v801_v37 = vpop.xlane.xlu0 %800 }
 0x5a8   :  { %4637 = vrcp.f32 %v801_v37  ;;  %1065 = vrot.lane.b32.xlu1 %v5327_v57, %s5007_s6 }
 0x5a9   :  { %v804_v38 = vpop.xlane.xlu1 %803 }
 0x5aa   :  { %4639 = vrcp.f32 %v804_v38 }
 0x5af   :  { %v807_v39 = vpop.xlane.xlu0 %806 }
 0x5b0   :  { %4641 = vrcp.f32 %v807_v39 }
 0x5b2   :  { %v4638_v40 = vpop.eup %4637 }
 0x5b3   :  { %1063 = vrot.lane.b32.xlu0 %v5322_v36, %s5007_s6  ;;  %v810_v41 = vpop.xlane.xlu1 %809  ;;  %v823_v45 = vmul.f32 %v4638_v40, %v5418_v47 }
 0x5b4   :  { %v4640_v43 = vpop.eup %4639  ;;  %4643 = vrcp.f32 %v810_v41 }
 0x5b5   :  { %v824_v49 = vmul.f32 %v4640_v43, %v5422_v52 }
 0x5b7   :  { %v829_v30 = vpack.c.bf16 %v824_v49, %v823_v45  ;;  %v813_v35 = vpop.xlane.xlu0 %812  ;;  %v4468_v45 = vld [vmem:[#allocation10 + $0x8] sm:$0xff]   ;;  %v4469_v49 = vld [vmem:[#allocation10 + $0x10] sm:$0xff]  }
 0x5b8   :  { %4645 = vrcp.f32 %v813_v35  ;;  %v4472_v35 = vld [vmem:[#allocation10 + $0x28] sm:$0xff]  }
 0x5b9   :  { %4146 = vmatmul.mubr.msk.bf16.vlgmr.msra.gmra.mrb[24].mxu1 %vm762_vm2, %v829_v30  ;;  %v816_v57 = vpop.xlane.xlu1 %815  ;;  %v4471_v30 = vld [vmem:[#allocation10 + $0x20] sm:$0xff]  }
 0x5ba   :  { %4647 = vrcp.f32 %v816_v57  ;;  %4149 = vmatprep.mubr.msk.bf16.mxu1 %vm5013_vm0, %v5012_v0  ;;  %v4642_v36 = vpop.eup %4641  ;;  %v4473_v57 = vld [vmem:[#allocation10 + $0x30] sm:$0xff]  }
 0x5bb   :  { %4649 = vpow2.f32 %v1025_v53  ;;  %v825_v47 = vmul.f32 %v4642_v36, %v5428_v58  ;;  %v4474_v53 = vld [vmem:[#allocation10 + $0x38] sm:$0xff]  }
 0x5be   :  { %v4644_v44 = vpop.eup %4643 }
 0x5bf   :  { %v826_v52 = vmul.f32 %v4644_v44, %v5432_v62 }
 0x5c1   :  { %v830_v55 = vpack.c.bf16 %v826_v52, %v825_v47 }
 0x5c2   :  { %v4646_v21 = vpop.eup %4645 }
 0x5c3   :  { %4150 = vmatmul.mubr.msk.bf16.gmra.mrb[28].mxu1 %vm762_vm2, %v830_v55  ;;  %v827_v59 = vmul.f32 %v4646_v21, %v5436_v63 }
 0x5c4   :  { %v4648_v48 = vpop.eup %4647  ;;  %4153 = vmatprep.mubr.msk.bf16.mxu1 %vm5013_vm0, %v5012_v0 }
 0x5c5   :  { %v828_v56 = vmul.f32 %v4648_v48, %v5440_v46  ;;  %v4650_v42 = vpop.eup %4649 }
 0x5c6   :  { %v1042_v58 = vsel %vm762_vm2, %v4650_v42, 0.0 }
 0x5c7   :  { %v831_v61 = vpack.c.bf16 %v828_v56, %v827_v59 }
 0x5cb   :  { %4154 = vmatmul.mubr.msk.bf16.gmra.mrb[32].mxu1 %vm762_vm2, %v831_v61 }
 0x5cc   :  { %1043 = vadd.xlane.f32.xlu1 %v1042_v58  ;;  %4181 = vmatprep.mubr.msk.bf16.mxu1 %vm5013_vm0, %v5012_v0 }
 0x5dd   :  { %1067 = vrot.lane.b32.xlu1 %v5333_v11, %s5007_s6 }
 0x61a   :  { %v1029_v62 = vpop.xlane.xlu0 %1028 }
 0x61c   :  { %v1032_v4 = vpop.xlane.xlu1 %1031 }
 0x61d   :  { %4651 = vrcp.f32 %v1032_v4 }
 0x61e   :  { %4653 = vrcp.f32 %v1029_v62 }
 0x622   :  { %v1035_v2 = vpop.xlane.xlu0 %1034 }
 0x624   :  { %v1038_v46 = vpop.xlane.xlu1 %1037 }
 0x625   :  { %4655 = vrcp.f32 %v1038_v46 }
 0x626   :  { %4657 = vrcp.f32 %v1035_v2 }
 0x627   :  { %v4652_v8 = vpop.eup %4651 }
 0x628   :  { %v1066_v63 = vpop.permute.xlu1 %1065  ;;  %v4654_v11 = vpop.eup %4653  ;;  %v1052_v9 = vmul.f32 %v4652_v8, %v5452_v6 }
 0x629   :  { %v1051_v54 = vmul.f32 %v4654_v11, %v5448_v18 }
 0x62a   :  { %v1041_v5 = vpop.xlane.xlu0 %1040 }
 0x62b   :  { %v1057_v60 = vpack.c.bf16 %v1052_v9, %v1051_v54 }
 0x62e   :  { %v1064_v7 = vpop.permute.xlu0 %1063 }
 0x62f   :  { %4176 = vmatpush3.bf16.msra.mxu1 %v1064_v7  ;;  %v4656_v1 = vpop.eup %4655 }
 0x630   :  { %4177 = vmatprep.subr.bf16.mxu1 %v5012_v0  ;;  %v4658_v15 = vpop.eup %4657  ;;  %v1054_v16 = vmul.f32 %v4656_v1, %v5461_v28 }
 0x631   :  { %v1053_v3 = vmul.f32 %v4658_v15, %v5457_v13 }
 0x633   :  { %4178 = vmatpush3.bf16.msra.mxu1 %v1066_v63  ;;  %v1058_v20 = vpack.c.bf16 %v1054_v16, %v1053_v3 }
 0x634   :  { %4179 = vmatprep.subr.bf16.mxu1 %v5012_v0 }
 0x659   :  { %v1044_v50 = vpop.xlane.xlu1 %1043 }
 0x65a   :  { %4659 = vrcp.f32 %v1044_v50 }
 0x65b   :  { %4661 = vrcp.f32 %v1041_v5 }
 0x65d   :  { %v1068_v12 = vpop.permute.xlu1 %1067 }
 0x65e   :  { %4180 = vmatpush3.bf16.msra.mxu1 %v1068_v12 }
 0x661   :  { %4182 = vmatmul.mubr.msk.bf16.vlgmr.msra.gmra.mrb[36].mxu1 %vm762_vm2, %v1057_v60 }
 0x662   :  { %4185 = vmatprep.mubr.msk.bf16.mxu1 %vm5013_vm0, %v5012_v0 }
 0x664   :  { %v4660_v6 = vpop.eup %4659 }
 0x665   :  { %v4662_v18 = vpop.eup %4661  ;;  %v1056_v23 = vmul.f32 %v4660_v6, %v4650_v42 }
 0x666   :  { %v1055_v10 = vmul.f32 %v4662_v18, %v5465_v17  ;;  %v4467_v17 = vld [vmem:[#allocation10] sm:$0xff]  }
 0x667   :  { %4194 = vmatpush3.bf16.msra.mxu0 %v4467_v17 }
 0x668   :  { %v1059_v25 = vpack.c.bf16 %v1056_v23, %v1055_v10  ;;  %4195 = vmatprep.subr.bf16.mxu0 %v5012_v0  ;;  %v1298_v10 = vld [vmem:[%s6309_s8 + $0x4] ss:$0 sm:$0xff] }
 0x669   :  { %4186 = vmatmul.mubr.msk.bf16.gmra.mrb[40].mxu1 %vm762_vm2, %v1058_v20 }
 0x66a   :  { %4189 = vmatprep.mubr.msk.bf16.mxu1 %vm5013_vm0, %v5012_v0 }
 0x66b   :  { %4196 = vmatpush3.bf16.msra.mxu0 %v4468_v45 }
 0x66c   :  { %4197 = vmatprep.subr.bf16.mxu0 %v5012_v0 }
 0x66f   :  { %4198 = vmatpush3.bf16.msra.mxu0 %v4469_v49 }
 0x670   :  { %4199 = vmatprep.subr.bf16.mxu0 %v5012_v0 }
 0x671   :  { %4190 = vmatmul.mubr.msk.bf16.gmra.mrb[44].mxu1 %vm762_vm2, %v1059_v25 }
 0x672   :  { %1529 = vmatprep.mubr.bf16.mxu1 %v5014_v24 }
 0x673   :  { %4200 = vmatpush3.bf16.msra.mxu0 %v4470_v51 }
 0x674   :  { %4201 = vmatprep.subr.bf16.mxu0 %v5012_v0 }
 0x677   :  { %4202 = vmatpush3.bf16.msra.mxu0 %v4471_v30 }
 0x678   :  { %4203 = vmatprep.subr.bf16.mxu0 %v5012_v0 }
 0x67b   :  { %4204 = vmatpush3.bf16.msra.mxu0 %v4472_v35 }
 0x67c   :  { %4205 = vmatprep.subr.bf16.mxu0 %v5012_v0 }
 0x67f   :  { %4206 = vmatpush3.bf16.msra.mxu0 %v4473_v57 }
 0x680   :  { %4207 = vmatprep.subr.bf16.mxu0 %v5012_v0 }
 0x683   :  { %4208 = vmatpush3.bf16.msra.mxu0 %v4474_v53  ;;  %v4477_v53 = vld [vmem:[#allocation11 + $0x4] ss:$8 sps:$4 sm:$0xff]  }
 0x684   :  { %1497 = vmatprep.subr.bf16.mxu1 %v4477_v53 }
 0x68c   :  { %v875_v26 = vpop.f32.mrb[24].mxu1 }
 0x68d   :  { %v4147_v28 = vpop.f32.mrb[25].mxu1 }
 0x68e   :  { %v878_v29 = vpop.f32.mrb[26].mxu1 }
 0x68f   :  { %v4148_v13 = vpop.f32.mrb[27].mxu1 }
 0x696   :  { %v883_v32 = vpop.f32.mrb[28].mxu1 }
 0x697   :  { %v4151_v33 = vpop.f32.mrb[29].mxu1 }
 0x698   :  { %v886_v37 = vpop.f32.mrb[30].mxu1 }
 0x699   :  { %v4152_v38 = vpop.f32.mrb[31].mxu1 }
 0x69e   :  { %v5507_v39 = vpop.f32.mrb[32].mxu1 }
 0x69f   :  { %v4155_v40 = vpop.f32.mrb[33].mxu1 }
 0x6a0   :  { %v5509_v41 = vpop.f32.mrb[34].mxu1 }
 0x6a1   :  { %v4156_v43 = vpop.f32.mrb[35].mxu1 }
 0x734   :  { %v1115_v36 = vpop.f32.mrb[36].mxu1 }
 0x735   :  { %v4183_v44 = vpop.f32.mrb[37].mxu1 }
 0x736   :  { %v1118_v47 = vpop.f32.mrb[38].mxu1 }
 0x737   :  { %v4394_v52 = vpack.i.bf16 %v1118_v47, %v1115_v36  ;;  %v4184_v55 = vpop.f32.mrb[39].mxu1  ;;  %v4480_v36 = vld [vmem:[#allocation11 + $0x14] ss:$8 sps:$4 sm:$0xff]  }
 0x739   :  { %4395 = vrot.lane.b32.xlu1 %v4394_v52, %s5007_s6 }
 0x73c   :  { %v1123_v21 = vpop.f32.mrb[40].mxu1 }
 0x73d   :  { %v4187_v48 = vpop.f32.mrb[41].mxu1 }
 0x73e   :  { %v1126_v56 = vpop.f32.mrb[42].mxu1 }
 0x73f   :  { %v4399_v59 = vpack.i.bf16 %v1126_v56, %v1123_v21  ;;  %v4188_v42 = vpop.f32.mrb[43].mxu1 }
 0x741   :  { %4400 = vrot.lane.b32.xlu0 %v4399_v59, %s5007_s6 }
 0x744   :  { %v1131_v61 = vpop.f32.mrb[44].mxu1 }
 0x745   :  { %v4191_v58 = vpop.f32.mrb[45].mxu1 }
 0x746   :  { %v1134_v62 = vpop.f32.mrb[46].mxu1 }
 0x747   :  { %v4404_v2 = vpack.i.bf16 %v1134_v62, %v1131_v61  ;;  %v4192_v4 = vpop.f32.mrb[47].mxu1 }
 0x749   :  { %4405 = vrot.lane.b32.xlu1 %v4404_v2, %s5007_s6 }
 0x7ab   :  { %v4396_v5 = vpop.permute.xlu1 %4395 }
 0x7ac   :  { %v4398_v46 = vunpack.i.h.bf16 %v4396_v5  ;;  %v4397_v7 = vunpack.i.l.bf16 %v4396_v5 }
 0x7ae   :  { %v1163_v63 = vsel %vm686_vm1, %v878_v29, %v4398_v46  ;;  %v1162_v8 = vsel %vm686_vm1, %v875_v26, %v4397_v7 }
 0x7af   :  { %v1168_v50 = vpack.c.bf16 %v1163_v63, %v1162_v8 }
 0x7b1   :  { %4210 = vmatmul.mubr.bf16.vlgmr.msra.gmra.mrb[36].mxu0 %v1168_v50 }
 0x7b2   :  { %4213 = vmatprep.mubr.msk.bf16.mxu0 %vm5013_vm0, %v5012_v0 }
 0x7b3   :  { %v4401_v11 = vpop.permute.xlu0 %4400 }
 0x7b4   :  { %v4403_v9 = vunpack.i.h.bf16 %v4401_v11  ;;  %v4402_v54 = vunpack.i.l.bf16 %v4401_v11  ;;  %v4483_v11 = vld [vmem:[#allocation11 + $0x24] ss:$8 sps:$4 sm:$0xff]  }
 0x7b6   :  { %v1164_v12 = vsel %vm686_vm1, %v883_v32, %v4402_v54  ;;  %v1165_v60 = vsel %vm686_vm1, %v886_v37, %v4403_v9 }
 0x7b7   :  { %v1169_v1 = vpack.c.bf16 %v1165_v60, %v1164_v12  ;;  %v4481_v12 = vld [vmem:[#allocation11 + $0x20] ss:$8 sps:$4 sm:$0xff]  }
 0x7b9   :  { %4214 = vmatmul.mubr.bf16.gmra.mrb[40].mxu0 %v1169_v1  ;;  %v4486_v1 = vld [vmem:[#allocation11 + $0x34] ss:$8 sps:$4 sm:$0xff]  }
 0x7ba   :  { %4217 = vmatprep.mubr.msk.bf16.mxu0 %vm5013_vm0, %v5012_v0 }
 0x7bb   :  { %v4406_v15 = vpop.permute.xlu1 %4405 }
 0x7bc   :  { %v4408_v16 = vunpack.i.h.bf16 %v4406_v15  ;;  %v4407_v3 = vunpack.i.l.bf16 %v4406_v15  ;;  %v4484_v15 = vld [vmem:[#allocation11 + $0x30] ss:$8 sps:$4 sm:$0xff]  }
 0x7be   :  { %v1166_v20 = vsel %vm686_vm1, %v5507_v39, %v4407_v3  ;;  %v1167_v6 = vsel %vm686_vm1, %v5509_v41, %v4408_v16  ;;  %v4489_v16 = vld [vmem:[#allocation11 + $0x44] ss:$8 sps:$4 sm:$0xff]   ;;  %v4487_v3 = vld [vmem:[#allocation11 + $0x40] ss:$8 sps:$4 sm:$0xff]  }
 0x7bf   :  { %v1170_v18 = vpack.c.bf16 %v1167_v6, %v1166_v20  ;;  %v4492_v20 = vld [vmem:[#allocation11 + $0x54] ss:$8 sps:$4 sm:$0xff]   ;;  %v4490_v6 = vld [vmem:[#allocation11 + $0x50] ss:$8 sps:$4 sm:$0xff]  }
 0x7c1   :  { %4218 = vmatmul.mubr.bf16.gmra.mrb[44].mxu0 %v1170_v18  ;;  %v4495_v18 = vld [vmem:[#allocation11 + $0x64] ss:$8 sps:$4 sm:$0xff]  }
 0x884   :  { %v1269_v23 = vpop.f32.mrb[36].mxu0 }
 0x885   :  { %v1292_v25 = vadd.f32 %v1269_v23, %v5233_v14  ;;  %v4211_v26 = vpop.f32.mrb[37].mxu0  ;;  %v4493_v23 = vld [vmem:[#allocation11 + $0x60] ss:$8 sps:$4 sm:$0xff]  }
 0x886   :  { %v1272_v28 = vpop.f32.mrb[38].mxu0 }
 0x887   :  { %v5537_v29 = vadd.f32 %v1298_v10, %v1292_v25  ;;  %v1293_v13 = vadd.f32 %v1272_v28, %v5236_v19  ;;  %v4212_v32 = vpop.f32.mrb[39].mxu0  ;;  %v4496_v25 = vld [vmem:[#allocation11 + $0x70] ss:$8 sps:$4 sm:$0xff]  }
 0x889   :  { %v5540_v33 = vadd.f32 %v1298_v10, %v1293_v13  ;;  %1307 = vadd.xlane.f32.xlu0 %v5537_v29 }
 0x88b   :  { %1309 = vadd.xlane.f32.xlu1 %v5540_v33 }
 0x88c   :  { %v1277_v37 = vpop.f32.mrb[40].mxu0 }
 0x88d   :  { %v1294_v38 = vadd.f32 %v1277_v37, %v5239_v22  ;;  %v4215_v39 = vpop.f32.mrb[41].mxu0 }
 0x88e   :  { %v1280_v40 = vpop.f32.mrb[42].mxu0 }
 0x88f   :  { %v5545_v41 = vadd.f32 %v1298_v10, %v1294_v38  ;;  %v1295_v14 = vadd.f32 %v1280_v40, %v5242_v27  ;;  %v4216_v43 = vpop.f32.mrb[43].mxu0  ;;  %v4475_v27 = vld [vmem:[#allocation11] ss:$8 sps:$4 sm:$0xff]  }
 0x890   :  { %1498 = vmatpush1.bf16.msra.mxu1 %v4475_v27 }
 0x891   :  { %1311 = vadd.xlane.f32.xlu0 %v5545_v41  ;;  %v5549_v19 = vadd.f32 %v1298_v10, %v1295_v14  ;;  %1499 = vmatprep.subr.bf16.mxu1 %v4480_v36 }
 0x894   :  { %v1285_v17 = vpop.f32.mrb[44].mxu0 }
 0x895   :  { %v1296_v45 = vadd.f32 %v1285_v17, %v5245_v31  ;;  %1313 = vadd.xlane.f32.xlu0 %v5549_v19  ;;  %v4219_v49 = vpop.f32.mrb[45].mxu0  ;;  %v4478_v31 = vld [vmem:[#allocation11 + $0x10] ss:$8 sps:$4 sm:$0xff]  }
 0x896   :  { %v1288_v51 = vpop.f32.mrb[46].mxu0  ;;  %1500 = vmatpush1.bf16.msra.mxu1 %v4478_v31  ;;  %v1305_v49 = vld [vmem:[%s6309_s8 + $0x2] ss:$0 sm:$0xff] }
 0x897   :  { %v5553_v30 = vadd.f32 %v1298_v10, %v1296_v45  ;;  %v1297_v22 = vadd.f32 %v1288_v51, %v5247_v34  ;;  %v4220_v35 = vpop.f32.mrb[47].mxu0  ;;  %1501 = vmatprep.subr.bf16.mxu1 %v4483_v11 }
 0x899   :  { %v5556_v57 = vadd.f32 %v1298_v10, %v1297_v22  ;;  %1315 = vadd.xlane.f32.xlu0 %v5553_v30  ;;  %v4498_v10 = vld [vmem:[#allocation11 + $0x74] ss:$8 sps:$4 sm:$0xff]  }
 0x89a   :  { %1502 = vmatpush1.bf16.msra.mxu1 %v4481_v12 }
 0x89b   :  { %1317 = vadd.xlane.f32.xlu1 %v5556_v57  ;;  %1503 = vmatprep.subr.bf16.mxu1 %v4486_v1 }
 0x89e   :  { %1504 = vmatpush1.bf16.msra.mxu1 %v4484_v15 }
 0x89f   :  { %1505 = vmatprep.subr.bf16.mxu1 %v4489_v16 }
 0x8a2   :  { %1506 = vmatpush1.bf16.msra.mxu1 %v4487_v3 }
 0x8a3   :  { %1507 = vmatprep.subr.bf16.mxu1 %v4492_v20  ;;  %v4500_v20 = vld [vmem:[#allocation13] sm:$0xff]  }
 0x8a6   :  { %1508 = vmatpush1.bf16.msra.mxu1 %v4490_v6  ;;  %v4502_v6 = vld [vmem:[#allocation13 + $0x8] sm:$0xff]  }
 0x8a7   :  { %1509 = vmatprep.subr.bf16.mxu1 %v4495_v18  ;;  %v4504_v18 = vld [vmem:[#allocation13 + $0x10] sm:$0xff]  }
 0x8aa   :  { %1510 = vmatpush1.bf16.msra.mxu1 %v4493_v23  ;;  %v4505_v23 = vld [vmem:[#allocation13 + $0x58] sm:$0xff]  }
 0x8ab   :  { %1511 = vmatprep.subr.bf16.mxu1 %v4498_v10  ;;  %v4506_v10 = vld [vmem:[#allocation13 + $0x18] sm:$0xff]  }
 0x8ae   :  { %1512 = vmatpush1.bf16.msra.mxu1 %v4496_v25  ;;  %v4507_v25 = vld [vmem:[#allocation13 + $0x60] sm:$0xff]  }
 0x916   :  { %v1308_v44 = vpop.xlane.xlu0 %1307 }
 0x917   :  { %v1319_v47 = vmul.f32 0.0078125, %v1308_v44 }
 0x918   :  { %v1310_v52 = vpop.xlane.xlu1 %1309 }
 0x919   :  { %v5561_v34 = vsub.f32 %v5537_v29, %v1319_v47  ;;  %v1320_v55 = vmul.f32 0.0078125, %v1310_v52 }
 0x91b   :  { %v5564_v21 = vsub.f32 %v5540_v33, %v1320_v55  ;;  %v1331_v48 = vmul.f32 %v5561_v34, %v5561_v34  ;;  %v1306_v55 = vld [vmem:[%s6309_s8 + $0x3] ss:$0 sm:$0xff] }
 0x91d   :  { %1337 = vadd.xlane.f32.xlu0 %v1331_v48  ;;  %v1332_v56 = vmul.f32 %v5564_v21, %v5564_v21 }
 0x91e   :  { %v1312_v59 = vpop.xlane.xlu0 %1311 }
 0x91f   :  { %v1321_v42 = vmul.f32 0.0078125, %v1312_v59  ;;  %1339 = vadd.xlane.f32.xlu1 %v1332_v56 }
 0x921   :  { %v5571_v61 = vsub.f32 %v5545_v41, %v1321_v42 }
 0x922   :  { %v1314_v58 = vpop.xlane.xlu0 %1313 }
 0x923   :  { %v1322_v62 = vmul.f32 0.0078125, %v1314_v58  ;;  %v1333_v2 = vmul.f32 %v5571_v61, %v5571_v61 }
 0x925   :  { %v5576_v4 = vsub.f32 %v5549_v19, %v1322_v62  ;;  %1341 = vadd.xlane.f32.xlu0 %v1333_v2 }
 0x926   :  { %v1316_v5 = vpop.xlane.xlu0 %1315 }
 0x927   :  { %v1323_v46 = vmul.f32 0.0078125, %v1316_v5  ;;  %v1334_v7 = vmul.f32 %v5576_v4, %v5576_v4 }
 0x928   :  { %v1318_v63 = vpop.xlane.xlu1 %1317 }
 0x929   :  { %v5581_v8 = vsub.f32 %v5553_v30, %v1323_v46  ;;  %v1324_v50 = vmul.f32 0.0078125, %v1318_v63  ;;  %1343 = vadd.xlane.f32.xlu1 %v1334_v7 }
 0x92b   :  { %v5584_v9 = vsub.f32 %v5556_v57, %v1324_v50  ;;  %v1335_v54 = vmul.f32 %v5581_v8, %v5581_v8 }
 0x92d   :  { %1345 = vadd.xlane.f32.xlu0 %v1335_v54  ;;  %v1336_v60 = vmul.f32 %v5584_v9, %v5584_v9 }
 0x92f   :  { %1347 = vadd.xlane.f32.xlu1 %v1336_v60 }
 0x9aa   :  { %v1338_v26 = vpop.xlane.xlu0 %1337 }
 0x9ab   :  { %v1349_v28 = vmul.f32 0.0078125, %v1338_v26  ;;  %v4508_v26 = vld [vmem:[#allocation13 + $0x20] sm:$0xff]  }
 0x9ac   :  { %v1340_v13 = vpop.xlane.xlu1 %1339 }
 0x9ad   :  { %v1355_v32 = vadd.f32 1e-06, %v1349_v28  ;;  %v1350_v37 = vmul.f32 0.0078125, %v1340_v13  ;;  %v4509_v28 = vld [vmem:[#allocation13 + $0x68] sm:$0xff]  }
 0x9ae   :  { %v4510_v13 = vld [vmem:[#allocation13 + $0x28] sm:$0xff]  }
 0x9af   :  { %4663 = vrsqrt.f32 %v1355_v32  ;;  %v1356_v38 = vadd.f32 1e-06, %v1350_v37  ;;  %v4511_v32 = vld [vmem:[#allocation13 + $0x70] sm:$0xff]  }
 0x9b0   :  { %v4512_v37 = vld [vmem:[#allocation13 + $0x30] sm:$0xff]  }
 0x9b1   :  { %4665 = vrsqrt.f32 %v1356_v38  ;;  %v4513_v38 = vld [vmem:[#allocation13 + $0x78] sm:$0xff]  }
 0x9b2   :  { %v1342_v39 = vpop.xlane.xlu0 %1341 }
 0x9b3   :  { %v1351_v40 = vmul.f32 0.0078125, %v1342_v39  ;;  %v4514_v39 = vld [vmem:[#allocation13 + $0x38] sm:$0xff]  }
 0x9b5   :  { %v1357_v14 = vadd.f32 1e-06, %v1351_v40  ;;  %v1407_v40 = vlaneseq }
 0x9b6   :  { %v1344_v43 = vpop.xlane.xlu1 %1343 }
 0x9b7   :  { %4667 = vrsqrt.f32 %v1357_v14  ;;  %v1352_v17 = vmul.f32 0.0078125, %v1344_v43  ;;  %v5606_v14 = vshrl.u32 %v1407_v40, 7 }
 0x9b9   :  { %v4664_v45 = vpop.eup %4663  ;;  %v1358_v51 = vadd.f32 1e-06, %v1352_v17  ;;  %v1409_v43 = vsub.s32 0, %v5606_v14  ;;  %v3753_v17 = vld [vmem:[%s6309_s8 + $0x11] ss:$8 sm:$0x3] }
 0x9ba   :  { %v1367_v22 = vmul.f32 %v4664_v45, %v5561_v34  ;;  %v1346_v35 = vpop.xlane.xlu0 %1345  ;;  %v1413_v45 = vsub.s32 1, %v5606_v14 }
 0x9bb   :  { %v4666_v27 = vpop.eup %4665  ;;  %4669 = vrsqrt.f32 %v1358_v51  ;;  %v1353_v53 = vmul.f32 0.0078125, %v1346_v35 }
 0x9bc   :  { %v1373_v36 = vmul.f32 %v1367_v22, %v1305_v49  ;;  %v1368_v31 = vmul.f32 %v4666_v27, %v5564_v21  ;;  %v1348_v44 = vpop.xlane.xlu1 %1347  ;;  %v5619_v51 = vrot.slane %v3753_v17, %v1413_v45 }
 0x9bd   :  { %v1359_v47 = vadd.f32 1e-06, %v1353_v53  ;;  %v1354_v52 = vmul.f32 0.0078125, %v1348_v44 }
 0x9be   :  { %v1374_v48 = vmul.f32 %v1368_v31, %v1305_v49  ;;  %v1379_v59 = vadd.f32 %v1373_v36, %v1306_v55 }
 0x9bf   :  { %4671 = vrsqrt.f32 %v1359_v47  ;;  %v1360_v56 = vadd.f32 1e-06, %v1354_v52 }
 0x9c0   :  { %v1380_v42 = vadd.f32 %v1374_v48, %v1306_v55 }
 0x9c1   :  { %v4668_v34 = vpop.eup %4667  ;;  %4673 = vrsqrt.f32 %v1360_v56 }
 0x9c2   :  { %v1385_v58 = vpack.c.bf16 %v1380_v42, %v1379_v59  ;;  %v1369_v62 = vmul.f32 %v4668_v34, %v5571_v61 }
 0x9c4   :  { %1530 = vmatmul.mubr.bf16.vlgmr.msra.gmra.mrb[48].mxu1 %v1385_v58  ;;  %v1375_v5 = vmul.f32 %v1369_v62, %v1305_v49 }
 0x9c5   :  { %v4670_v2 = vpop.eup %4669  ;;  %1539 = vmatprep.mubr.bf16.mxu1 %v5014_v24 }
 0x9c6   :  { %v1370_v21 = vmul.f32 %v4670_v2, %v5576_v4  ;;  %v1381_v63 = vadd.f32 %v1375_v5, %v1306_v55  ;;  %v4499_v4 = vld [vmem:[#allocation13 + $0x40] sm:$0xff]  }
 0x9c7   :  { %3940 = vmatprep.subr.bf16.mxu0 %v4499_v4 }
 0x9c8   :  { %v1376_v46 = vmul.f32 %v1370_v21, %v1305_v49  ;;  %3941 = vmatpush3.bf16.msra.mxu0 %v4500_v20 }
 0x9c9   :  { %v4672_v7 = vpop.eup %4671 }
 0x9ca   :  { %v1382_v50 = vadd.f32 %v1376_v46, %v1306_v55  ;;  %v1371_v11 = vmul.f32 %v4672_v7, %v5581_v8  ;;  %v4501_v8 = vld [vmem:[#allocation13 + $0x48] sm:$0xff]  }
 0x9cb   :  { %v4674_v54 = vpop.eup %4673  ;;  %3942 = vmatprep.subr.bf16.mxu0 %v4501_v8 }
 0x9cc   :  { %v1386_v12 = vpack.c.bf16 %v1382_v50, %v1381_v63  ;;  %v1372_v60 = vmul.f32 %v4674_v54, %v5584_v9  ;;  %v1377_v1 = vmul.f32 %v1371_v11, %v1305_v49  ;;  %3943 = vmatpush3.bf16.msra.mxu0 %v4502_v6  ;;  %v4503_v9 = vld [vmem:[#allocation13 + $0x50] sm:$0xff]  }
 0x9cd   :  { %3944 = vmatprep.subr.bf16.mxu0 %v4503_v9 }
 0x9ce   :  { %1540 = vmatmul.mubr.bf16.gmra.mrb[52].mxu1 %v1386_v12  ;;  %v1378_v61 = vmul.f32 %v1372_v60, %v1305_v49  ;;  %v1383_v16 = vadd.f32 %v1377_v1, %v1306_v55  ;;  %v5615_v49 = vrot.slane %v3753_v17, %v1409_v43 }
 0x9cf   :  { %1549 = vmatprep.mubr.bf16.mxu1 %v5014_v24 }
 0x9d0   :  { %v1384_v15 = vadd.f32 %v1378_v61, %v1306_v55  ;;  %3945 = vmatpush3.bf16.msra.mxu0 %v4504_v18 }
 0x9d1   :  { %3946 = vmatprep.subr.bf16.mxu0 %v4505_v23 }
 0x9d2   :  { %v1387_v3 = vpack.c.bf16 %v1384_v15, %v1383_v16 }
 0x9d4   :  { %3947 = vmatpush3.bf16.msra.mxu0 %v4506_v10 }
 0x9d5   :  { %3948 = vmatprep.subr.bf16.mxu0 %v4507_v25 }
 0x9d6   :  { %1550 = vmatmul.mubr.bf16.gmra.mrb[56].mxu1 %v1387_v3 }
 0x9d7   :  { %2149 = vmatprep.mubr.bf16.mxu1 %v5014_v24 }
 0x9d8   :  { %3949 = vmatpush3.bf16.msra.mxu0 %v4508_v26 }
 0x9d9   :  { %3950 = vmatprep.subr.bf16.mxu0 %v4509_v28 }
 0x9dc   :  { %3951 = vmatpush3.bf16.msra.mxu0 %v4510_v13 }
 0x9dd   :  { %3952 = vmatprep.subr.bf16.mxu0 %v4511_v32 }
 0x9e0   :  { %3953 = vmatpush3.bf16.msra.mxu0 %v4512_v37 }
 0x9e1   :  { %3954 = vmatprep.subr.bf16.mxu0 %v4513_v38 }
 0x9e4   :  { %3955 = vmatpush3.bf16.msra.mxu0 %v4514_v39 }
 0x9e5   :  { %4221 = vmatprep.subr.bf16.mxu0 %v5012_v0 }
 0xa97   :  { %v1531_v22 = vpop.f32.mrb[48].mxu1 }
 0xa98   :  { %v5622_v35 = vadd.f32 %v1531_v22, %v5615_v49  ;;  %v1533_v27 = vpop.f32.mrb[49].mxu1 }
 0xa99   :  { %v5625_v53 = vadd.f32 %v1533_v27, %v5619_v51  ;;  %v1535_v36 = vpop.f32.mrb[50].mxu1 }
 0xa9a   :  { %v1560_v31 = vmul.f32 %v5622_v35, %v5622_v35  ;;  %v5630_v44 = vadd.f32 %v1535_v36, %v5615_v49  ;;  %v1537_v47 = vpop.f32.mrb[51].mxu1 }
 0xa9b   :  { %v1561_v52 = vmul.f32 %v5625_v53, %v5625_v53  ;;  %v5635_v55 = vadd.f32 %v1537_v47, %v5619_v51 }
 0xa9c   :  { %v1572_v48 = vmul.f32 %v1560_v31, %v5622_v35  ;;  %v1562_v56 = vmul.f32 %v5630_v44, %v5630_v44 }
 0xa9d   :  { %v1573_v59 = vmul.f32 %v1561_v52, %v5625_v53  ;;  %v1563_v42 = vmul.f32 %v5635_v55, %v5635_v55 }
 0xa9e   :  { %v1584_v34 = vmul.f32 0.044715, %v1572_v48  ;;  %v1574_v58 = vmul.f32 %v1562_v56, %v5630_v44 }
 0xa9f   :  { %v1585_v62 = vmul.f32 0.044715, %v1573_v59  ;;  %v1575_v2 = vmul.f32 %v1563_v42, %v5635_v55 }
 0xaa0   :  { %v1596_v21 = vadd.f32 %v1584_v34, %v5622_v35  ;;  %v1586_v5 = vmul.f32 0.044715, %v1574_v58 }
 0xaa1   :  { %v1597_v46 = vadd.f32 %v1585_v62, %v5625_v53  ;;  %v1587_v7 = vmul.f32 0.044715, %v1575_v2  ;;  %v1541_v63 = vpop.f32.mrb[52].mxu1 }
 0xaa2   :  { %v1608_v50 = vmul.f32 0.7978846, %v1596_v21  ;;  %v1598_v11 = vadd.f32 %v1586_v5, %v5630_v44  ;;  %v5649_v54 = vadd.f32 %v1541_v63, %v5615_v49  ;;  %v1543_v12 = vpop.f32.mrb[53].mxu1 }
 0xaa3   :  { %v1609_v60 = vmul.f32 0.7978846, %v1597_v46  ;;  %v1599_v1 = vadd.f32 %v1587_v7, %v5635_v55  ;;  %v5653_v61 = vadd.f32 %v1543_v12, %v5619_v51  ;;  %v1545_v15 = vpop.f32.mrb[54].mxu1 }
 0xaa4   :  { %4675 = vtanh.f32 %v1608_v50  ;;  %v1610_v16 = vmul.f32 0.7978846, %v1598_v11  ;;  %v1564_v3 = vmul.f32 %v5649_v54, %v5649_v54  ;;  %v5658_v4 = vadd.f32 %v1545_v15, %v5615_v49  ;;  %v1547_v20 = vpop.f32.mrb[55].mxu1 }
 0xaa5   :  { %4677 = vtanh.f32 %v1609_v60  ;;  %v1611_v8 = vmul.f32 0.7978846, %v1599_v1  ;;  %v1565_v6 = vmul.f32 %v5653_v61, %v5653_v61  ;;  %v5663_v9 = vadd.f32 %v1547_v20, %v5619_v51 }
 0xaa6   :  { %4679 = vtanh.f32 %v1610_v16  ;;  %v1576_v18 = vmul.f32 %v1564_v3, %v5649_v54  ;;  %v1566_v23 = vmul.f32 %v5658_v4, %v5658_v4 }
 0xaa7   :  { %4681 = vtanh.f32 %v1611_v8  ;;  %v1577_v10 = vmul.f32 %v1565_v6, %v5653_v61  ;;  %v1567_v25 = vmul.f32 %v5663_v9, %v5663_v9 }
 0xaa8   :  { %v1588_v26 = vmul.f32 0.044715, %v1576_v18  ;;  %v1578_v28 = vmul.f32 %v1566_v23, %v5658_v4 }
 0xaa9   :  { %v1589_v13 = vmul.f32 0.044715, %v1577_v10  ;;  %v1579_v32 = vmul.f32 %v1567_v25, %v5663_v9  ;;  %v1551_v37 = vpop.f32.mrb[56].mxu1 }
 0xaaa   :  { %v1600_v38 = vadd.f32 %v1588_v26, %v5649_v54  ;;  %v1590_v39 = vmul.f32 0.044715, %v1578_v28  ;;  %v5675_v40 = vadd.f32 %v1551_v37, %v5615_v49  ;;  %v1553_v17 = vpop.f32.mrb[57].mxu1 }
 0xaab   :  { %v1601_v22 = vadd.f32 %v1589_v13, %v5653_v61  ;;  %v1591_v27 = vmul.f32 0.044715, %v1579_v32  ;;  %v5679_v36 = vadd.f32 %v1553_v17, %v5619_v51  ;;  %v1555_v31 = vpop.f32.mrb[58].mxu1 }
 0xaac   :  { %v1612_v47 = vmul.f32 0.7978846, %v1600_v38  ;;  %v1602_v52 = vadd.f32 %v1590_v39, %v5658_v4  ;;  %v1568_v48 = vmul.f32 %v5675_v40, %v5675_v40  ;;  %v5685_v56 = vadd.f32 %v1555_v31, %v5615_v49  ;;  %v1557_v59 = vpop.f32.mrb[59].mxu1 }
 0xaad   :  { %v1613_v42 = vmul.f32 0.7978846, %v1601_v22  ;;  %v1603_v34 = vadd.f32 %v1591_v27, %v5663_v9  ;;  %v1569_v58 = vmul.f32 %v5679_v36, %v5679_v36  ;;  %v5691_v62 = vadd.f32 %v1557_v59, %v5619_v51 }
 0xaae   :  { %v4676_v2 = vpop.eup %4675  ;;  %4683 = vtanh.f32 %v1612_v47  ;;  %v1614_v21 = vmul.f32 0.7978846, %v1602_v52  ;;  %v1580_v5 = vmul.f32 %v1568_v48, %v5675_v40  ;;  %v1570_v46 = vmul.f32 %v5685_v56, %v5685_v56 }
 0xaaf   :  { %v4678_v49 = vpop.eup %4677  ;;  %v1632_v7 = vadd.f32 1.0, %v4676_v2  ;;  %4685 = vtanh.f32 %v1613_v42  ;;  %v1615_v63 = vmul.f32 0.7978846, %v1603_v34  ;;  %v1581_v50 = vmul.f32 %v1569_v58, %v5679_v36 }
 0xab0   :  { %v4680_v11 = vpop.eup %4679  ;;  %4687 = vtanh.f32 %v1614_v21  ;;  %v1592_v12 = vmul.f32 0.044715, %v1580_v5  ;;  %v1582_v51 = vmul.f32 %v1570_v46, %v5685_v56  ;;  %v1571_v60 = vmul.f32 %v5691_v62, %v5691_v62 }
 0xab1   :  { %v4682_v1 = vpop.eup %4681  ;;  %v1644_v15 = vmul.f32 0.5, %v1632_v7  ;;  %v1634_v16 = vadd.f32 1.0, %v4680_v11  ;;  %4689 = vtanh.f32 %v1615_v63  ;;  %v1593_v3 = vmul.f32 0.044715, %v1581_v50 }
 0xab2   :  { %v1604_v20 = vadd.f32 %v1592_v12, %v5675_v40  ;;  %v1594_v8 = vmul.f32 0.044715, %v1582_v51  ;;  %v1583_v6 = vmul.f32 %v1571_v60, %v5691_v62  ;;  %v1633_v18 = vadd.f32 1.0, %v4678_v49 }
 0xab3   :  { %v1646_v23 = vmul.f32 0.5, %v1634_v16  ;;  %v1605_v10 = vadd.f32 %v1593_v3, %v5679_v36  ;;  %v1635_v25 = vadd.f32 1.0, %v4682_v1  ;;  %v1656_v37 = vmul.f32 %v1644_v15, %v5622_v35 }
 0xab4   :  { %v1616_v26 = vmul.f32 0.7978846, %v1604_v20  ;;  %v1606_v28 = vadd.f32 %v1594_v8, %v5685_v56  ;;  %v1595_v13 = vmul.f32 0.044715, %v1583_v6  ;;  %v1645_v32 = vmul.f32 0.5, %v1633_v18 }
 0xab5   :  { %v1658_v38 = vmul.f32 %v1646_v23, %v5630_v44  ;;  %v1617_v39 = vmul.f32 0.7978846, %v1605_v10  ;;  %v1647_v17 = vmul.f32 0.5, %v1635_v25 }
 0xab6   :  { %4691 = vtanh.f32 %v1616_v26  ;;  %v1618_v22 = vmul.f32 0.7978846, %v1606_v28  ;;  %v1607_v27 = vadd.f32 %v1595_v13, %v5691_v62  ;;  %v1657_v47 = vmul.f32 %v1645_v32, %v5625_v53 }
 0xab7   :  { %v1668_v31 = vpack.c.bf16 %v1658_v38, %v1656_v37  ;;  %4693 = vtanh.f32 %v1617_v39  ;;  %v1659_v52 = vmul.f32 %v1647_v17, %v5635_v55 }
 0xab8   :  { %v4684_v48 = vpop.eup %4683  ;;  %4695 = vtanh.f32 %v1618_v22  ;;  %v1619_v59 = vmul.f32 0.7978846, %v1607_v27 }
 0xab9   :  { %v4686_v42 = vpop.eup %4685  ;;  %v1669_v34 = vpack.c.bf16 %v1659_v52, %v1657_v47  ;;  %v1636_v35 = vadd.f32 1.0, %v4684_v48 }
 0xaba   :  { %v4688_v58 = vpop.eup %4687  ;;  %4697 = vtanh.f32 %v1619_v59  ;;  %v1637_v44 = vadd.f32 1.0, %v4686_v42 }
 0xabb   :  { %v4690_v2 = vpop.eup %4689  ;;  %1834 = vmatprep.mubr.bf16.mxu0 %v1669_v34  ;;  %v1638_v21 = vadd.f32 1.0, %v4688_v58  ;;  %v1648_v5 = vmul.f32 0.5, %v1636_v35 }
 0xabc   :  { %1835 = vmatmul.mubr.bf16.vlgmr.msra.gmra.mrb[48].mxu0 %v1668_v31  ;;  %v1639_v46 = vadd.f32 1.0, %v4690_v2  ;;  %v1649_v49 = vmul.f32 0.5, %v1637_v44 }
 0xabd   :  { %v1650_v7 = vmul.f32 0.5, %v1638_v21  ;;  %v1660_v55 = vmul.f32 %v1648_v5, %v5649_v54 }
 0xabe   :  { %v1651_v53 = vmul.f32 0.5, %v1639_v46  ;;  %v1661_v11 = vmul.f32 %v1649_v49, %v5653_v61 }
 0xabf   :  { %v1662_v63 = vmul.f32 %v1650_v7, %v5658_v4  ;;  %v4515_v7 = vld [vmem:[#allocation8 + $0xc0] ss:$12 sps:$4 sm:$0xff]  }
 0xac0   :  { %v4692_v50 = vpop.eup %4691  ;;  %v1663_v12 = vmul.f32 %v1651_v53, %v5663_v9  ;;  %v4517_v53 = vld [vmem:[#allocation8 + $0xc4] ss:$12 sps:$4 sm:$0xff]  }
 0xac1   :  { %v4694_v51 = vpop.eup %4693  ;;  %v1670_v60 = vpack.c.bf16 %v1662_v63, %v1660_v55  ;;  %v1640_v1 = vadd.f32 1.0, %v4692_v50  ;;  %v4518_v55 = vld [vmem:[#allocation8 + $0xc8] ss:$12 sps:$4 sm:$0xff]   ;;  %2117 = vmatprep.subr.bf16.mxu1 %v4517_v53  ;;  %v4522_v50 = vld [vmem:[#allocation8 + $0xe0] ss:$12 sps:$4 sm:$0xff]  }
 0xac2   :  { %v4696_v15 = vpop.eup %4695  ;;  %v1671_v16 = vpack.c.bf16 %v1663_v12, %v1661_v11  ;;  %v1641_v3 = vadd.f32 1.0, %v4694_v51  ;;  %v4521_v63 = vld [vmem:[#allocation8 + $0xdc] ss:$12 sps:$4 sm:$0xff]   ;;  %4222 = vmatpush3.bf16.msra.mxu0 %v4518_v55  ;;  %2118 = vmatpush1.bf16.msra.mxu1 %v4515_v7 }
 0xac3   :  { %v1642_v20 = vadd.f32 1.0, %v4696_v15  ;;  %v1652_v8 = vmul.f32 0.5, %v1640_v1  ;;  %4223 = vmatprep.subr.bf16.mxu0 %v5012_v0  ;;  %2119 = vmatprep.subr.bf16.mxu1 %v4521_v63 }
 0xac4   :  { %v4698_v6 = vpop.eup %4697  ;;  %1842 = vmatprep.mubr.bf16.mxu0 %v1671_v16  ;;  %v1653_v54 = vmul.f32 0.5, %v1641_v3 }
 0xac5   :  { %1843 = vmatmul.mubr.bf16.gmra.mrb[52].mxu0 %v1670_v60  ;;  %v1643_v18 = vadd.f32 1.0, %v4698_v6  ;;  %v1654_v23 = vmul.f32 0.5, %v1642_v20  ;;  %v1664_v10 = vmul.f32 %v1652_v8, %v5675_v40  ;;  %v1865_v40 = vld [vmem:[%s6309_s8 + $0x5] ss:$0 sm:$0xff] }
 0xac6   :  { %v1665_v9 = vmul.f32 %v1653_v54, %v5679_v36  ;;  %4224 = vmatpush3.bf16.msra.mxu0 %v4522_v50 }
 0xac7   :  { %v1655_v4 = vmul.f32 0.5, %v1643_v18  ;;  %v1666_v61 = vmul.f32 %v1654_v23, %v5685_v56  ;;  %4225 = vmatprep.subr.bf16.mxu0 %v5012_v0 }
 0xac9   :  { %v1667_v25 = vmul.f32 %v1655_v4, %v5691_v62  ;;  %v1672_v26 = vpack.c.bf16 %v1666_v61, %v1664_v10 }
 0xacb   :  { %v1673_v28 = vpack.c.bf16 %v1667_v25, %v1665_v9 }
 0xacd   :  { %1850 = vmatprep.mubr.bf16.mxu0 %v1673_v28  ;;  %v4525_v28 = vld [vmem:[#allocation8 + $0xf4] ss:$12 sps:$4 sm:$0xff]  }
 0xace   :  { %1851 = vmatmul.mubr.bf16.gmra.mrb[56].mxu0 %v1672_v26 }
 0xacf   :  { %4237 = vmatprep.mubr.msk.bf16.mxu0 %vm5013_vm0, %v5012_v0 }
 0xb8f   :  { %v3956_v13 = vpop.f32.mrb[48].mxu0 }
 0xb90   :  { %v3957_v32 = vpop.f32.mrb[49].mxu0 }
 0xb91   :  { %v3958_v37 = vadd.f32 %v3957_v32, %v3956_v13  ;;  %v3959_v38 = vpop.f32.mrb[50].mxu0  ;;  %v4523_v13 = vld [vmem:[#allocation8 + $0xf0] ss:$12 sps:$4 sm:$0xff]   ;;  %v4526_v32 = vld [vmem:[#allocation8 + $0xf8] ss:$12 sps:$4 sm:$0xff]  }
 0xb92   :  { %v3960_v39 = vpop.f32.mrb[51].mxu0  ;;  %4226 = vmatpush3.bf16.msra.mxu0 %v4526_v32 }
 0xb93   :  { %v1859_v36 = vadd.f32 %v3958_v37, %v5537_v29  ;;  %v3961_v56 = vadd.f32 %v3960_v39, %v3959_v38  ;;  %4227 = vmatprep.subr.bf16.mxu0 %v5012_v0 }
 0xb95   :  { %v1860_v62 = vadd.f32 %v3961_v56, %v5540_v33  ;;  %v5724_v17 = vadd.f32 %v1865_v40, %v1859_v36  ;;  %v4527_v36 = vld [vmem:[#allocation8 + $0x108] ss:$12 sps:$4 sm:$0xff]   ;;  %v4530_v56 = vld [vmem:[#allocation8 + $0x110] ss:$12 sps:$4 sm:$0xff]  }
 0xb96   :  { %4228 = vmatpush3.bf16.msra.mxu0 %v4530_v56 }
 0xb97   :  { %1875 = vadd.xlane.f32.xlu0 %v5724_v17  ;;  %v5727_v22 = vadd.f32 %v1865_v40, %v1860_v62  ;;  %v4533_v62 = vld [vmem:[#allocation8 + $0x124] ss:$12 sps:$4 sm:$0xff]   ;;  %4229 = vmatprep.subr.bf16.mxu0 %v5012_v0 }
 0xb98   :  { %v3962_v27 = vpop.f32.mrb[52].mxu0 }
 0xb99   :  { %1877 = vadd.xlane.f32.xlu1 %v5727_v22  ;;  %v3963_v31 = vpop.f32.mrb[53].mxu0 }
 0xb9a   :  { %v3964_v47 = vadd.f32 %v3963_v31, %v3962_v27  ;;  %v3965_v52 = vpop.f32.mrb[54].mxu0  ;;  %v4531_v27 = vld [vmem:[#allocation8 + $0x120] ss:$12 sps:$4 sm:$0xff]   ;;  %v4534_v31 = vld [vmem:[#allocation8 + $0x128] ss:$12 sps:$4 sm:$0xff]  }
 0xb9b   :  { %v3966_v48 = vpop.f32.mrb[55].mxu0  ;;  %4230 = vmatpush3.bf16.msra.mxu0 %v4534_v31 }
 0xb9c   :  { %v1861_v59 = vadd.f32 %v3964_v47, %v5545_v41  ;;  %v3967_v42 = vadd.f32 %v3966_v48, %v3965_v52  ;;  %v4537_v47 = vld [vmem:[#allocation8 + $0x13c] ss:$12 sps:$4 sm:$0xff]   ;;  %4231 = vmatprep.subr.bf16.mxu0 %v5012_v0  ;;  %v4535_v52 = vld [vmem:[#allocation8 + $0x138] ss:$12 sps:$4 sm:$0xff]   ;;  %v4538_v48 = vld [vmem:[#allocation8 + $0x140] ss:$12 sps:$4 sm:$0xff]  }
 0xb9e   :  { %v1862_v29 = vadd.f32 %v3967_v42, %v5549_v19  ;;  %v5732_v34 = vadd.f32 %v1865_v40, %v1861_v59  ;;  %v4541_v59 = vld [vmem:[#allocation8 + $0x154] ss:$12 sps:$4 sm:$0xff]   ;;  %v4539_v42 = vld [vmem:[#allocation8 + $0x150] ss:$12 sps:$4 sm:$0xff]  }
 0xb9f   :  { %4232 = vmatpush3.bf16.msra.mxu0 %v4538_v48 }
 0xba0   :  { %1879 = vadd.xlane.f32.xlu0 %v5732_v34  ;;  %v5735_v33 = vadd.f32 %v1865_v40, %v1862_v29  ;;  %4233 = vmatprep.subr.bf16.mxu0 %v5012_v0  ;;  %v4542_v29 = vld [vmem:[#allocation8 + $0x158] ss:$12 sps:$4 sm:$0xff]  }
 0xba1   :  { %v3968_v35 = vpop.f32.mrb[56].mxu0 }
 0xba2   :  { %v3969_v58 = vpop.f32.mrb[57].mxu0  ;;  %1881 = vadd.xlane.f32.xlu1 %v5735_v33 }
 0xba3   :  { %v3970_v44 = vadd.f32 %v3969_v58, %v3968_v35  ;;  %v3971_v2 = vpop.f32.mrb[58].mxu0  ;;  %4234 = vmatpush3.bf16.msra.mxu0 %v4542_v29  ;;  %v4545_v35 = vld [vmem:[#allocation8 + $0x16c] ss:$12 sps:$4 sm:$0xff]   ;;  %v4543_v58 = vld [vmem:[#allocation8 + $0x168] ss:$12 sps:$4 sm:$0xff]  }
 0xba4   :  { %v3972_v21 = vpop.f32.mrb[59].mxu0  ;;  %4235 = vmatprep.subr.bf16.mxu0 %v5012_v0  ;;  %v3812_v29 = vld [vmem:[%s6309_s8 + $0x26] ss:$0 sm:$0xff] }
 0xba5   :  { %v1863_v5 = vadd.f32 %v3970_v44, %v5553_v30  ;;  %v3973_v46 = vadd.f32 %v3972_v21, %v3971_v2  ;;  %v4519_v30 = vld [vmem:[#allocation8 + $0xd8] ss:$12 sps:$4 sm:$0xff]   ;;  %v4546_v44 = vld [vmem:[#allocation8 + $0x170] ss:$12 sps:$4 sm:$0xff]  }
 0xba6   :  { %2120 = vmatpush1.bf16.msra.mxu1 %v4519_v30 }
 0xba7   :  { %v1864_v41 = vadd.f32 %v3973_v46, %v5556_v57  ;;  %v5740_v49 = vadd.f32 %v1865_v40, %v1863_v5  ;;  %2121 = vmatprep.subr.bf16.mxu1 %v4525_v28  ;;  %4236 = vmatpush3.bf16.msra.mxu0 %v4546_v44  ;;  %v3813_v44 = vld [vmem:[%s6309_s8 + $0x27] ss:$0 sm:$0xff] }
 0xba8   :  { %4267 = vmatprep.subr.bf16.mxu0 %v5012_v0 }
 0xba9   :  { %1883 = vadd.xlane.f32.xlu0 %v5740_v49  ;;  %v5743_v19 = vadd.f32 %v1865_v40, %v1864_v41  ;;  %v4529_v40 = vld [vmem:[#allocation8 + $0x10c] ss:$12 sps:$4 sm:$0xff]  }
 0xbaa   :  { %2122 = vmatpush1.bf16.msra.mxu1 %v4523_v13 }
 0xbab   :  { %1885 = vadd.xlane.f32.xlu1 %v5743_v19  ;;  %2123 = vmatprep.subr.bf16.mxu1 %v4529_v40 }
 0xbae   :  { %2124 = vmatpush1.bf16.msra.mxu1 %v4527_v36 }
 0xbaf   :  { %2125 = vmatprep.subr.bf16.mxu1 %v4533_v62 }
 0xbb2   :  { %2126 = vmatpush1.bf16.msra.mxu1 %v4531_v27 }
 0xbb3   :  { %2127 = vmatprep.subr.bf16.mxu1 %v4537_v47 }
 0xbb6   :  { %2128 = vmatpush1.bf16.msra.mxu1 %v4535_v52 }
 0xbb7   :  { %2129 = vmatprep.subr.bf16.mxu1 %v4541_v59 }
 0xbba   :  { %2130 = vmatpush1.bf16.msra.mxu1 %v4539_v42 }
 0xbbb   :  { %2131 = vmatprep.subr.bf16.mxu1 %v4545_v35 }
 0xbbe   :  { %2132 = vmatpush1.bf16.msra.mxu1 %v4543_v58 }
 0xbbf   :  { %4249 = vmatprep.subr.bf16.mxu1 %v5012_v0 }
 0xc24   :  { %v1876_v57 = vpop.xlane.xlu0 %1875 }
 0xc25   :  { %v1887_v11 = vmul.f32 0.0078125, %v1876_v57 }
 0xc26   :  { %v1878_v12 = vpop.xlane.xlu1 %1877 }
 0xc27   :  { %v5749_v51 = vsub.f32 %v5724_v17, %v1887_v11  ;;  %v1888_v60 = vmul.f32 0.0078125, %v1878_v12  ;;  %v3786_v12 = vld [vmem:[%s6309_s8 + $0x20] ss:$0 sm:$0xff] }
 0xc29   :  { %v5752_v1 = vsub.f32 %v5727_v22, %v1888_v60  ;;  %v1899_v15 = vmul.f32 %v5749_v51, %v5749_v51 }
 0xc2b   :  { %1905 = vadd.xlane.f32.xlu0 %v1899_v15  ;;  %v1900_v16 = vmul.f32 %v5752_v1, %v5752_v1 }
 0xc2d   :  { %1907 = vadd.xlane.f32.xlu1 %v1900_v16  ;;  %v1880_v3 = vpop.xlane.xlu0 %1879 }
 0xc2e   :  { %v1889_v20 = vmul.f32 0.0078125, %v1880_v3 }
 0xc2f   :  { %v1882_v8 = vpop.xlane.xlu1 %1881 }
 0xc30   :  { %v5759_v6 = vsub.f32 %v5732_v34, %v1889_v20  ;;  %v1890_v18 = vmul.f32 0.0078125, %v1882_v8 }
 0xc32   :  { %v5762_v54 = vsub.f32 %v5735_v33, %v1890_v18  ;;  %v1901_v23 = vmul.f32 %v5759_v6, %v5759_v6  ;;  %v3787_v18 = vld [vmem:[%s6309_s8 + $0x21] ss:$0 sm:$0xff] }
 0xc34   :  { %1909 = vadd.xlane.f32.xlu0 %v1901_v23  ;;  %v1902_v4 = vmul.f32 %v5762_v54, %v5762_v54 }
 0xc36   :  { %v1884_v10 = vpop.xlane.xlu0 %1883  ;;  %1911 = vadd.xlane.f32.xlu1 %v1902_v4 }
 0xc37   :  { %v1891_v61 = vmul.f32 0.0078125, %v1884_v10 }
 0xc38   :  { %v1886_v9 = vpop.xlane.xlu1 %1885 }
 0xc39   :  { %v5769_v25 = vsub.f32 %v5740_v49, %v1891_v61  ;;  %v1892_v26 = vmul.f32 0.0078125, %v1886_v9 }
 0xc3b   :  { %v5772_v37 = vsub.f32 %v5743_v19, %v1892_v26  ;;  %v1903_v38 = vmul.f32 %v5769_v25, %v5769_v25 }
 0xc3d   :  { %1913 = vadd.xlane.f32.xlu0 %v1903_v38  ;;  %v1904_v39 = vmul.f32 %v5772_v37, %v5772_v37 }
 0xc3f   :  { %1915 = vadd.xlane.f32.xlu1 %v1904_v39 }
 0xcb8   :  { %v1906_v2 = vpop.xlane.xlu0 %1905 }
 0xcb9   :  { %v1917_v21 = vmul.f32 0.0078125, %v1906_v2 }
 0xcba   :  { %v1908_v5 = vpop.xlane.xlu1 %1907 }
 0xcbb   :  { %v1923_v46 = vadd.f32 1e-06, %v1917_v21  ;;  %v1918_v41 = vmul.f32 0.0078125, %v1908_v5 }
 0xcbd   :  { %4699 = vrsqrt.f32 %v1923_v46  ;;  %v1924_v7 = vadd.f32 1e-06, %v1918_v41 }
 0xcbf   :  { %4701 = vrsqrt.f32 %v1924_v7 }
 0xcc1   :  { %v1910_v53 = vpop.xlane.xlu0 %1909 }
 0xcc2   :  { %v1919_v55 = vmul.f32 0.0078125, %v1910_v53 }
 0xcc3   :  { %v1912_v63 = vpop.xlane.xlu1 %1911 }
 0xcc4   :  { %v1925_v50 = vadd.f32 1e-06, %v1919_v55  ;;  %v1920_v30 = vmul.f32 0.0078125, %v1912_v63 }
 0xcc6   :  { %4703 = vrsqrt.f32 %v1925_v50  ;;  %v1926_v57 = vadd.f32 1e-06, %v1920_v30 }
 0xcc7   :  { %v4700_v11 = vpop.eup %4699 }
 0xcc8   :  { %v1935_v60 = vmul.f32 %v4700_v11, %v5749_v51  ;;  %4705 = vrsqrt.f32 %v1926_v57 }
 0xcc9   :  { %v4702_v15 = vpop.eup %4701 }
 0xcca   :  { %v1941_v16 = vmul.f32 %v3786_v12, %v1935_v60  ;;  %v1936_v3 = vmul.f32 %v4702_v15, %v5752_v1  ;;  %v1914_v20 = vpop.xlane.xlu0 %1913 }
 0xccb   :  { %v1921_v8 = vmul.f32 0.0078125, %v1914_v20 }
 0xccc   :  { %v1942_v23 = vmul.f32 %v3786_v12, %v1936_v3  ;;  %v1916_v4 = vpop.xlane.xlu1 %1915  ;;  %v1947_v9 = vadd.f32 %v3787_v18, %v1941_v16 }
 0xccd   :  { %v1927_v10 = vadd.f32 1e-06, %v1921_v8  ;;  %v1922_v61 = vmul.f32 0.0078125, %v1916_v4 }
 0xcce   :  { %v1948_v26 = vadd.f32 %v3787_v18, %v1942_v23 }
 0xccf   :  { %4707 = vrsqrt.f32 %v1927_v10  ;;  %v1928_v28 = vadd.f32 1e-06, %v1922_v61 }
 0xcd0   :  { %v4704_v51 = vpop.eup %4703  ;;  %v1953_v13 = vpack.c.bf16 %v1948_v26, %v1947_v9 }
 0xcd1   :  { %4709 = vrsqrt.f32 %v1928_v28  ;;  %v1937_v32 = vmul.f32 %v4704_v51, %v5759_v6 }
 0xcd2   :  { %v4706_v1 = vpop.eup %4705  ;;  %2150 = vmatmul.mubr.bf16.vlgmr.msra.gmra.mrb[60].mxu1 %v1953_v13  ;;  %4238 = vmatmul.mubr.bf16.vlgmr.msra.gmra.mrb[60].mxu0 %v1953_v13 }
 0xcd3   :  { %2159 = vmatprep.mubr.bf16.mxu1 %v5014_v24  ;;  %4241 = vmatprep.mubr.msk.bf16.mxu0 %vm5013_vm0, %v5012_v0  ;;  %v1938_v38 = vmul.f32 %v4706_v1, %v5762_v54  ;;  %v1943_v39 = vmul.f32 %v3786_v12, %v1937_v32 }
 0xcd5   :  { %v1944_v40 = vmul.f32 %v3786_v12, %v1938_v38  ;;  %v1949_v36 = vadd.f32 %v3787_v18, %v1943_v39 }
 0xcd7   :  { %v1950_v56 = vadd.f32 %v3787_v18, %v1944_v40 }
 0xcd9   :  { %v4708_v62 = vpop.eup %4707  ;;  %v1954_v27 = vpack.c.bf16 %v1950_v56, %v1949_v36 }
 0xcda   :  { %v1939_v31 = vmul.f32 %v4708_v62, %v5769_v25 }
 0xcdb   :  { %v4710_v47 = vpop.eup %4709  ;;  %2160 = vmatmul.mubr.bf16.gmra.mrb[64].mxu1 %v1954_v27  ;;  %4242 = vmatmul.mubr.bf16.gmra.mrb[64].mxu0 %v1954_v27 }
 0xcdc   :  { %2169 = vmatprep.mubr.bf16.mxu1 %v5014_v24  ;;  %4245 = vmatprep.mubr.msk.bf16.mxu0 %vm5013_vm0, %v5012_v0  ;;  %v1940_v6 = vmul.f32 %v4710_v47, %v5772_v37  ;;  %v1945_v52 = vmul.f32 %v3786_v12, %v1939_v31  ;;  %v3814_v37 = vld [vmem:[%s6309_s8 + $0x30] ss:$0 sm:$0xff] }
 0xcde   :  { %v1946_v54 = vmul.f32 %v3786_v12, %v1940_v6  ;;  %v1951_v48 = vadd.f32 %v3787_v18, %v1945_v52 }
 0xce0   :  { %v1952_v59 = vadd.f32 %v3787_v18, %v1946_v54 }
 0xce2   :  { %v1955_v42 = vpack.c.bf16 %v1952_v59, %v1951_v48 }
 0xce4   :  { %2170 = vmatmul.mubr.bf16.gmra.mrb[68].mxu1 %v1955_v42  ;;  %4246 = vmatmul.mubr.bf16.gmra.mrb[68].mxu0 %v1955_v42 }
 0xce5   :  { %4255 = vmatprep.mubr.msk.bf16.mxu1 %vm5013_vm0, %v5012_v0  ;;  %4273 = vmatprep.mubr.msk.bf16.mxu0 %vm5013_vm0, %v5012_v0 }
 0xda5   :  { %v2151_v25 = vpop.f32.mrb[60].mxu1  ;;  %v2214_v35 = vpop.f32.mrb[60].mxu0 }
 0xda6   :  { %v2153_v58 = vpop.f32.mrb[61].mxu1  ;;  %v4239_v2 = vpop.f32.mrb[61].mxu0  ;;  %v2238_v46 = vadd.f32 %v3812_v29, %v2151_v25  ;;  %v2258_v41 = vadd.f32 %v3814_v37, %v2214_v35 }
 0xda7   :  { %v2155_v21 = vpop.f32.mrb[62].mxu1  ;;  %v2217_v5 = vpop.f32.mrb[62].mxu0  ;;  %v2248_v50 = vadd.f32 %v3813_v44, %v2153_v58 }
 0xda8   :  { %v2239_v7 = vadd.f32 %v3812_v29, %v2155_v21  ;;  %v2259_v53 = vadd.f32 %v3814_v37, %v2217_v5  ;;  %v2157_v55 = vpop.f32.mrb[63].mxu1  ;;  %v4240_v63 = vpop.f32.mrb[63].mxu0 }
 0xda9   :  { %v2249_v30 = vadd.f32 %v3813_v44, %v2157_v55  ;;  %v4807_v63 = vld [vmem:[#allocation7] sm:$0xff] }
 0xdaa   :  { %v5816_v57 = vpack.c.bf16 %v2259_v53, %v2258_v41  ;;  %v2244_v11 = vpack.c.bf16 %v2239_v7, %v2238_v46 }
 0xdab   :  { %v2254_v12 = vpack.c.bf16 %v2249_v30, %v2248_v50 }
 0xdac   :  { %4268 = vmatpush3.bf16.msra.mxu0 %v5816_v57 }
 0xdad   :  { %2489 = vrot.lane.b32.xlu0 %v2254_v12, %s5007_s6  ;;  %v2277_v60 = vsel %vm686_vm1, %v2254_v12, 0  ;;  %4269 = vmatprep.subr.bf16.mxu0 %v5012_v0  ;;  %v4808_v12 = vld [vmem:[#allocation7 + $0x8] sm:$0xff] }
 0xdae   :  { %4250 = vmatpush3.bf16.xpose.msra.mxu1 %v2277_v60  ;;  %v2161_v15 = vpop.f32.mrb[64].mxu1  ;;  %v2222_v16 = vpop.f32.mrb[64].mxu0 }
 0xdaf   :  { %v2163_v3 = vpop.f32.mrb[65].mxu1  ;;  %v4243_v20 = vpop.f32.mrb[65].mxu0  ;;  %4251 = vmatprep.subr.bf16.mxu1 %v5012_v0  ;;  %v2240_v23 = vadd.f32 %v3812_v29, %v2161_v15  ;;  %v2260_v4 = vadd.f32 %v3814_v37, %v2222_v16 }
 0xdb0   :  { %v2165_v8 = vpop.f32.mrb[66].mxu1  ;;  %v2225_v18 = vpop.f32.mrb[66].mxu0  ;;  %v2250_v28 = vadd.f32 %v3813_v44, %v2163_v3 }
 0xdb1   :  { %v2241_v10 = vadd.f32 %v3812_v29, %v2165_v8  ;;  %v2261_v61 = vadd.f32 %v3814_v37, %v2225_v18  ;;  %v2167_v9 = vpop.f32.mrb[67].mxu1  ;;  %v4244_v26 = vpop.f32.mrb[67].mxu0  ;;  %v4809_v8 = vld [vmem:[#allocation7 + $0x10] sm:$0xff] }
 0xdb2   :  { %v2251_v51 = vadd.f32 %v3813_v44, %v2167_v9 }
 0xdb3   :  { %v5823_v13 = vpack.c.bf16 %v2261_v61, %v2260_v4  ;;  %v2245_v32 = vpack.c.bf16 %v2241_v10, %v2240_v23  ;;  %v4810_v10 = vld [vmem:[#allocation7 + $0x18] sm:$0xff] }
 0xdb4   :  { %v2255_v1 = vpack.c.bf16 %v2251_v51, %v2250_v28 }
 0xdb5   :  { %4270 = vmatpush3.bf16.msra.mxu0 %v5823_v13  ;;  %2482 = vrot.lane.b32.xlu0 %v2245_v32, %s5007_s6 }
 0xdb6   :  { %2491 = vrot.lane.b32.xlu1 %v2255_v1, %s5007_s6  ;;  %v2280_v38 = vsel %vm686_vm1, %v2255_v1, 0  ;;  %4271 = vmatprep.subr.bf16.mxu0 %v5012_v0 }
 0xdb7   :  { %v2171_v39 = vpop.f32.mrb[68].mxu1  ;;  %v2230_v40 = vpop.f32.mrb[68].mxu0  ;;  %4252 = vmatpush3.bf16.xpose.msra.mxu1 %v2280_v38 }
 0xdb8   :  { %v2173_v36 = vpop.f32.mrb[69].mxu1  ;;  %v4247_v56 = vpop.f32.mrb[69].mxu0  ;;  %4253 = vmatprep.subr.bf16.mxu1 %v5012_v0  ;;  %v2242_v31 = vadd.f32 %v3812_v29, %v2171_v39  ;;  %v2262_v47 = vadd.f32 %v3814_v37, %v2230_v40  ;;  %v4812_v40 = vld [vmem:[#allocation7 + $0x28] sm:$0xff] }
 0xdb9   :  { %v2175_v62 = vpop.f32.mrb[70].mxu1  ;;  %v2233_v27 = vpop.f32.mrb[70].mxu0  ;;  %v2252_v59 = vadd.f32 %v3813_v44, %v2173_v36 }
 0xdba   :  { %v2243_v6 = vadd.f32 %v3812_v29, %v2175_v62  ;;  %v2263_v52 = vadd.f32 %v3814_v37, %v2233_v27  ;;  %v2177_v54 = vpop.f32.mrb[71].mxu1  ;;  %v4248_v48 = vpop.f32.mrb[71].mxu0 }
 0xdbb   :  { %v2253_v42 = vadd.f32 %v3813_v44, %v2177_v54 }
 0xdbc   :  { %v5831_v25 = vpack.c.bf16 %v2263_v52, %v2262_v47  ;;  %v2246_v35 = vpack.c.bf16 %v2243_v6, %v2242_v31 }
 0xdbd   :  { %v2256_v58 = vpack.c.bf16 %v2253_v42, %v2252_v59 }
 0xdbe   :  { %4272 = vmatpush3.bf16.msra.mxu0 %v5831_v25 }
 0xdbf   :  { %2493 = vrot.lane.b32.xlu1 %v2256_v58, %s5007_s6  ;;  %v2283_v2 = vsel %vm686_vm1, %v2256_v58, 0  ;;  %4303 = vmatprep.subr.bf16.mxu0 %v5012_v0 }
 0xdc0   :  { %4254 = vmatpush3.bf16.xpose.msra.mxu1 %v2283_v2 }
 0xdc1   :  { %4285 = vmatprep.subr.bf16.mxu1 %v5012_v0 }
 0xdc3   :  { %2480 = vrot.lane.b32.xlu1 %v2244_v11, %s5007_s6 }
 0xdc7   :  { %2484 = vrot.lane.b32.xlu1 %v2246_v35, %s5007_s6  ;;  %4256 = vmatmul.mubr.msk.bf16.vlgmr.msra.gmra.mrb[72].mxu1 %vm686_vm1, %v2244_v11 }
 0xdc8   :  { %4259 = vmatprep.mubr.msk.bf16.mxu1 %vm5013_vm0, %v5012_v0 }
 0xdcf   :  { %4260 = vmatmul.mubr.msk.bf16.gmra.mrb[76].mxu1 %vm686_vm1, %v2245_v32  ;;  %v4811_v32 = vld [vmem:[#allocation7 + $0x20] sm:$0xff] }
 0xdd0   :  { %4263 = vmatprep.mubr.msk.bf16.mxu1 %vm5013_vm0, %v5012_v0 }
 0xdd7   :  { %4264 = vmatmul.mubr.msk.bf16.gmra.mrb[80].mxu1 %vm686_vm1, %v2246_v35 }
 0xdd8   :  { %4291 = vmatprep.mubr.msk.bf16.mxu1 %vm5013_vm0, %v5012_v0 }
 0xe1f   :  { %v2490_v29 = vpop.permute.xlu0 %2489 }
 0xe20   :  { %v2505_v37 = vsel %vm686_vm1, %v2490_v29, 0 }
 0xe21   :  { %4286 = vmatpush3.bf16.xpose.msra.mxu1 %v2505_v37 }
 0xe22   :  { %4287 = vmatprep.subr.bf16.mxu1 %v5012_v0 }
 0xe27   :  { %v2483_v7 = vpop.permute.xlu0 %2482 }
 0xe28   :  { %v2492_v44 = vpop.permute.xlu1 %2491 }
 0xe29   :  { %v2508_v21 = vsel %vm686_vm1, %v2492_v44, 0 }
 0xe2a   :  { %4288 = vmatpush3.bf16.xpose.msra.mxu1 %v2508_v21 }
 0xe2b   :  { %4289 = vmatprep.subr.bf16.mxu1 %v5012_v0 }
 0xe31   :  { %v2494_v5 = vpop.permute.xlu1 %2493 }
 0xe32   :  { %v2511_v46 = vsel %vm686_vm1, %v2494_v5, 0 }
 0xe33   :  { %4290 = vmatpush3.bf16.xpose.msra.mxu1 %v2511_v46 }
 0xe34   :  { %4321 = vmatprep.subr.bf16.mxu1 %v5012_v0 }
 0xe35   :  { %v2481_v41 = vpop.permute.xlu1 %2480 }
 0xe39   :  { %v2485_v53 = vpop.permute.xlu1 %2484 }
 0xe3a   :  { %4292 = vmatmul.mubr.msk.bf16.vlgmr.msra.gmra.mrb[84].mxu1 %vm686_vm1, %v2481_v41 }
 0xe3b   :  { %4295 = vmatprep.mubr.msk.bf16.mxu1 %vm5013_vm0, %v5012_v0 }
 0xe42   :  { %4296 = vmatmul.mubr.msk.bf16.gmra.mrb[88].mxu1 %vm686_vm1, %v2483_v7 }
 0xe43   :  { %4299 = vmatprep.mubr.msk.bf16.mxu1 %vm5013_vm0, %v5012_v0 }
 0xe4a   :  { %4300 = vmatmul.mubr.msk.bf16.gmra.mrb[92].mxu1 %vm686_vm1, %v2485_v53 }
 0xe4b   :  { %4337 = vmatprep.mubr.msk.bf16.mxu1 %vm5013_vm0, %v5012_v0 }
 0xe9a   :  { %v2319_v55 = vpop.f32.mrb[72].mxu1 }
 0xe9b   :  { %v5864_v50 = vadd.f32 %v4807_v63, %v2319_v55  ;;  %v4257_v30 = vpop.f32.mrb[73].mxu1 }
 0xe9c   :  { %v2322_v11 = vpop.f32.mrb[74].mxu1 }
 0xe9d   :  { %v5866_v60 = vadd.f32 %v4808_v12, %v2322_v11  ;;  %v4258_v15 = vpop.f32.mrb[75].mxu1  ;;  %v2342_v16 = vsel %vm762_vm2, %v5864_v50, -inf }
 0xe9e   :  { %2343 = vmax.xlane.f32.xlu0 %v2342_v16 }
 0xe9f   :  { %v2345_v3 = vsel %vm762_vm2, %v5866_v60, -inf }
 0xea0   :  { %2346 = vmax.xlane.f32.xlu1 %v2345_v3 }
 0xea2   :  { %v2327_v20 = vpop.f32.mrb[76].mxu1 }
 0xea3   :  { %v2328_v18 = vadd.f32 %v4809_v8, %v2327_v20  ;;  %v4261_v23 = vpop.f32.mrb[77].mxu1 }
 0xea4   :  { %v2330_v4 = vpop.f32.mrb[78].mxu1 }
 0xea5   :  { %v5872_v61 = vadd.f32 %v4810_v10, %v2330_v4  ;;  %v4262_v9 = vpop.f32.mrb[79].mxu1  ;;  %v2348_v26 = vsel %vm762_vm2, %v2328_v18, -inf }
 0xea6   :  { %2349 = vmax.xlane.f32.xlu0 %v2348_v26 }
 0xea7   :  { %v2351_v28 = vsel %vm762_vm2, %v5872_v61, -inf }
 0xeaa   :  { %2352 = vmax.xlane.f32.xlu0 %v2351_v28  ;;  %v2335_v51 = vpop.f32.mrb[80].mxu1 }
 0xeab   :  { %v5877_v1 = vadd.f32 %v4811_v32, %v2335_v51  ;;  %v4265_v38 = vpop.f32.mrb[81].mxu1 }
 0xeac   :  { %v2338_v39 = vpop.f32.mrb[82].mxu1 }
 0xead   :  { %v5879_v36 = vadd.f32 %v4812_v40, %v2338_v39  ;;  %v4266_v56 = vpop.f32.mrb[83].mxu1  ;;  %v2354_v62 = vsel %vm762_vm2, %v5877_v1, -inf }
 0xeae   :  { %2355 = vmax.xlane.f32.xlu0 %v2354_v62 }
 0xeaf   :  { %v2357_v27 = vsel %vm762_vm2, %v5879_v36, -inf }
 0xeb0   :  { %2358 = vmax.xlane.f32.xlu1 %v2357_v27 }
 0xf0d   :  { %v2547_v31 = vpop.f32.mrb[84].mxu1 }
 0xf0e   :  { %v5885_v47 = vadd.f32 %v4807_v63, %v2547_v31  ;;  %v4293_v6 = vpop.f32.mrb[85].mxu1 }
 0xf0f   :  { %v2550_v52 = vpop.f32.mrb[86].mxu1 }
 0xf10   :  { %v5887_v54 = vadd.f32 %v4808_v12, %v2550_v52  ;;  %v4294_v48 = vpop.f32.mrb[87].mxu1  ;;  %v2570_v59 = vsel %vm762_vm2, %v5885_v47, -inf }
 0xf11   :  { %2571 = vmax.xlane.f32.xlu0 %v2570_v59 }
 0xf12   :  { %v2573_v42 = vsel %vm762_vm2, %v5887_v54, -inf }
 0xf13   :  { %2574 = vmax.xlane.f32.xlu1 %v2573_v42 }
 0xf15   :  { %v2555_v35 = vpop.f32.mrb[88].mxu1 }
 0xf16   :  { %v5893_v58 = vadd.f32 %v4809_v8, %v2555_v35  ;;  %v4297_v2 = vpop.f32.mrb[89].mxu1 }
 0xf17   :  { %v2558_v29 = vpop.f32.mrb[90].mxu1 }
 0xf18   :  { %v5895_v37 = vadd.f32 %v4810_v10, %v2558_v29  ;;  %v4298_v44 = vpop.f32.mrb[91].mxu1  ;;  %v2576_v21 = vsel %vm762_vm2, %v5893_v58, -inf }
 0xf19   :  { %2577 = vmax.xlane.f32.xlu0 %v2576_v21 }
 0xf1a   :  { %v2579_v5 = vsel %vm762_vm2, %v5895_v37, -inf }
 0xf1b   :  { %2580 = vmax.xlane.f32.xlu1 %v2579_v5 }
 0xf1d   :  { %v2563_v46 = vpop.f32.mrb[92].mxu1 }
 0xf1e   :  { %v5901_v41 = vadd.f32 %v4811_v32, %v2563_v46  ;;  %v4301_v7 = vpop.f32.mrb[93].mxu1 }
 0xf1f   :  { %v2566_v53 = vpop.f32.mrb[94].mxu1 }
 0xf20   :  { %v5903_v55 = vadd.f32 %v4812_v40, %v2566_v53  ;;  %v4302_v63 = vpop.f32.mrb[95].mxu1  ;;  %v2582_v30 = vsel %vm762_vm2, %v5901_v41, -inf }
 0xf21   :  { %2583 = vmax.xlane.f32.xlu0 %v2582_v30 }
 0xf22   :  { %v2585_v11 = vsel %vm762_vm2, %v5903_v55, -inf }
 0xf23   :  { %2586 = vmax.xlane.f32.xlu1 %v2585_v11 }
 0xf2b   :  { %v2344_v12 = vpop.xlane.xlu0 %2343 }
 0xf2c   :  { %v2360_v15 = vsub.f32 %v5864_v50, %v2344_v12 }
 0xf2d   :  { %v2347_v16 = vpop.xlane.xlu1 %2346 }
 0xf2e   :  { %v2366_v3 = vmul.f32 1.442695, %v2360_v15  ;;  %v2361_v20 = vsub.f32 %v5866_v60, %v2347_v16 }
 0xf30   :  { %4711 = vpow2.f32 %v2366_v3  ;;  %v2368_v8 = vmul.f32 1.442695, %v2361_v20 }
 0xf32   :  { %4713 = vpow2.f32 %v2368_v8 }
 0xf33   :  { %v2350_v23 = vpop.xlane.xlu0 %2349 }
 0xf34   :  { %v2362_v4 = vsub.f32 %v2328_v18, %v2350_v23 }
 0xf36   :  { %v2370_v10 = vmul.f32 1.442695, %v2362_v4 }
 0xf37   :  { %v2353_v9 = vpop.xlane.xlu0 %2352 }
 0xf38   :  { %4715 = vpow2.f32 %v2370_v10  ;;  %v2363_v26 = vsub.f32 %v5872_v61, %v2353_v9 }
 0xf3a   :  { %v5912_v28 = vpop.eup %4711  ;;  %v2372_v51 = vmul.f32 1.442695, %v2363_v26 }
 0xf3b   :  { %v2356_v32 = vpop.xlane.xlu0 %2355  ;;  %v2378_v50 = vsel %vm762_vm2, %v5912_v28, 0.0 }
 0xf3c   :  { %v5916_v38 = vpop.eup %4713  ;;  %4717 = vpow2.f32 %v2372_v51  ;;  %v2364_v60 = vsub.f32 %v5877_v1, %v2356_v32  ;;  %2379 = vadd.xlane.f32.xlu0 %v2378_v50 }
 0xf3d   :  { %v2359_v39 = vpop.xlane.xlu1 %2358  ;;  %v2381_v18 = vsel %vm762_vm2, %v5916_v38, 0.0 }
 0xf3e   :  { %v2374_v40 = vmul.f32 1.442695, %v2364_v60  ;;  %v2365_v61 = vsub.f32 %v5879_v36, %v2359_v39  ;;  %2382 = vadd.xlane.f32.xlu1 %v2381_v18 }
 0xf40   :  { %4719 = vpow2.f32 %v2374_v40  ;;  %v2376_v56 = vmul.f32 1.442695, %v2365_v61 }
 0xf42   :  { %v5922_v62 = vpop.eup %4715  ;;  %4721 = vpow2.f32 %v2376_v56 }
 0xf43   :  { %v2384_v27 = vsel %vm762_vm2, %v5922_v62, 0.0 }
 0xf44   :  { %2385 = vadd.xlane.f32.xlu0 %v2384_v27 }
 0xf46   :  { %v5926_v31 = vpop.eup %4717 }
 0xf47   :  { %v2387_v1 = vsel %vm762_vm2, %v5926_v31, 0.0 }
 0xf48   :  { %2388 = vadd.xlane.f32.xlu1 %v2387_v1 }
 0xf4a   :  { %v5930_v6 = vpop.eup %4719 }
 0xf4b   :  { %v2390_v36 = vsel %vm762_vm2, %v5930_v6, 0.0 }
 0xf4c   :  { %v5934_v52 = vpop.eup %4721  ;;  %2391 = vadd.xlane.f32.xlu0 %v2390_v36 }
 0xf4d   :  { %v2393_v48 = vsel %vm762_vm2, %v5934_v52, 0.0 }
 0xf4e   :  { %2394 = vadd.xlane.f32.xlu1 %v2393_v48 }
 0xf9e   :  { %v2572_v59 = vpop.xlane.xlu0 %2571 }
 0xf9f   :  { %v2588_v42 = vsub.f32 %v5885_v47, %v2572_v59 }
 0xfa0   :  { %v2575_v35 = vpop.xlane.xlu1 %2574 }
 0xfa1   :  { %v2594_v2 = vmul.f32 1.442695, %v2588_v42  ;;  %v2589_v29 = vsub.f32 %v5887_v54, %v2575_v35 }
 0xfa3   :  { %4723 = vpow2.f32 %v2594_v2  ;;  %v2596_v44 = vmul.f32 1.442695, %v2589_v29 }
 0xfa5   :  { %4725 = vpow2.f32 %v2596_v44 }
 0xfa6   :  { %v2578_v21 = vpop.xlane.xlu0 %2577 }
 0xfa7   :  { %v2590_v5 = vsub.f32 %v5893_v58, %v2578_v21 }
 0xfa8   :  { %v2581_v46 = vpop.xlane.xlu1 %2580 }
 0xfa9   :  { %v2598_v7 = vmul.f32 1.442695, %v2590_v5  ;;  %v2591_v53 = vsub.f32 %v5895_v37, %v2581_v46 }
 0xfab   :  { %4727 = vpow2.f32 %v2598_v7  ;;  %v2600_v63 = vmul.f32 1.442695, %v2591_v53 }
 0xfad   :  { %v5942_v30 = vpop.eup %4723  ;;  %4729 = vpow2.f32 %v2600_v63 }
 0xfae   :  { %v2584_v47 = vpop.xlane.xlu0 %2583  ;;  %v2606_v11 = vsel %vm762_vm2, %v5942_v30, 0.0 }
 0xfaf   :  { %v5946_v54 = vpop.eup %4725  ;;  %v2592_v12 = vsub.f32 %v5901_v41, %v2584_v47  ;;  %2607 = vadd.xlane.f32.xlu0 %v2606_v11 }
 0xfb0   :  { %v2609_v58 = vsel %vm762_vm2, %v5946_v54, 0.0  ;;  %v2587_v23 = vpop.xlane.xlu1 %2586 }
 0xfb1   :  { %v2602_v15 = vmul.f32 1.442695, %v2592_v12  ;;  %2610 = vadd.xlane.f32.xlu1 %v2609_v58  ;;  %v2593_v39 = vsub.f32 %v5903_v55, %v2587_v23 }
 0xfb3   :  { %4731 = vpow2.f32 %v2602_v15  ;;  %v2604_v61 = vmul.f32 1.442695, %v2593_v39 }
 0xfb5   :  { %v5951_v37 = vpop.eup %4727 }
 0xfb6   :  { %v2612_v16 = vsel %vm762_vm2, %v5951_v37, 0.0 }
 0xfb7   :  { %v5955_v3 = vpop.eup %4729  ;;  %2613 = vadd.xlane.f32.xlu0 %v2612_v16 }
 0xfb8   :  { %v2615_v20 = vsel %vm762_vm2, %v5955_v3, 0.0 }
 0xfb9   :  { %2616 = vadd.xlane.f32.xlu1 %v2615_v20 }
 0xfbd   :  { %v5959_v41 = vpop.eup %4731 }
 0xfbe   :  { %v2618_v8 = vsel %vm762_vm2, %v5959_v41, 0.0 }
 0xfbf   :  { %2619 = vadd.xlane.f32.xlu0 %v2618_v8 }
 0xfc9   :  { %v2380_v4 = vpop.xlane.xlu0 %2379 }
 0xfca   :  { %4733 = vrcp.f32 %v2380_v4  ;;  %2644 = vrot.lane.b32.xlu1 %v5823_v13, %s5007_s6 }
 0xfcb   :  { %v2383_v10 = vpop.xlane.xlu1 %2382 }
 0xfcc   :  { %4735 = vrcp.f32 %v2383_v10 }
 0xfd1   :  { %v2386_v9 = vpop.xlane.xlu0 %2385 }
 0xfd2   :  { %4737 = vrcp.f32 %v2386_v9 }
 0xfd4   :  { %v4734_v26 = vpop.eup %4733 }
 0xfd5   :  { %v2389_v51 = vpop.xlane.xlu1 %2388  ;;  %2642 = vrot.lane.b32.xlu0 %v5816_v57, %s5007_s6  ;;  %v2402_v50 = vmul.f32 %v4734_v26, %v5912_v28 }
 0xfd6   :  { %v4736_v32 = vpop.eup %4735  ;;  %4739 = vrcp.f32 %v2389_v51 }
 0xfd7   :  { %v2403_v60 = vmul.f32 %v4736_v32, %v5916_v38 }
 0xfd9   :  { %v2408_v18 = vpack.c.bf16 %v2403_v60, %v2402_v50  ;;  %v2392_v40 = vpop.xlane.xlu0 %2391 }
 0xfda   :  { %4741 = vrcp.f32 %v2392_v40  ;;  %v4549_v40 = vld [vmem:[#allocation10 + $0x50] sm:$0xff]  }
 0xfdb   :  { %v2395_v13 = vpop.xlane.xlu1 %2394  ;;  %4274 = vmatmul.mubr.msk.bf16.vlgmr.msra.gmra.mrb[72].mxu0 %vm762_vm2, %v2408_v18  ;;  %v4548_v18 = vld [vmem:[#allocation10 + $0x48] sm:$0xff]  }
 0xfdc   :  { %4743 = vrcp.f32 %v2395_v13  ;;  %4277 = vmatprep.mubr.msk.bf16.mxu0 %vm5013_vm0, %v5012_v0  ;;  %v4738_v57 = vpop.eup %4737  ;;  %v4550_v13 = vld [vmem:[#allocation10 + $0x58] sm:$0xff]  }
 0xfdd   :  { %4745 = vpow2.f32 %v2604_v61  ;;  %v2404_v28 = vmul.f32 %v4738_v57, %v5922_v62  ;;  %v4551_v61 = vld [vmem:[#allocation10 + $0x60] sm:$0xff]   ;;  %v4552_v57 = vld [vmem:[#allocation10 + $0x68] sm:$0xff]  }
 0xfe0   :  { %v4740_v56 = vpop.eup %4739 }
 0xfe1   :  { %v2405_v38 = vmul.f32 %v4740_v56, %v5926_v31  ;;  %v4553_v56 = vld [vmem:[#allocation10 + $0x70] sm:$0xff]  }
 0xfe3   :  { %v2409_v27 = vpack.c.bf16 %v2405_v38, %v2404_v28  ;;  %v4554_v28 = vld [vmem:[#allocation10 + $0x78] sm:$0xff]  }
 0xfe4   :  { %v4742_v55 = vpop.eup %4741 }
 0xfe5   :  { %4278 = vmatmul.mubr.msk.bf16.gmra.mrb[76].mxu0 %vm762_vm2, %v2409_v27  ;;  %v2406_v48 = vmul.f32 %v4742_v55, %v5930_v6 }
 0xfe6   :  { %v4744_v1 = vpop.eup %4743  ;;  %4281 = vmatprep.mubr.msk.bf16.mxu0 %vm5013_vm0, %v5012_v0 }
 0xfe7   :  { %v2407_v36 = vmul.f32 %v4744_v1, %v5934_v52  ;;  %v4746_v59 = vpop.eup %4745 }
 0xfe8   :  { %v2621_v62 = vsel %vm762_vm2, %v4746_v59, 0.0 }
 0xfe9   :  { %v2410_v42 = vpack.c.bf16 %v2407_v36, %v2406_v48 }
 0xfed   :  { %4282 = vmatmul.mubr.msk.bf16.gmra.mrb[80].mxu0 %vm762_vm2, %v2410_v42 }
 0xfee   :  { %2622 = vadd.xlane.f32.xlu1 %v2621_v62  ;;  %4309 = vmatprep.mubr.msk.bf16.mxu0 %vm5013_vm0, %v5012_v0 }
 0xfff   :  { %2646 = vrot.lane.b32.xlu1 %v5831_v25, %s5007_s6 }
0x103c   :  { %v2608_v31 = vpop.xlane.xlu0 %2607 }
0x103e   :  { %v2611_v2 = vpop.xlane.xlu1 %2610 }
0x103f   :  { %4747 = vrcp.f32 %v2611_v2 }
0x1040   :  { %4749 = vrcp.f32 %v2608_v31 }
0x1044   :  { %v2614_v35 = vpop.xlane.xlu0 %2613 }
0x1046   :  { %v2617_v52 = vpop.xlane.xlu1 %2616 }
0x1047   :  { %4751 = vrcp.f32 %v2617_v52 }
0x1048   :  { %4753 = vrcp.f32 %v2614_v35 }
0x1049   :  { %v4748_v21 = vpop.eup %4747 }
0x104a   :  { %v2645_v6 = vpop.permute.xlu1 %2644  ;;  %v4750_v25 = vpop.eup %4749  ;;  %v2631_v46 = vmul.f32 %v4748_v21, %v5946_v54 }
0x104b   :  { %v2630_v7 = vmul.f32 %v4750_v25, %v5942_v30 }
0x104c   :  { %v2620_v29 = vpop.xlane.xlu0 %2619 }
0x104d   :  { %v2636_v63 = vpack.c.bf16 %v2631_v46, %v2630_v7 }
0x1050   :  { %v2643_v44 = vpop.permute.xlu0 %2642 }
0x1051   :  { %4304 = vmatpush3.bf16.msra.mxu0 %v2643_v44  ;;  %v4752_v47 = vpop.eup %4751 }
0x1052   :  { %4305 = vmatprep.subr.bf16.mxu0 %v5012_v0  ;;  %v4754_v11 = vpop.eup %4753  ;;  %v2633_v12 = vmul.f32 %v4752_v47, %v5955_v3 }
0x1053   :  { %v2632_v58 = vmul.f32 %v4754_v11, %v5951_v37 }
0x1055   :  { %4306 = vmatpush3.bf16.msra.mxu0 %v2645_v6  ;;  %v2637_v15 = vpack.c.bf16 %v2633_v12, %v2632_v58 }
0x1056   :  { %4307 = vmatprep.subr.bf16.mxu0 %v5012_v0 }
0x107b   :  { %v2623_v5 = vpop.xlane.xlu1 %2622 }
0x107c   :  { %4755 = vrcp.f32 %v2623_v5 }
0x107d   :  { %4757 = vrcp.f32 %v2620_v29 }
0x107f   :  { %v2647_v53 = vpop.permute.xlu1 %2646 }
0x1080   :  { %4308 = vmatpush3.bf16.msra.mxu0 %v2647_v53 }
0x1083   :  { %4310 = vmatmul.mubr.msk.bf16.vlgmr.msra.gmra.mrb[84].mxu0 %vm762_vm2, %v2636_v63 }
0x1084   :  { %4313 = vmatprep.mubr.msk.bf16.mxu0 %vm5013_vm0, %v5012_v0 }
0x1086   :  { %v4756_v54 = vpop.eup %4755 }
0x1087   :  { %v4758_v30 = vpop.eup %4757  ;;  %v2635_v16 = vmul.f32 %v4756_v54, %v4746_v59 }
0x1088   :  { %v2634_v20 = vmul.f32 %v4758_v30, %v5959_v41  ;;  %v4547_v41 = vld [vmem:[#allocation10 + $0x40] sm:$0xff]  }
0x1089   :  { %4322 = vmatpush3.bf16.msra.mxu1 %v4547_v41 }
0x108a   :  { %v2638_v8 = vpack.c.bf16 %v2635_v16, %v2634_v20  ;;  %4323 = vmatprep.subr.bf16.mxu1 %v5012_v0 }
0x108b   :  { %4314 = vmatmul.mubr.msk.bf16.gmra.mrb[88].mxu0 %vm762_vm2, %v2637_v15 }
0x108c   :  { %4317 = vmatprep.mubr.msk.bf16.mxu0 %vm5013_vm0, %v5012_v0 }
0x108d   :  { %4324 = vmatpush3.bf16.msra.mxu1 %v4548_v18 }
0x108e   :  { %4325 = vmatprep.subr.bf16.mxu1 %v5012_v0 }
0x1091   :  { %4326 = vmatpush3.bf16.msra.mxu1 %v4549_v40 }
0x1092   :  { %4327 = vmatprep.subr.bf16.mxu1 %v5012_v0 }
0x1093   :  { %4318 = vmatmul.mubr.msk.bf16.gmra.mrb[92].mxu0 %vm762_vm2, %v2638_v8 }
0x1094   :  { %3110 = vmatprep.mubr.bf16.mxu0 %v5014_v24 }
0x1095   :  { %4328 = vmatpush3.bf16.msra.mxu1 %v4550_v13 }
0x1096   :  { %4329 = vmatprep.subr.bf16.mxu1 %v5012_v0 }
0x1099   :  { %4330 = vmatpush3.bf16.msra.mxu1 %v4551_v61 }
0x109a   :  { %4331 = vmatprep.subr.bf16.mxu1 %v5012_v0 }
0x109d   :  { %4332 = vmatpush3.bf16.msra.mxu1 %v4552_v57 }
0x109e   :  { %4333 = vmatprep.subr.bf16.mxu1 %v5012_v0 }
0x10a1   :  { %4334 = vmatpush3.bf16.msra.mxu1 %v4553_v56 }
0x10a2   :  { %4335 = vmatprep.subr.bf16.mxu1 %v5012_v0 }
0x10a5   :  { %4336 = vmatpush3.bf16.msra.mxu1 %v4554_v28 }
0x10ae   :  { %v2454_v23 = vpop.f32.mrb[72].mxu0 }
0x10af   :  { %v4275_v3 = vpop.f32.mrb[73].mxu0 }
0x10b0   :  { %v2457_v4 = vpop.f32.mrb[74].mxu0  ;;  %v3835_v3 = vld [vmem:[%s6309_s8 + $0x24] ss:$0 sm:$0xff] }
0x10b1   :  { %v4276_v37 = vpop.f32.mrb[75].mxu0 }
0x10b8   :  { %v2462_v10 = vpop.f32.mrb[76].mxu0 }
0x10b9   :  { %v4279_v9 = vpop.f32.mrb[77].mxu0 }
0x10ba   :  { %v2465_v26 = vpop.f32.mrb[78].mxu0 }
0x10bb   :  { %v4280_v51 = vpop.f32.mrb[79].mxu0 }
0x10c0   :  { %v6001_v32 = vpop.f32.mrb[80].mxu0 }
0x10c1   :  { %v4283_v50 = vpop.f32.mrb[81].mxu0 }
0x10c2   :  { %v6003_v60 = vpop.f32.mrb[82].mxu0 }
0x10c3   :  { %v4284_v39 = vpop.f32.mrb[83].mxu0 }
0x1156   :  { %v2694_v38 = vpop.f32.mrb[84].mxu0 }
0x1157   :  { %v4311_v27 = vpop.f32.mrb[85].mxu0 }
0x1158   :  { %v2697_v55 = vpop.f32.mrb[86].mxu0 }
0x1159   :  { %v4409_v1 = vpack.i.bf16 %v2697_v55, %v2694_v38  ;;  %v4312_v36 = vpop.f32.mrb[87].mxu0  ;;  %v4557_v55 = vld [vmem:[#allocation11 + $0x84] ss:$8 sps:$4 sm:$0xff]  }
0x115a   :  { %3078 = vmatprep.subr.bf16.mxu0 %v4557_v55 }
0x115b   :  { %4410 = vrot.lane.b32.xlu1 %v4409_v1, %s5007_s6  ;;  %v4560_v1 = vld [vmem:[#allocation11 + $0x94] ss:$8 sps:$4 sm:$0xff]  }
0x115e   :  { %v2702_v48 = vpop.f32.mrb[88].mxu0 }
0x115f   :  { %v4315_v59 = vpop.f32.mrb[89].mxu0 }
0x1160   :  { %v2705_v42 = vpop.f32.mrb[90].mxu0 }
0x1161   :  { %v4414_v62 = vpack.i.bf16 %v2705_v42, %v2702_v48  ;;  %v4316_v31 = vpop.f32.mrb[91].mxu0 }
0x1163   :  { %4415 = vrot.lane.b32.xlu0 %v4414_v62, %s5007_s6 }
0x1166   :  { %v2710_v35 = vpop.f32.mrb[92].mxu0 }
0x1167   :  { %v4319_v2 = vpop.f32.mrb[93].mxu0 }
0x1168   :  { %v2713_v29 = vpop.f32.mrb[94].mxu0 }
0x1169   :  { %v4419_v52 = vpack.i.bf16 %v2713_v29, %v2710_v35  ;;  %v4320_v44 = vpop.f32.mrb[95].mxu0 }
0x116b   :  { %4420 = vrot.lane.b32.xlu1 %v4419_v52, %s5007_s6 }
0x11cd   :  { %v4411_v6 = vpop.permute.xlu1 %4410 }
0x11ce   :  { %v4413_v21 = vunpack.i.h.bf16 %v4411_v6  ;;  %v4412_v5 = vunpack.i.l.bf16 %v4411_v6 }
0x11d0   :  { %v2742_v25 = vsel %vm686_vm1, %v2457_v4, %v4413_v21  ;;  %v2741_v46 = vsel %vm686_vm1, %v2454_v23, %v4412_v5 }
0x11d1   :  { %v2747_v7 = vpack.c.bf16 %v2742_v25, %v2741_v46 }
0x11d3   :  { %4338 = vmatmul.mubr.bf16.vlgmr.msra.gmra.mrb[96].mxu1 %v2747_v7 }
0x11d4   :  { %4341 = vmatprep.mubr.msk.bf16.mxu1 %vm5013_vm0, %v5012_v0 }
0x11d5   :  { %v4416_v53 = vpop.permute.xlu0 %4415 }
0x11d6   :  { %v4418_v63 = vunpack.i.h.bf16 %v4416_v53  ;;  %v4417_v47 = vunpack.i.l.bf16 %v4416_v53 }
0x11d8   :  { %v2743_v11 = vsel %vm686_vm1, %v2462_v10, %v4417_v47  ;;  %v2744_v12 = vsel %vm686_vm1, %v2465_v26, %v4418_v63 }
0x11d9   :  { %v2748_v58 = vpack.c.bf16 %v2744_v12, %v2743_v11 }
0x11db   :  { %4342 = vmatmul.mubr.bf16.gmra.mrb[100].mxu1 %v2748_v58  ;;  %v4563_v58 = vld [vmem:[#allocation11 + $0xa4] ss:$8 sps:$4 sm:$0xff]  }
0x11dc   :  { %4345 = vmatprep.mubr.msk.bf16.mxu1 %vm5013_vm0, %v5012_v0 }
0x11dd   :  { %v4421_v15 = vpop.permute.xlu1 %4420 }
0x11de   :  { %v4423_v54 = vunpack.i.h.bf16 %v4421_v15  ;;  %v4422_v30 = vunpack.i.l.bf16 %v4421_v15  ;;  %v4561_v15 = vld [vmem:[#allocation11 + $0xa0] ss:$8 sps:$4 sm:$0xff]  }
0x11e0   :  { %v2745_v16 = vsel %vm686_vm1, %v6001_v32, %v4422_v30  ;;  %v2746_v20 = vsel %vm686_vm1, %v6003_v60, %v4423_v54  ;;  %v4566_v30 = vld [vmem:[#allocation11 + $0xb4] ss:$8 sps:$4 sm:$0xff]  }
0x11e1   :  { %v2749_v8 = vpack.c.bf16 %v2746_v20, %v2745_v16  ;;  %v4564_v16 = vld [vmem:[#allocation11 + $0xb0] ss:$8 sps:$4 sm:$0xff]   ;;  %v4569_v20 = vld [vmem:[#allocation11 + $0xc4] ss:$8 sps:$4 sm:$0xff]  }
0x11e3   :  { %4346 = vmatmul.mubr.bf16.gmra.mrb[104].mxu1 %v2749_v8  ;;  %v4567_v8 = vld [vmem:[#allocation11 + $0xc0] ss:$8 sps:$4 sm:$0xff]  }
0x12a6   :  { %v2849_v23 = vpop.f32.mrb[96].mxu1 }
0x12a7   :  { %v2872_v4 = vadd.f32 %v2849_v23, %v5724_v17  ;;  %v4339_v37 = vpop.f32.mrb[97].mxu1  ;;  %v4572_v23 = vld [vmem:[#allocation11 + $0xd4] ss:$8 sps:$4 sm:$0xff]  }
0x12a8   :  { %v2852_v10 = vpop.f32.mrb[98].mxu1  ;;  %v4573_v37 = vld [vmem:[#allocation11 + $0xe0] ss:$8 sps:$4 sm:$0xff]  }
0x12a9   :  { %v6031_v9 = vadd.f32 %v3835_v3, %v2872_v4  ;;  %v2873_v26 = vadd.f32 %v2852_v10, %v5727_v22  ;;  %v4340_v51 = vpop.f32.mrb[99].mxu1  ;;  %v4575_v4 = vld [vmem:[#allocation11 + $0xe4] ss:$8 sps:$4 sm:$0xff]   ;;  %v4578_v10 = vld [vmem:[#allocation11 + $0xf4] ss:$8 sps:$4 sm:$0xff]  }
0x12ab   :  { %v6034_v32 = vadd.f32 %v3835_v3, %v2873_v26  ;;  %2887 = vadd.xlane.f32.xlu0 %v6031_v9  ;;  %v4576_v26 = vld [vmem:[#allocation11 + $0xf0] ss:$8 sps:$4 sm:$0xff]  }
0x12ad   :  { %2889 = vadd.xlane.f32.xlu1 %v6034_v32 }
0x12ae   :  { %v2857_v50 = vpop.f32.mrb[100].mxu1 }
0x12af   :  { %v2874_v60 = vadd.f32 %v2857_v50, %v5732_v34  ;;  %v4343_v39 = vpop.f32.mrb[101].mxu1 }
0x12b0   :  { %v2860_v41 = vpop.f32.mrb[102].mxu1 }
0x12b1   :  { %v6039_v18 = vadd.f32 %v3835_v3, %v2874_v60  ;;  %v2875_v17 = vadd.f32 %v2860_v41, %v5735_v33  ;;  %v4344_v40 = vpop.f32.mrb[103].mxu1  ;;  %v4555_v33 = vld [vmem:[#allocation11 + $0x80] ss:$8 sps:$4 sm:$0xff]  }
0x12b2   :  { %3079 = vmatpush1.bf16.msra.mxu0 %v4555_v33 }
0x12b3   :  { %2891 = vadd.xlane.f32.xlu0 %v6039_v18  ;;  %v6043_v22 = vadd.f32 %v3835_v3, %v2875_v17  ;;  %3080 = vmatprep.subr.bf16.mxu0 %v4560_v1 }
0x12b6   :  { %v2865_v13 = vpop.f32.mrb[104].mxu1 }
0x12b7   :  { %v2876_v61 = vadd.f32 %v2865_v13, %v5740_v49  ;;  %2893 = vadd.xlane.f32.xlu0 %v6043_v22  ;;  %v4347_v57 = vpop.f32.mrb[105].mxu1  ;;  %v4558_v49 = vld [vmem:[#allocation11 + $0x90] ss:$8 sps:$4 sm:$0xff]  }
0x12b8   :  { %v2868_v56 = vpop.f32.mrb[106].mxu1  ;;  %3081 = vmatpush1.bf16.msra.mxu0 %v4558_v49 }
0x12b9   :  { %v6047_v28 = vadd.f32 %v3835_v3, %v2876_v61  ;;  %v2877_v34 = vadd.f32 %v2868_v56, %v5743_v19  ;;  %v4348_v38 = vpop.f32.mrb[107].mxu1  ;;  %3082 = vmatprep.subr.bf16.mxu0 %v4563_v58 }
0x12ba   :  { %v3836_v38 = vld [vmem:[%s6309_s8 + $0x22] ss:$0 sm:$0xff] }
0x12bb   :  { %v6050_v27 = vadd.f32 %v3835_v3, %v2877_v34  ;;  %2895 = vadd.xlane.f32.xlu0 %v6047_v28  ;;  %v4570_v3 = vld [vmem:[#allocation11 + $0xd0] ss:$8 sps:$4 sm:$0xff]  }
0x12bc   :  { %3083 = vmatpush1.bf16.msra.mxu0 %v4561_v15 }
0x12bd   :  { %2897 = vadd.xlane.f32.xlu1 %v6050_v27  ;;  %3084 = vmatprep.subr.bf16.mxu0 %v4566_v30 }
0x12c0   :  { %3085 = vmatpush1.bf16.msra.mxu0 %v4564_v16 }
0x12c1   :  { %3086 = vmatprep.subr.bf16.mxu0 %v4569_v20 }
0x12c4   :  { %3087 = vmatpush1.bf16.msra.mxu0 %v4567_v8 }
0x12c5   :  { %3088 = vmatprep.subr.bf16.mxu0 %v4572_v23 }
0x12c8   :  { %3089 = vmatpush1.bf16.msra.mxu0 %v4570_v3 }
0x12c9   :  { %3090 = vmatprep.subr.bf16.mxu0 %v4575_v4 }
0x12cc   :  { %3091 = vmatpush1.bf16.msra.mxu0 %v4573_v37  ;;  %v4580_v37 = vld [vmem:[#allocation13 + $0x80] sm:$0xff]  }
0x12cd   :  { %3092 = vmatprep.subr.bf16.mxu0 %v4578_v10  ;;  %v4582_v10 = vld [vmem:[#allocation13 + $0x88] sm:$0xff]  }
0x12d0   :  { %3093 = vmatpush1.bf16.msra.mxu0 %v4576_v26  ;;  %v4584_v26 = vld [vmem:[#allocation13 + $0x90] sm:$0xff]  }
0x12d1   :  { %4349 = vmatprep.subr.bf16.mxu0 %v5012_v0 }
0x1338   :  { %v2888_v36 = vpop.xlane.xlu0 %2887 }
0x1339   :  { %v2899_v48 = vmul.f32 0.0078125, %v2888_v36 }
0x133a   :  { %v2890_v59 = vpop.xlane.xlu1 %2889 }
0x133b   :  { %v6055_v19 = vsub.f32 %v6031_v9, %v2899_v48  ;;  %v2900_v42 = vmul.f32 0.0078125, %v2890_v59 }
0x133d   :  { %v6058_v62 = vsub.f32 %v6034_v32, %v2900_v42  ;;  %v2911_v31 = vmul.f32 %v6055_v19, %v6055_v19 }
0x133f   :  { %2917 = vadd.xlane.f32.xlu0 %v2911_v31  ;;  %v2912_v35 = vmul.f32 %v6058_v62, %v6058_v62 }
0x1340   :  { %v2892_v2 = vpop.xlane.xlu0 %2891 }
0x1341   :  { %v2901_v29 = vmul.f32 0.0078125, %v2892_v2  ;;  %2919 = vadd.xlane.f32.xlu1 %v2912_v35  ;;  %v3837_v2 = vld [vmem:[%s6309_s8 + $0x23] ss:$0 sm:$0xff] }
0x1343   :  { %v6065_v52 = vsub.f32 %v6039_v18, %v2901_v29 }
0x1344   :  { %v2894_v44 = vpop.xlane.xlu0 %2893 }
0x1345   :  { %v2902_v6 = vmul.f32 0.0078125, %v2894_v44  ;;  %v2913_v21 = vmul.f32 %v6065_v52, %v6065_v52 }
0x1347   :  { %v6070_v5 = vsub.f32 %v6043_v22, %v2902_v6  ;;  %2921 = vadd.xlane.f32.xlu0 %v2913_v21 }
0x1348   :  { %v2896_v25 = vpop.xlane.xlu0 %2895 }
0x1349   :  { %v2903_v46 = vmul.f32 0.0078125, %v2896_v25  ;;  %v2914_v7 = vmul.f32 %v6070_v5, %v6070_v5 }
0x134a   :  { %v2898_v53 = vpop.xlane.xlu1 %2897 }
0x134b   :  { %v6075_v63 = vsub.f32 %v6047_v28, %v2903_v46  ;;  %v2904_v47 = vmul.f32 0.0078125, %v2898_v53  ;;  %2923 = vadd.xlane.f32.xlu1 %v2914_v7 }
0x134d   :  { %v6078_v11 = vsub.f32 %v6050_v27, %v2904_v47  ;;  %v2915_v12 = vmul.f32 %v6075_v63, %v6075_v63 }
0x134f   :  { %2925 = vadd.xlane.f32.xlu0 %v2915_v12  ;;  %v2916_v54 = vmul.f32 %v6078_v11, %v6078_v11 }
0x1351   :  { %2927 = vadd.xlane.f32.xlu1 %v2916_v54 }
0x13cc   :  { %v2918_v51 = vpop.xlane.xlu0 %2917 }
0x13cd   :  { %v2929_v50 = vmul.f32 0.0078125, %v2918_v51  ;;  %v4586_v51 = vld [vmem:[#allocation13 + $0x98] sm:$0xff]  }
0x13ce   :  { %v2920_v60 = vpop.xlane.xlu1 %2919 }
0x13cf   :  { %v2935_v39 = vadd.f32 1e-06, %v2929_v50  ;;  %v2930_v41 = vmul.f32 0.0078125, %v2920_v60  ;;  %v4587_v50 = vld [vmem:[#allocation13 + $0xe0] sm:$0xff]  }
0x13d0   :  { %v4588_v60 = vld [vmem:[#allocation13 + $0xa0] sm:$0xff]  }
0x13d1   :  { %4759 = vrsqrt.f32 %v2935_v39  ;;  %v2936_v17 = vadd.f32 1e-06, %v2930_v41  ;;  %v4589_v39 = vld [vmem:[#allocation13 + $0xe8] sm:$0xff]  }
0x13d2   :  { %v4590_v41 = vld [vmem:[#allocation13 + $0xa8] sm:$0xff]  }
0x13d3   :  { %4761 = vrsqrt.f32 %v2936_v17  ;;  %v4591_v17 = vld [vmem:[#allocation13 + $0xf0] sm:$0xff]  }
0x13d4   :  { %v2922_v40 = vpop.xlane.xlu0 %2921 }
0x13d5   :  { %v2931_v13 = vmul.f32 0.0078125, %v2922_v40  ;;  %v4592_v40 = vld [vmem:[#allocation13 + $0xb0] sm:$0xff]  }
0x13d7   :  { %v2937_v61 = vadd.f32 1e-06, %v2931_v13  ;;  %v4593_v13 = vld [vmem:[#allocation13 + $0xf8] sm:$0xff]  }
0x13d8   :  { %v2924_v57 = vpop.xlane.xlu1 %2923 }
0x13d9   :  { %4763 = vrsqrt.f32 %v2937_v61  ;;  %v2932_v56 = vmul.f32 0.0078125, %v2924_v57  ;;  %v4594_v61 = vld [vmem:[#allocation13 + $0xb8] sm:$0xff]  }
0x13da   :  { %v3838_v57 = vld [vmem:[%s6309_s8 + $0x31] ss:$8 sm:$0x3] }
0x13db   :  { %v4760_v34 = vpop.eup %4759  ;;  %v2938_v33 = vadd.f32 1e-06, %v2932_v56  ;;  %v6106_v56 = vrot.slane %v3838_v57, %v1409_v43 }
0x13dc   :  { %v2947_v55 = vmul.f32 %v4760_v34, %v6055_v19  ;;  %v2926_v1 = vpop.xlane.xlu0 %2925  ;;  %v6110_v34 = vrot.slane %v3838_v57, %v1413_v45 }
0x13dd   :  { %v4762_v49 = vpop.eup %4761  ;;  %4765 = vrsqrt.f32 %v2938_v33  ;;  %v2933_v36 = vmul.f32 0.0078125, %v2926_v1 }
0x13de   :  { %v2953_v48 = vmul.f32 %v3836_v38, %v2947_v55  ;;  %v2948_v59 = vmul.f32 %v4762_v49, %v6058_v62  ;;  %v2928_v42 = vpop.xlane.xlu1 %2927 }
0x13df   :  { %v2939_v31 = vadd.f32 1e-06, %v2933_v36  ;;  %v2934_v35 = vmul.f32 0.0078125, %v2928_v42 }
0x13e0   :  { %v2954_v29 = vmul.f32 %v3836_v38, %v2948_v59  ;;  %v2959_v6 = vadd.f32 %v3837_v2, %v2953_v48 }
0x13e1   :  { %4767 = vrsqrt.f32 %v2939_v31  ;;  %v2940_v44 = vadd.f32 1e-06, %v2934_v35 }
0x13e2   :  { %v2960_v21 = vadd.f32 %v3837_v2, %v2954_v29 }
0x13e3   :  { %v4764_v19 = vpop.eup %4763  ;;  %4769 = vrsqrt.f32 %v2940_v44 }
0x13e4   :  { %v2965_v25 = vpack.c.bf16 %v2960_v21, %v2959_v6  ;;  %v2949_v46 = vmul.f32 %v4764_v19, %v6065_v52 }
0x13e6   :  { %3111 = vmatmul.mubr.bf16.vlgmr.msra.gmra.mrb[96].mxu0 %v2965_v25  ;;  %v2955_v53 = vmul.f32 %v3836_v38, %v2949_v46 }
0x13e7   :  { %v4766_v7 = vpop.eup %4765  ;;  %3120 = vmatprep.mubr.bf16.mxu0 %v5014_v24 }
0x13e8   :  { %v2950_v62 = vmul.f32 %v4766_v7, %v6070_v5  ;;  %v2961_v58 = vadd.f32 %v3837_v2, %v2955_v53  ;;  %v4579_v5 = vld [vmem:[#allocation13 + $0xc0] sm:$0xff]  }
0x13e9   :  { %4020 = vmatprep.subr.bf16.mxu1 %v4579_v5 }
0x13ea   :  { %v2956_v47 = vmul.f32 %v3836_v38, %v2950_v62  ;;  %4021 = vmatpush3.bf16.msra.mxu1 %v4580_v37 }
0x13eb   :  { %v4768_v12 = vpop.eup %4767 }
0x13ec   :  { %v2962_v15 = vadd.f32 %v3837_v2, %v2956_v47  ;;  %v2951_v54 = vmul.f32 %v4768_v12, %v6075_v63  ;;  %v4581_v63 = vld [vmem:[#allocation13 + $0xc8] sm:$0xff]  }
0x13ed   :  { %v4770_v30 = vpop.eup %4769  ;;  %4022 = vmatprep.subr.bf16.mxu1 %v4581_v63 }
0x13ee   :  { %v2966_v16 = vpack.c.bf16 %v2962_v15, %v2961_v58  ;;  %v2952_v20 = vmul.f32 %v4770_v30, %v6078_v11  ;;  %v2957_v8 = vmul.f32 %v3836_v38, %v2951_v54  ;;  %4023 = vmatpush3.bf16.msra.mxu1 %v4582_v10  ;;  %v4583_v11 = vld [vmem:[#allocation13 + $0xd0] sm:$0xff]  }
0x13ef   :  { %4024 = vmatprep.subr.bf16.mxu1 %v4583_v11 }
0x13f0   :  { %3121 = vmatmul.mubr.bf16.gmra.mrb[100].mxu0 %v2966_v16  ;;  %v2958_v52 = vmul.f32 %v3836_v38, %v2952_v20  ;;  %v2963_v3 = vadd.f32 %v3837_v2, %v2957_v8 }
0x13f1   :  { %3130 = vmatprep.mubr.bf16.mxu0 %v5014_v24  ;;  %v4585_v24 = vld [vmem:[#allocation13 + $0xd8] sm:$0xff]  }
0x13f2   :  { %v2964_v23 = vadd.f32 %v3837_v2, %v2958_v52  ;;  %4025 = vmatpush3.bf16.msra.mxu1 %v4584_v26 }
0x13f3   :  { %4026 = vmatprep.subr.bf16.mxu1 %v4585_v24 }
0x13f4   :  { %v2967_v4 = vpack.c.bf16 %v2964_v23, %v2963_v3 }
0x13f6   :  { %4027 = vmatpush3.bf16.msra.mxu1 %v4586_v51 }
0x13f7   :  { %4028 = vmatprep.subr.bf16.mxu1 %v4587_v50 }
0x13f8   :  { %3131 = vmatmul.mubr.bf16.gmra.mrb[104].mxu0 %v2967_v4 }
0x13f9   :  { %4365 = vmatprep.mubr.msk.bf16.mxu0 %vm5013_vm0, %v5012_v0 }
0x13fa   :  { %4029 = vmatpush3.bf16.msra.mxu1 %v4588_v60 }
0x13fb   :  { %4030 = vmatprep.subr.bf16.mxu1 %v4589_v39 }
0x13fe   :  { %4031 = vmatpush3.bf16.msra.mxu1 %v4590_v41 }
0x13ff   :  { %4032 = vmatprep.subr.bf16.mxu1 %v4591_v17 }
0x1402   :  { %4033 = vmatpush3.bf16.msra.mxu1 %v4592_v40 }
0x1403   :  { %4034 = vmatprep.subr.bf16.mxu1 %v4593_v13 }
0x1406   :  { %4035 = vmatpush3.bf16.msra.mxu1 %v4594_v61 }
0x14b9   :  { %v3112_v38 = vpop.f32.mrb[96].mxu0 }
0x14ba   :  { %v6113_v33 = vadd.f32 %v3112_v38, %v6106_v56  ;;  %v3114_v55 = vpop.f32.mrb[97].mxu0 }
0x14bb   :  { %v6116_v1 = vadd.f32 %v3114_v55, %v6110_v34  ;;  %v3116_v49 = vpop.f32.mrb[98].mxu0 }
0x14bc   :  { %v3141_v36 = vmul.f32 %v6113_v33, %v6113_v33  ;;  %v6121_v48 = vadd.f32 %v3116_v49, %v6106_v56  ;;  %v3118_v43 = vpop.f32.mrb[99].mxu0 }
0x14bd   :  { %v3142_v14 = vmul.f32 %v6116_v1, %v6116_v1  ;;  %v6126_v45 = vadd.f32 %v3118_v43, %v6110_v34 }
0x14be   :  { %v3153_v59 = vmul.f32 %v3141_v36, %v6113_v33  ;;  %v3143_v42 = vmul.f32 %v6121_v48, %v6121_v48 }
0x14bf   :  { %v3154_v31 = vmul.f32 %v3142_v14, %v6116_v1  ;;  %v3144_v35 = vmul.f32 %v6126_v45, %v6126_v45 }
0x14c0   :  { %v3165_v2 = vmul.f32 0.044715, %v3153_v59  ;;  %v3155_v29 = vmul.f32 %v3143_v42, %v6121_v48 }
0x14c1   :  { %v3166_v44 = vmul.f32 0.044715, %v3154_v31  ;;  %v3156_v6 = vmul.f32 %v3144_v35, %v6126_v45 }
0x14c2   :  { %v3177_v21 = vadd.f32 %v3165_v2, %v6113_v33  ;;  %v3167_v19 = vmul.f32 0.044715, %v3155_v29 }
0x14c3   :  { %v3178_v25 = vadd.f32 %v3166_v44, %v6116_v1  ;;  %v3168_v46 = vmul.f32 0.044715, %v3156_v6  ;;  %v3122_v7 = vpop.f32.mrb[100].mxu0 }
0x14c4   :  { %v3189_v62 = vmul.f32 0.7978846, %v3177_v21  ;;  %v3179_v53 = vadd.f32 %v3167_v19, %v6121_v48  ;;  %v6140_v47 = vadd.f32 %v3122_v7, %v6106_v56  ;;  %v3124_v12 = vpop.f32.mrb[101].mxu0 }
0x14c5   :  { %v3190_v58 = vmul.f32 0.7978846, %v3178_v25  ;;  %v3180_v15 = vadd.f32 %v3168_v46, %v6126_v45  ;;  %v6144_v54 = vadd.f32 %v3124_v12, %v6110_v34  ;;  %v3126_v30 = vpop.f32.mrb[102].mxu0 }
0x14c6   :  { %4771 = vtanh.f32 %v3189_v62  ;;  %v3191_v16 = vmul.f32 0.7978846, %v3179_v53  ;;  %v3145_v20 = vmul.f32 %v6140_v47, %v6140_v47  ;;  %v6149_v8 = vadd.f32 %v3126_v30, %v6106_v56  ;;  %v3128_v52 = vpop.f32.mrb[103].mxu0 }
0x14c7   :  { %4773 = vtanh.f32 %v3190_v58  ;;  %v3192_v23 = vmul.f32 0.7978846, %v3180_v15  ;;  %v3146_v3 = vmul.f32 %v6144_v54, %v6144_v54  ;;  %v6154_v4 = vadd.f32 %v3128_v52, %v6110_v34 }
0x14c8   :  { %4775 = vtanh.f32 %v3191_v16  ;;  %v3157_v5 = vmul.f32 %v3145_v20, %v6140_v47  ;;  %v3147_v37 = vmul.f32 %v6149_v8, %v6149_v8 }
0x14c9   :  { %4777 = vtanh.f32 %v3192_v23  ;;  %v3158_v63 = vmul.f32 %v3146_v3, %v6144_v54  ;;  %v3148_v10 = vmul.f32 %v6154_v4, %v6154_v4 }
0x14ca   :  { %v3169_v11 = vmul.f32 0.044715, %v3157_v5  ;;  %v3159_v26 = vmul.f32 %v3147_v37, %v6149_v8 }
0x14cb   :  { %v3170_v24 = vmul.f32 0.044715, %v3158_v63  ;;  %v3160_v51 = vmul.f32 %v3148_v10, %v6154_v4  ;;  %v3132_v50 = vpop.f32.mrb[104].mxu0 }
0x14cc   :  { %v3181_v60 = vadd.f32 %v3169_v11, %v6140_v47  ;;  %v3171_v39 = vmul.f32 0.044715, %v3159_v26  ;;  %v6166_v41 = vadd.f32 %v3132_v50, %v6106_v56  ;;  %v3134_v17 = vpop.f32.mrb[105].mxu0 }
0x14cd   :  { %v3182_v40 = vadd.f32 %v3170_v24, %v6144_v54  ;;  %v3172_v13 = vmul.f32 0.044715, %v3160_v51  ;;  %v6170_v61 = vadd.f32 %v3134_v17, %v6110_v34  ;;  %v3136_v57 = vpop.f32.mrb[106].mxu0 }
0x14ce   :  { %v3193_v38 = vmul.f32 0.7978846, %v3181_v60  ;;  %v3183_v55 = vadd.f32 %v3171_v39, %v6149_v8  ;;  %v3149_v49 = vmul.f32 %v6166_v41, %v6166_v41  ;;  %v6176_v36 = vadd.f32 %v3136_v57, %v6106_v56  ;;  %v3138_v43 = vpop.f32.mrb[107].mxu0 }
0x14cf   :  { %v3194_v14 = vmul.f32 0.7978846, %v3182_v40  ;;  %v3184_v59 = vadd.f32 %v3172_v13, %v6154_v4  ;;  %v3150_v42 = vmul.f32 %v6170_v61, %v6170_v61  ;;  %v6182_v31 = vadd.f32 %v3138_v43, %v6110_v34 }
0x14d0   :  { %v4772_v35 = vpop.eup %4771  ;;  %4779 = vtanh.f32 %v3193_v38  ;;  %v3195_v2 = vmul.f32 0.7978846, %v3183_v55  ;;  %v3161_v29 = vmul.f32 %v3149_v49, %v6166_v41  ;;  %v3151_v44 = vmul.f32 %v6176_v36, %v6176_v36 }
0x14d1   :  { %v4774_v56 = vpop.eup %4773  ;;  %v3213_v6 = vadd.f32 1.0, %v4772_v35  ;;  %4781 = vtanh.f32 %v3194_v14  ;;  %v3196_v21 = vmul.f32 0.7978846, %v3184_v59  ;;  %v3162_v19 = vmul.f32 %v3150_v42, %v6170_v61 }
0x14d2   :  { %v4776_v25 = vpop.eup %4775  ;;  %4783 = vtanh.f32 %v3195_v2  ;;  %v3173_v46 = vmul.f32 0.044715, %v3161_v29  ;;  %v3163_v34 = vmul.f32 %v3151_v44, %v6176_v36  ;;  %v3152_v7 = vmul.f32 %v6182_v31, %v6182_v31 }
0x14d3   :  { %v4778_v62 = vpop.eup %4777  ;;  %v3225_v53 = vmul.f32 0.5, %v3213_v6  ;;  %v3215_v12 = vadd.f32 1.0, %v4776_v25  ;;  %4785 = vtanh.f32 %v3196_v21  ;;  %v3174_v58 = vmul.f32 0.044715, %v3162_v19 }
0x14d4   :  { %v3185_v15 = vadd.f32 %v3173_v46, %v6166_v41  ;;  %v3175_v30 = vmul.f32 0.044715, %v3163_v34  ;;  %v3164_v16 = vmul.f32 %v3152_v7, %v6182_v31  ;;  %v3214_v20 = vadd.f32 1.0, %v4774_v56 }
0x14d5   :  { %v3227_v52 = vmul.f32 0.5, %v3215_v12  ;;  %v3186_v23 = vadd.f32 %v3174_v58, %v6170_v61  ;;  %v3216_v3 = vadd.f32 1.0, %v4778_v62  ;;  %v3237_v11 = vmul.f32 %v3225_v53, %v6113_v33 }
0x14d6   :  { %v3197_v5 = vmul.f32 0.7978846, %v3185_v15  ;;  %v3187_v37 = vadd.f32 %v3175_v30, %v6176_v36  ;;  %v3176_v63 = vmul.f32 0.044715, %v3164_v16  ;;  %v3226_v10 = vmul.f32 0.5, %v3214_v20 }
0x14d7   :  { %v3239_v26 = vmul.f32 %v3227_v52, %v6121_v48  ;;  %v3198_v24 = vmul.f32 0.7978846, %v3186_v23  ;;  %v3228_v51 = vmul.f32 0.5, %v3216_v3 }
0x14d8   :  { %4787 = vtanh.f32 %v3197_v5  ;;  %v3199_v50 = vmul.f32 0.7978846, %v3187_v37  ;;  %v3188_v60 = vadd.f32 %v3176_v63, %v6182_v31  ;;  %v3238_v17 = vmul.f32 %v3226_v10, %v6116_v1  ;;  %v3871_v10 = vld [vmem:[%s6309_s8 + $0x25] ss:$0 sm:$0xff] }
0x14d9   :  { %v3249_v39 = vpack.c.bf16 %v3239_v26, %v3237_v11  ;;  %4789 = vtanh.f32 %v3198_v24  ;;  %v3240_v40 = vmul.f32 %v3228_v51, %v6126_v45 }
0x14da   :  { %v4780_v13 = vpop.eup %4779  ;;  %4791 = vtanh.f32 %v3199_v50  ;;  %v3200_v57 = vmul.f32 0.7978846, %v3188_v60 }
0x14db   :  { %v4782_v38 = vpop.eup %4781  ;;  %v3250_v55 = vpack.c.bf16 %v3240_v40, %v3238_v17  ;;  %v3217_v33 = vadd.f32 1.0, %v4780_v13 }
0x14dc   :  { %v4784_v49 = vpop.eup %4783  ;;  %4793 = vtanh.f32 %v3200_v57  ;;  %v3218_v48 = vadd.f32 1.0, %v4782_v38 }
0x14dd   :  { %v4786_v43 = vpop.eup %4785  ;;  %3416 = vmatprep.mubr.bf16.mxu1 %v3250_v55  ;;  %v3219_v14 = vadd.f32 1.0, %v4784_v49  ;;  %v3229_v59 = vmul.f32 0.5, %v3217_v33 }
0x14de   :  { %3417 = vmatmul.mubr.bf16.vlgmr.msra.gmra.mrb[108].mxu1 %v3249_v39  ;;  %v3220_v42 = vadd.f32 1.0, %v4786_v43  ;;  %v3230_v35 = vmul.f32 0.5, %v3218_v48 }
0x14df   :  { %v3231_v2 = vmul.f32 0.5, %v3219_v14  ;;  %v3241_v45 = vmul.f32 %v3229_v59, %v6140_v47  ;;  %v4596_v59 = vld [vmem:[%s6310_s9 + $0x8] sm:$0xff]  }
0x14e0   :  { %v3232_v1 = vmul.f32 0.5, %v3220_v42  ;;  %v3242_v56 = vmul.f32 %v3230_v35, %v6144_v54 }
0x14e1   :  { %v3243_v29 = vmul.f32 %v3231_v2, %v6149_v8 }
0x14e2   :  { %v4788_v44 = vpop.eup %4787  ;;  %v3244_v6 = vmul.f32 %v3232_v1, %v6154_v4 }
0x14e3   :  { %v4790_v21 = vpop.eup %4789  ;;  %v3251_v19 = vpack.c.bf16 %v3243_v29, %v3241_v45  ;;  %v3221_v25 = vadd.f32 1.0, %v4788_v44 }
0x14e4   :  { %v4792_v46 = vpop.eup %4791  ;;  %v3252_v34 = vpack.c.bf16 %v3244_v6, %v3242_v56  ;;  %v3222_v7 = vadd.f32 1.0, %v4790_v21 }
0x14e5   :  { %v3223_v62 = vadd.f32 1.0, %v4792_v46  ;;  %v3233_v53 = vmul.f32 0.5, %v3221_v25 }
0x14e6   :  { %v4794_v12 = vpop.eup %4793  ;;  %3424 = vmatprep.mubr.bf16.mxu1 %v3252_v34  ;;  %v3234_v47 = vmul.f32 0.5, %v3222_v7 }
0x14e7   :  { %3425 = vmatmul.mubr.bf16.gmra.mrb[112].mxu1 %v3251_v19  ;;  %v3224_v58 = vadd.f32 1.0, %v4794_v12  ;;  %v3235_v15 = vmul.f32 0.5, %v3223_v62  ;;  %v3245_v30 = vmul.f32 %v3233_v53, %v6166_v41 }
0x14e8   :  { %v3246_v4 = vmul.f32 %v3234_v47, %v6170_v61  ;;  %v4597_v47 = vld [vmem:[%s6310_s9 + $0x10] sm:$0xff]  }
0x14e9   :  { %v3236_v8 = vmul.f32 0.5, %v3224_v58  ;;  %v3247_v54 = vmul.f32 %v3235_v15, %v6176_v36 }
0x14eb   :  { %v3248_v16 = vmul.f32 %v3236_v8, %v6182_v31  ;;  %v3253_v20 = vpack.c.bf16 %v3247_v54, %v3245_v30  ;;  %v4598_v54 = vld [vmem:[%s6310_s9 + $0x18] sm:$0xff]  }
0x14ed   :  { %v3254_v52 = vpack.c.bf16 %v3248_v16, %v3246_v4  ;;  %v4599_v4 = vld [vmem:[%s6310_s9 + $0x20] sm:$0xff]   ;;  %v4600_v16 = vld [vmem:[%s6310_s9 + $0x28] sm:$0xff]  }
0x14ef   :  { %3432 = vmatprep.mubr.bf16.mxu1 %v3254_v52  ;;  %v4602_v52 = vld [vmem:[%s6310_s9 + $0x38] sm:$0xff]  }
0x14f0   :  { %3433 = vmatmul.mubr.bf16.gmra.mrb[116].mxu1 %v3253_v20  ;;  %v4601_v20 = vld [vmem:[%s6310_s9 + $0x30] sm:$0xff]  }
0x15b1   :  { %v4036_v23 = vpop.f32.mrb[108].mxu1 }
0x15b2   :  { %v4037_v3 = vpop.f32.mrb[109].mxu1 }
0x15b3   :  { %v4038_v5 = vadd.f32 %v4037_v3, %v4036_v23  ;;  %v4039_v37 = vpop.f32.mrb[110].mxu1 }
0x15b4   :  { %v4040_v63 = vpop.f32.mrb[111].mxu1 }
0x15b5   :  { %v3441_v41 = vadd.f32 %v4038_v5, %v6031_v9  ;;  %v4041_v36 = vadd.f32 %v4040_v63, %v4039_v37 }
0x15b7   :  { %v3442_v61 = vadd.f32 %v4041_v36, %v6034_v32  ;;  %v3448_v11 = vadd.f32 %v3871_v10, %v3441_v41 }
0x15b9   :  { %3456 = vadd.xlane.f32.xlu0 %v3448_v11  ;;  %v3449_v31 = vadd.f32 %v3871_v10, %v3442_v61 }
0x15ba   :  { %v4042_v26 = vpop.f32.mrb[112].mxu1 }
0x15bb   :  { %3458 = vadd.xlane.f32.xlu1 %v3449_v31  ;;  %v4043_v24 = vpop.f32.mrb[113].mxu1 }
0x15bc   :  { %v4044_v51 = vadd.f32 %v4043_v24, %v4042_v26  ;;  %v4045_v50 = vpop.f32.mrb[114].mxu1 }
0x15bd   :  { %v4046_v60 = vpop.f32.mrb[115].mxu1 }
0x15be   :  { %v3443_v39 = vadd.f32 %v4044_v51, %v6039_v18  ;;  %v4047_v17 = vadd.f32 %v4046_v60, %v4045_v50  ;;  %v3872_v51 = vld [vmem:[%s6311_s10] ss:$0 sm:$0xff] }
0x15c0   :  { %v3444_v40 = vadd.f32 %v4047_v17, %v6043_v22  ;;  %v3450_v13 = vadd.f32 %v3871_v10, %v3443_v39  ;;  %v4595_v22 = vld [vmem:[%s6310_s9] sm:$0xff]  }
0x15c1   :  { %4350 = vmatpush3.bf16.msra.mxu0 %v4595_v22 }
0x15c2   :  { %3460 = vadd.xlane.f32.xlu0 %v3450_v13  ;;  %v3451_v9 = vadd.f32 %v3871_v10, %v3444_v40  ;;  %4351 = vmatprep.subr.bf16.mxu0 %v5012_v0 }
0x15c3   :  { %v4048_v57 = vpop.f32.mrb[116].mxu1 }
0x15c4   :  { %v4049_v38 = vpop.f32.mrb[117].mxu1  ;;  %3462 = vadd.xlane.f32.xlu1 %v3451_v9 }
0x15c5   :  { %v4050_v32 = vadd.f32 %v4049_v38, %v4048_v57  ;;  %v4051_v55 = vpop.f32.mrb[118].mxu1  ;;  %4352 = vmatpush3.bf16.msra.mxu0 %v4596_v59 }
0x15c6   :  { %v4052_v33 = vpop.f32.mrb[119].mxu1  ;;  %4353 = vmatprep.subr.bf16.mxu0 %v5012_v0 }
0x15c7   :  { %v3445_v49 = vadd.f32 %v4050_v32, %v6047_v28  ;;  %v4053_v48 = vadd.f32 %v4052_v33, %v4051_v55 }
0x15c9   :  { %v3446_v43 = vadd.f32 %v4053_v48, %v6050_v27  ;;  %v3452_v14 = vadd.f32 %v3871_v10, %v3445_v49  ;;  %4354 = vmatpush3.bf16.msra.mxu0 %v4597_v47 }
0x15ca   :  { %4355 = vmatprep.subr.bf16.mxu0 %v5012_v0 }
0x15cb   :  { %3464 = vadd.xlane.f32.xlu0 %v3452_v14  ;;  %v3453_v18 = vadd.f32 %v3871_v10, %v3446_v43 }
0x15cd   :  { %3466 = vadd.xlane.f32.xlu1 %v3453_v18  ;;  %4356 = vmatpush3.bf16.msra.mxu0 %v4598_v54 }
0x15ce   :  { %4357 = vmatprep.subr.bf16.mxu0 %v5012_v0 }
0x15d1   :  { %4358 = vmatpush3.bf16.msra.mxu0 %v4599_v4 }
0x15d2   :  { %4359 = vmatprep.subr.bf16.mxu0 %v5012_v0 }
0x15d5   :  { %4360 = vmatpush3.bf16.msra.mxu0 %v4600_v16 }
0x15d6   :  { %4361 = vmatprep.subr.bf16.mxu0 %v5012_v0 }
0x15d9   :  { %4362 = vmatpush3.bf16.msra.mxu0 %v4601_v20 }
0x15da   :  { %4363 = vmatprep.subr.bf16.mxu0 %v5012_v0 }
0x15dd   :  { %4364 = vmatpush3.bf16.msra.mxu0 %v4602_v52 }
0x1646   :  { %v3457_v28 = vpop.xlane.xlu0 %3456 }
0x1647   :  { %v3468_v27 = vmul.f32 0.0078125, %v3457_v28 }
0x1648   :  { %v3459_v42 = vpop.xlane.xlu1 %3458 }
0x1649   :  { %v3474_v35 = vsub.f32 %v3448_v11, %v3468_v27  ;;  %v3469_v2 = vmul.f32 0.0078125, %v3459_v42 }
0x164b   :  { %v6225_v1 = vsub.f32 %v3449_v31, %v3469_v2  ;;  %v3480_v45 = vmul.f32 %v3474_v35, %v3474_v35 }
0x164d   :  { %3486 = vadd.xlane.f32.xlu0 %v3480_v45  ;;  %v3481_v29 = vmul.f32 %v6225_v1, %v6225_v1 }
0x164f   :  { %3488 = vadd.xlane.f32.xlu1 %v3481_v29  ;;  %v3461_v44 = vpop.xlane.xlu0 %3460 }
0x1650   :  { %v3470_v56 = vmul.f32 0.0078125, %v3461_v44 }
0x1651   :  { %v3463_v6 = vpop.xlane.xlu1 %3462 }
0x1652   :  { %v6229_v21 = vsub.f32 %v3450_v13, %v3470_v56  ;;  %v3471_v19 = vmul.f32 0.0078125, %v3463_v6 }
0x1654   :  { %v6231_v25 = vsub.f32 %v3451_v9, %v3471_v19  ;;  %v3482_v46 = vmul.f32 %v6229_v21, %v6229_v21  ;;  %v3873_v9 = vld [vmem:[%s6311_s10 + $0x1] ss:$0 sm:$0xff] }
0x1656   :  { %3490 = vadd.xlane.f32.xlu0 %v3482_v46  ;;  %v3483_v34 = vmul.f32 %v6231_v25, %v6231_v25  ;;  %v3874_v46 = vld [vmem:[%s6311_s10 + $0x2] ss:$0 sm:$0xff]  ;;  %s4967_s10 = scalar_lea.vmem %s3683_s26, 768 }
0x1657   :  { %p4968_p0 = scmp.ne.s32.totalorder %s3683_s26, %s4967_s10  ;;  %p4973_p2 = scmp.lt.s32.totalorder %s4967_s10, %s4967_s10 }
0x1658   :  { %v3465_v7 = vpop.xlane.xlu0 %3464  ;;  %3492 = vadd.xlane.f32.xlu1 %v3483_v34 }
0x1659   :  { %v3472_v62 = vmul.f32 0.0078125, %v3465_v7  ;;  %p4974_p3 = por %p4973_p2, %p4972_p1 }
0x165a   :  { %v3467_v53 = vpop.xlane.xlu1 %3466 }
0x165b   :  { %v6237_v12 = vsub.f32 %v3452_v14, %v3472_v62  ;;  %v3473_v58 = vmul.f32 0.0078125, %v3467_v53  ;;  %p4975_p4 = pnand %p4974_p3, %p4968_p0 }
0x165d   :  { %v6242_v15 = vsub.f32 %v3453_v18, %v3473_v58  ;;  %v3484_v8 = vmul.f32 %v6237_v12, %v6237_v12 }
0x165f   :  { %3494 = vadd.xlane.f32.xlu0 %v3484_v8  ;;  %v3485_v30 = vmul.f32 %v6242_v15, %v6242_v15 }
0x1661   :  { %3496 = vadd.xlane.f32.xlu1 %v3485_v30 }
0x16da   :  { %v3487_v23 = vpop.xlane.xlu0 %3486 }
0x16db   :  { %v3498_v3 = vmul.f32 0.0078125, %v3487_v23 }
0x16dc   :  { %v3489_v5 = vpop.xlane.xlu1 %3488 }
0x16dd   :  { %v3504_v37 = vadd.f32 1e-06, %v3498_v3  ;;  %v3499_v63 = vmul.f32 0.0078125, %v3489_v5 }
0x16df   :  { %4795 = vrsqrt.f32 %v3504_v37  ;;  %v3505_v10 = vadd.f32 1e-06, %v3499_v63 }
0x16e1   :  { %4797 = vrsqrt.f32 %v3505_v10 }
0x16e3   :  { %v3491_v41 = vpop.xlane.xlu0 %3490 }
0x16e4   :  { %v3500_v36 = vmul.f32 0.0078125, %v3491_v41 }
0x16e5   :  { %v3493_v61 = vpop.xlane.xlu1 %3492 }
0x16e6   :  { %v3506_v11 = vadd.f32 1e-06, %v3500_v36  ;;  %v3501_v31 = vmul.f32 0.0078125, %v3493_v61 }
0x16e8   :  { %4799 = vrsqrt.f32 %v3506_v11  ;;  %v3507_v26 = vadd.f32 1e-06, %v3501_v31 }
0x16e9   :  { %v4796_v24 = vpop.eup %4795 }
0x16ea   :  { %v3516_v50 = vmul.f32 %v4796_v24, %v3474_v35  ;;  %4801 = vrsqrt.f32 %v3507_v26 }
0x16eb   :  { %v4798_v60 = vpop.eup %4797 }
0x16ec   :  { %v3526_v39 = vmul.f32 %v3872_v51, %v3516_v50  ;;  %v3517_v17 = vmul.f32 %v4798_v60, %v6225_v1  ;;  %v3495_v40 = vpop.xlane.xlu0 %3494 }
0x16ed   :  { %v3502_v13 = vmul.f32 0.0078125, %v3495_v40 }
0x16ee   :  { %v3527_v57 = vmul.f32 %v3872_v51, %v3517_v17  ;;  %v3497_v38 = vpop.xlane.xlu1 %3496  ;;  %v3536_v33 = vadd.f32 %v3873_v9, %v3526_v39 }
0x16ef   :  { %v3508_v32 = vadd.f32 1e-06, %v3502_v13  ;;  %v3503_v55 = vmul.f32 0.0078125, %v3497_v38 }
0x16f0   :  { %v3537_v49 = vadd.f32 %v3873_v9, %v3527_v57 }
0x16f1   :  { %4803 = vrsqrt.f32 %v3508_v32  ;;  %v3509_v48 = vadd.f32 1e-06, %v3503_v55 }
0x16f2   :  { %v4800_v43 = vpop.eup %4799  ;;  %v3542_v14 = vpack.c.bf16 %v3537_v49, %v3536_v33 }
0x16f3   :  { %4805 = vrsqrt.f32 %v3509_v48  ;;  %v3518_v18 = vmul.f32 %v4800_v43, %v6229_v21 }
0x16f4   :  { %v4802_v22 = vpop.eup %4801  ;;  %4366 = vmatmul.mubr.bf16.vlgmr.msra.gmra.mrb[108].mxu0 %v3542_v14 }
0x16f5   :  { %4369 = vmatprep.mubr.msk.bf16.mxu0 %vm5013_vm0, %v5012_v0  ;;  %v3519_v59 = vmul.f32 %v4802_v22, %v6231_v25  ;;  %v3528_v28 = vmul.f32 %v3872_v51, %v3518_v18 }
0x16f7   :  { %v3529_v27 = vmul.f32 %v3872_v51, %v3519_v59  ;;  %v3538_v42 = vadd.f32 %v3873_v9, %v3528_v28 }
0x16f9   :  { %v3539_v35 = vadd.f32 %v3873_v9, %v3529_v27 }
0x16fb   :  { %v4804_v2 = vpop.eup %4803  ;;  %v3543_v1 = vpack.c.bf16 %v3539_v35, %v3538_v42 }
0x16fc   :  { %v3520_v45 = vmul.f32 %v4804_v2, %v6237_v12 }
0x16fd   :  { %v4806_v29 = vpop.eup %4805  ;;  %4370 = vmatmul.mubr.bf16.gmra.mrb[112].mxu0 %v3543_v1 }
0x16fe   :  { %4373 = vmatprep.mubr.msk.bf16.mxu0 %vm5013_vm0, %v5012_v0  ;;  %v3521_v44 = vmul.f32 %v4806_v29, %v6242_v15  ;;  %v3530_v56 = vmul.f32 %v3872_v51, %v3520_v45 }
0x1700   :  { %v3531_v6 = vmul.f32 %v3872_v51, %v3521_v44  ;;  %v3540_v21 = vadd.f32 %v3873_v9, %v3530_v56 }
0x1702   :  { %v3541_v19 = vadd.f32 %v3873_v9, %v3531_v6 }
0x1704   :  { %v3544_v25 = vpack.c.bf16 %v3541_v19, %v3540_v21 }
0x1706   :  { %4374 = vmatmul.mubr.bf16.gmra.mrb[116].mxu0 %v3544_v25 }
0x17c7   :  { %v3648_v34 = vpop.f32.mrb[108].mxu0 }
0x17c8   :  { %v3649_v7 = vadd.f32 %v3874_v46, %v3648_v34  ;;  %v4367_v62 = vpop.f32.mrb[109].mxu0 }
0x17c9   :  { %v3651_v53 = vpop.f32.mrb[110].mxu0 }
0x17ca   :  { %3671 = vst [vmem:[#allocation14] sm:$0xff] %v3649_v7  ;;  %v3652_v12 = vadd.f32 %v3874_v46, %v3651_v53  ;;  %v4368_v58 = vpop.f32.mrb[111].mxu0 }
0x17cc   :  { %3672 = vst [vmem:[#allocation14 + $0x8] sm:$0xff] %v3652_v12 }
0x17d0   :  { %v3656_v0 = vpop.f32.mrb[112].mxu0 }
0x17d1   :  { %v3657_v47 = vadd.f32 %v3874_v46, %v3656_v0  ;;  %v4371_v15 = vpop.f32.mrb[113].mxu0 }
0x17d2   :  { %v3659_v8 = vpop.f32.mrb[114].mxu0 }
0x17d3   :  { %3673 = vst [vmem:[#allocation14 + $0x10] sm:$0xff] %v3657_v47  ;;  %v3660_v30 = vadd.f32 %v3874_v46, %v3659_v8  ;;  %v4372_v54 = vpop.f32.mrb[115].mxu0 }
0x17d5   :  { %3674 = vst [vmem:[#allocation14 + $0x18] sm:$0xff] %v3660_v30 }
0x17d9   :  { %v3664_v4 = vpop.f32.mrb[116].mxu0 }
0x17da   :  { %v3665_v16 = vadd.f32 %v3874_v46, %v3664_v4  ;;  %v4375_v20 = vpop.f32.mrb[117].mxu0 }
0x17db   :  { %v3667_v52 = vpop.f32.mrb[118].mxu0 }
0x17dc   :  { %3675 = vst [vmem:[#allocation14 + $0x20] sm:$0xff] %v3665_v16  ;;  %v3668_v23 = vadd.f32 %v3874_v46, %v3667_v52  ;;  %v4376_v3 = vpop.f32.mrb[119].mxu0 }
0x17de   :  { %3676 = vst [vmem:[#allocation14 + $0x28] sm:$0xff] %v3668_v23 }
0x17df   :  { %4978 = shalt.err (!%p4975_p4)
}
0x17e0   :  { %s4979_s16 = scalar_lea.hbm %s6312_s11, 768 }
0x17e1   :  { %p4980_p5 = scmp.ne.s32.totalorder %s6312_s11, %s4979_s16  ;;  %p4983_p6 = scmp.lt.u32.totalorder %s4979_s16, %s6312_s11 }
0x17e3   :  { %p4985_p7 = pnand %p4983_p6, %p4980_p5 }
0x17e5   :  { %4988 = shalt.err (!%p4985_p7)
}
0x17e6   :  { %3688 = dma.vmem_to_hbm [thread:$0]  %s3683_s26, 768, %s6312_s11, [#allocation4], %s5000_s27, %s5000_s27, %s5001_s28  }
0x17e7   :  { %4997 = dma.done.wait [#allocation4], 768  }
0x17e8   :  { %4998 = vsyncadd [#allocation4], 4294966528 }
0x17e9   :  { %3692 = vsyncpa [#allocation3], 1 }
0x17ea   :  { %3693 = vsyncpa [#allocation6], 1 }
0x17eb   :  { %3694 = vsyncpa [#allocation9], 1 }
0x17ec   :  { %3695 = vsyncpa [#allocation12], 1 }
0x17ed   :  { %3696 = vsyncpa [#allocation4], 1 }

</bundles_post_ra>
